<compile_context>
chip_gen: v6e
topology: v6e:2x2x1
jax: 0.10.0
libtpu: 0.0.40
codegen_flags: <defaults>
</compile_context>

<pallas_src>
import functools

import jax
import jax.numpy as jnp
from jax.experimental import pallas as pl
from jax.experimental.pallas import tpu as pltpu


def _round_up(x, m):
    return ((x + m - 1) // m) * m


def _pick_tile(n, cands):
    for c in cands:
        if n % c == 0:
            return c
    return n


@functools.lru_cache(maxsize=None)
def _vmem_limit_bytes():
    # ~3/4 of physical VMEM: ~96 MiB on v5e/v6e (128 MiB), 48 MiB on v7x (64 MiB).
    try:
        cap = int(pltpu.get_tpu_info().vmem_capacity_bytes)
    except Exception:
        cap = 64 << 20
    return int(min(cap * 3 // 4, 100 << 20))


def _compiler_params(sem):
    return pltpu.CompilerParams(dimension_semantics=sem,
                                vmem_limit_bytes=_vmem_limit_bytes())


# ----------------------------------------------------------------------------
# Fused 1x1-conv matmul + bias [+ residual] + ReLU (no K grid, no acc scratch)
# ----------------------------------------------------------------------------
def _mm_kernel(a_ref, w_ref, b_ref, o_ref, *, relu):
    y = jnp.dot(a_ref[...], w_ref[...], preferred_element_type=jnp.float32)
    y = y + b_ref[...]
    if relu:
        y = jnp.maximum(y, 0.0)
    o_ref[...] = y.astype(o_ref.dtype)


def _mm_res_kernel(a_ref, w_ref, b_ref, r_ref, o_ref, *, relu):
    y = jnp.dot(a_ref[...], w_ref[...], preferred_element_type=jnp.float32)
    y = y + b_ref[...] + r_ref[...].astype(jnp.float32)
    if relu:
        y = jnp.maximum(y, 0.0)
    o_ref[...] = y.astype(o_ref.dtype)


def fused_matmul_bias(a, wm, bias, residual=None, relu=True,
                      out_dtype=jnp.bfloat16):
    """out = relu_opt(a @ wm + bias [+ residual]).

    `a`: (M, K) bf16 with K already padded to match `wm` (K, Np) bf16
    (BN scale pre-folded into columns); `bias`: (1, Np) f32;
    `residual` (optional): (M, Np) bf16.  Single K step -> no f32 scratch.
    """
    M, K = a.shape
    Kp, Np = wm.shape
    assert K == Kp, (K, Kp)

    TM = _pick_tile(M, (512, 256, 128, 64, 32, 16, 8))
    TN = _pick_tile(Np, (256, 128))
    grid = (M // TM, Np // TN)

    in_specs = [
        pl.BlockSpec((TM, K), lambda i, j: (i, 0)),
        pl.BlockSpec((K, TN), lambda i, j: (0, j)),
        pl.BlockSpec((1, TN), lambda i, j: (0, j)),
    ]
    args = [a, wm, bias]
    if residual is not None:
        in_specs.append(pl.BlockSpec((TM, TN), lambda i, j: (i, j)))
        args.append(residual)
        kernel = functools.partial(_mm_res_kernel, relu=relu)
    else:
        kernel = functools.partial(_mm_kernel, relu=relu)

    res_bytes = residual.size * 2 if residual is not None else 0
    cost = pl.CostEstimate(
        flops=2 * M * K * Np,
        transcendentals=0,
        bytes_accessed=a.size * 2 + wm.size * 2 + M * Np * 2
        + bias.size * 4 + res_bytes)

    return pl.pallas_call(
        kernel,
        out_shape=jax.ShapeDtypeStruct((M, Np), out_dtype),
        grid=grid,
        in_specs=in_specs,
        out_specs=pl.BlockSpec((TM, TN), lambda i, j: (i, j)),
        compiler_params=_compiler_params(("parallel", "parallel")),
        cost_estimate=cost,
    )(*args)


def conv1x1_bn(x, p, stride=1, residual=None, relu=True):
    """1x1 conv + folded BN [+ residual] + ReLU on a (N,H,W,Cp) bf16 tensor."""
    if stride > 1:
        # 1x1 conv with stride s == spatial subsample then 1x1 stride-1 conv.
        x = x[:, ::stride, ::stride, :]
    n, h, w, c = x.shape
    a = x.reshape(n * h * w, c)                       # free reshape (row-major)
    r = (residual.reshape(n * h * w, residual.shape[-1])
         if residual is not None else None)
    out = fused_matmul_bias(a, p["wm"], p["bias"], residual=r, relu=relu)
    return out.reshape(n, h, w, p["coutp"])


# ----------------------------------------------------------------------------
# Implicit-im2col spatial conv (3x3 / 7x7): phase-split image resident in VMEM
# ----------------------------------------------------------------------------
def _make_phases(x, kh, kw, stride, pad, pad_value=0.0):
    """Pad spatially and split into stride*stride phase grids so every tap of
    the conv/pool becomes a contiguous, stride-1 window inside the kernel."""
    n, h, w, c = x.shape
    oh = (h + 2 * pad - kh) // stride + 1
    ow = (w + 2 * pad - kw) // stride + 1
    ph = oh + (kh - 1) // stride
    pw = ow + (kw - 1) // stride
    hp = max(h + 2 * pad, stride * ph)
    wp = max(w + 2 * pad, stride * pw)
    xp = jnp.pad(x, ((0, 0), (pad, hp - h - pad), (pad, wp - w - pad), (0, 0)),
                 constant_values=pad_value)
    if stride == 1:
        phases = xp[:, None]                                # (n,1,ph,pw,c)
    else:
        ps = [xp[:, a::stride, b::stride, :][:, :ph, :pw, :]
              for a in range(stride) for b in range(stride)]
        phases = jnp.stack(ps, axis=1)                      # (n,s*s,ph,pw,c)
    return phases, oh, ow, ph, pw


def _spatial_conv_kernel(x_ref, w_ref, b_ref, o_ref, *, kh, kw, stride, relu):
    # x_ref: (1, s*s, PH, PW, Cin)  whole phase-split image (VMEM resident)
    # w_ref: (kh*kw, Cin, TCO)      BN scale already folded into columns
    # b_ref: (1, TCO)
    # o_ref: (1, 1, OW, TCO)        one output row per grid step
    oh = pl.program_id(2)
    ow, tco = o_ref.shape[2], o_ref.shape[3]
    acc = jnp.zeros((ow, tco), jnp.float32)
    for i in range(kh):
        for j in range(kw):
            pidx = (i % stride) * stride + (j % stride)
            win = x_ref[0, pidx, oh + i // stride, pl.ds(j // stride, ow), :]
            acc = acc + jnp.dot(win, w_ref[i * kw + j],
                                preferred_element_type=jnp.float32)
    y = acc + b_ref[...]
    if relu:
        y = jnp.maximum(y, 0.0)
    o_ref[0, 0] = y.astype(o_ref.dtype)


def conv_spatial_bn(x, p, stride, pad, relu=True):
    kh, kw = p["kh"], p["kw"]
    phases, oh, ow, ph, pw = _make_phases(x, kh, kw, stride, pad)
    n, nph, _, _, cin = phases.shape
    assert cin == p["wm"].shape[1], (cin, p["wm"].shape)
    coutp = p["coutp"]
    tco = _pick_tile(coutp, (256, 128))
    grid = (n, coutp // tco, oh)

    cost = pl.CostEstimate(
        flops=2 * n * oh * ow * kh * kw * cin * coutp,
        transcendentals=0,
        bytes_accessed=(phases.size + p["wm"].size + n * oh * ow * coutp) * 2)

    return pl.pallas_call(
        functools.partial(_spatial_conv_kernel, kh=kh, kw=kw, stride=stride,
                          relu=relu),
        out_shape=jax.ShapeDtypeStruct((n, oh, ow, coutp), jnp.bfloat16),
        grid=grid,
        in_specs=[
            pl.BlockSpec((1, nph, ph, pw, cin),
                         lambda nn, cc, oo: (nn, 0, 0, 0, 0)),
            pl.BlockSpec((kh * kw, cin, tco), lambda nn, cc, oo: (0, 0, cc)),
            pl.BlockSpec((1, tco), lambda nn, cc, oo: (0, cc)),
        ],
        out_specs=pl.BlockSpec((1, 1, ow, tco),
                               lambda nn, cc, oo: (nn, oo, 0, cc)),
        compiler_params=_compiler_params(("parallel", "parallel", "parallel")),
        cost_estimate=cost,
    )(phases, p["wm"], p["bias"])


# ----------------------------------------------------------------------------
# MaxPool (same phase machinery, no (k*k, M, C) HBM window stack)
# ----------------------------------------------------------------------------
def _maxpool_kernel(x_ref, o_ref, *, k, stride):
    oh = pl.program_id(1)
    ow = o_ref.shape[2]
    acc = None
    for i in range(k):
        for j in range(k):
            pidx = (i % stride) * stride + (j % stride)
            win = x_ref[0, pidx, oh + i // stride, pl.ds(j // stride, ow), :]
            acc = win if acc is None else jnp.maximum(acc, win)
    o_ref[0, 0] = acc


def maxpool_nhwc(x, k=3, stride=2, pad=1):
    phases, oh, ow, ph, pw = _make_phases(x, k, k, stride, pad,
                                          pad_value=-jnp.inf)
    n, nph, _, _, c = phases.shape
    return pl.pallas_call(
        functools.partial(_maxpool_kernel, k=k, stride=stride),
        out_shape=jax.ShapeDtypeStruct((n, oh, ow, c), x.dtype),
        grid=(n, oh),
        in_specs=[pl.BlockSpec((1, nph, ph, pw, c),
                               lambda nn, oo: (nn, 0, 0, 0, 0))],
        out_specs=pl.BlockSpec((1, 1, ow, c), lambda nn, oo: (nn, oo, 0, 0)),
        compiler_params=_compiler_params(("parallel", "parallel")),
    )(phases)


# ----------------------------------------------------------------------------
# Fused global average pool + FC head (f32 throughout)
# ----------------------------------------------------------------------------
def _avgpool_fc_kernel(x_ref, w_ref, b_ref, o_ref):
    pooled = jnp.mean(x_ref[...].astype(jnp.float32), axis=1)       # (N, C) f32
    o_ref[...] = (jnp.dot(pooled, w_ref[...],
                          preferred_element_type=jnp.float32) + b_ref[...])


def avgpool_fc(x, fc_w, fc_b, num_classes):
    n, h, w, c = x.shape
    xr = x.reshape(n, h * w, c)
    out = pl.pallas_call(
        _avgpool_fc_kernel,
        out_shape=jax.ShapeDtypeStruct((n, fc_w.shape[1]), jnp.float32),
    )(xr, fc_w, fc_b)
    return out[:, :num_classes]


# ----------------------------------------------------------------------------
# Parameters: deterministic synthetic init, BN folded, weights pre-packed
# ----------------------------------------------------------------------------
def init_params(key, image_channels=3, num_classes=5, eps=1e-5):
    keys = iter(jax.random.split(key, 128))

    def conv_bn_p(kh, kw, cin, cout, cin_pad):
        w = jax.random.normal(next(keys), (kh, kw, cin, cout), jnp.float32)
        w = w * jnp.sqrt(2.0 / (kh * kw * cin))
        conv_b = jnp.zeros((cout,), jnp.float32)      # Conv2d bias
        gamma = jnp.ones((cout,), jnp.float32)        # BN weight
        beta = jnp.zeros((cout,), jnp.float32)        # BN bias
        r_mean = jnp.zeros((cout,), jnp.float32)
        r_var = jnp.ones((cout,), jnp.float32)
        scale = gamma / jnp.sqrt(r_var + eps)
        bias = beta + scale * (conv_b - r_mean)
        coutp = _round_up(cout, 128)
        # Fold the BN scale directly into the weight columns (review item).
        w_sc = (w * scale[None, None, None, :]).astype(jnp.bfloat16)
        if kh == 1 and kw == 1:
            wm = jnp.zeros((cin_pad, coutp), jnp.bfloat16)
            wm = wm.at[:cin, :cout].set(w_sc.reshape(cin, cout))
        else:
            wm = jnp.zeros((kh * kw, cin_pad, coutp), jnp.bfloat16)
            wm = wm.at[:, :cin, :cout].set(w_sc.reshape(kh * kw, cin, cout))
        bias_p = jnp.zeros((1, coutp), jnp.float32).at[0, :cout].set(bias)
        return {"wm": wm, "bias": bias_p, "kh": kh, "kw": kw,
                "cout": cout, "coutp": coutp}

    stem_cinp = _round_up(image_channels, 128)
    params = {"stem": conv_bn_p(7, 7, image_channels, 64, stem_cinp)}

    layer_cfg = [(64, 3, 1), (128, 4, 2), (256, 6, 2), (512, 3, 2)]
    in_ch = 64
    layers = []
    for c, n_blocks, stride in layer_cfg:
        blocks = []
        for b in range(n_blocks):
            s = stride if b == 0 else 1
            blk = {
                "c1": conv_bn_p(1, 1, in_ch, c, _round_up(in_ch, 128)),
                "c2": conv_bn_p(3, 3, c, c, _round_up(c, 128)),
                "c3": conv_bn_p(1, 1, c, 4 * c, _round_up(c, 128)),
                "down": (conv_bn_p(1, 1, in_ch, 4 * c, _round_up(in_ch, 128))
                         if b == 0 else None),
                "stride": s,
            }
            in_ch = 4 * c
            blocks.append(blk)
        layers.append(blocks)
    params["layers"] = layers

    fc_in = 512 * 4
    fc_w = (jax.random.normal(next(keys), (fc_in, num_classes), jnp.float32)
            * jnp.sqrt(1.0 / fc_in))
    fc_b = jax.random.normal(next(keys), (num_classes,), jnp.float32) * 0.01
    npad = _round_up(num_classes, 128)
    params["fc_w"] = (jnp.zeros((fc_in, npad), jnp.float32)
                      .at[:, :num_classes].set(fc_w))
    params["fc_b"] = (jnp.zeros((1, npad), jnp.float32)
                      .at[0, :num_classes].set(fc_b))
    params["num_classes"] = num_classes
    return params


# ----------------------------------------------------------------------------
# Model forward
# ----------------------------------------------------------------------------
def block_forward(x, blk):
    identity = x
    out = conv1x1_bn(x, blk["c1"], stride=1, relu=True)
    out = conv_spatial_bn(out, blk["c2"], stride=blk["stride"], pad=1,
                          relu=True)
    if blk["down"] is not None:
        identity = conv1x1_bn(x, blk["down"], stride=blk["stride"], relu=False)
    # conv3 + folded BN + residual add + ReLU fused in one kernel epilogue.
    out = conv1x1_bn(out, blk["c3"], stride=1, residual=identity, relu=True)
    return out


def resnet50_forward(x_nchw, params):
    # NCHW f32 -> NHWC bf16; channels padded to the stem's packed Cin once.
    x = jnp.transpose(x_nchw, (0, 2, 3, 1)).astype(jnp.bfloat16)
    stem_cinp = params["stem"]["wm"].shape[1]
    if x.shape[-1] != stem_cinp:
        x = jnp.pad(x, ((0, 0), (0, 0), (0, 0), (0, stem_cinp - x.shape[-1])))
    x = conv_spatial_bn(x, params["stem"], stride=2, pad=3, relu=True)
    x = maxpool_nhwc(x, k=3, stride=2, pad=1)
    for layer in params["layers"]:
        for blk in layer:
            x = block_forward(x, blk)
    return avgpool_fc(x, params["fc_w"], params["fc_b"],
                      params["num_classes"])


if __name__ == "__main__":
    key = jax.random.PRNGKey(0)
    pkey, xkey = jax.random.split(key)
    params = init_params(pkey, image_channels=3, num_classes=5)
    x = jax.random.normal(xkey, (2, 3, 32, 32), jnp.float32)  # small NCHW input
    logits = resnet50_forward(x, params)
    logits = jax.block_until_ready(logits)
    assert logits.shape == (2, 5)
    assert bool(jnp.all(jnp.isfinite(logits)))
    print("KERNEL_OK")
</pallas_src>

<mosaic_0001>
module attributes {stable_mosaic.version = 11 : i64} {
  func.func @_spatial_conv_kernel(%arg0: i32, %arg1: i32, %arg2: i32, %arg3: memref<1x4x19x19x128xbf16, #tpu.memory_space<vmem>>, %arg4: memref<49x128x128xbf16, #tpu.memory_space<vmem>>, %arg5: memref<1x128xf32, #tpu.memory_space<vmem>>, %arg6: memref<1x1x16x128xbf16, #tpu.memory_space<vmem>>) attributes {dimension_semantics = [#tpu.dimension_semantics<parallel>, #tpu.dimension_semantics<parallel>, #tpu.dimension_semantics<parallel>], iteration_bounds = array<i64: 2, 1, 16>, scalar_prefetch = 0 : i64, scratch_operands = 0 : i64, tpu.core_type = #tpu.core_type<tc>, window_params = [{transform_indices = @transform_0, window_bounds = array<i64: 1, 4, 19, 19, 128>}, {transform_indices = @transform_1, window_bounds = array<i64: 49, 128, 128>}, {transform_indices = @transform_2, window_bounds = array<i64: 1, 128>}, {transform_indices = @transform_3, window_bounds = array<i64: 1, 1, 16, 128>}]} {
    %cst = arith.constant 0.000000e+00 : f32
    %0 = vector.broadcast %cst : f32 to vector<16x128xf32>
    %c0_i32 = arith.constant 0 : i32
    %1 = arith.addi %arg2, %c0_i32 : i32
    %c0 = arith.constant 0 : index
    %c0_0 = arith.constant 0 : index
    %2 = arith.index_cast %1 : i32 to index
    %c0_1 = arith.constant 0 : index
    %c0_2 = arith.constant 0 : index
    %3 = vector.load %arg3[%c0, %c0_0, %2, %c0_1, %c0_2] : memref<1x4x19x19x128xbf16, #tpu.memory_space<vmem>>, vector<1x1x1x16x128xbf16>
    %4 = vector.shape_cast %3 : vector<1x1x1x16x128xbf16> to vector<16x128xbf16>
    %c0_3 = arith.constant 0 : index
    %c0_4 = arith.constant 0 : index
    %c0_5 = arith.constant 0 : index
    %5 = vector.load %arg4[%c0_3, %c0_4, %c0_5] : memref<49x128x128xbf16, #tpu.memory_space<vmem>>, vector<1x128x128xbf16>
    %6 = vector.shape_cast %5 : vector<1x128x128xbf16> to vector<128x128xbf16>
    %cst_6 = arith.constant dense<0.000000e+00> : vector<16x128xf32>
    %7 = tpu.matmul %4, %6, %cst_6 {dimension_numbers = #tpu.dot_dimension_numbers<[1], [0], [0], [1], [0, 0, 1, 1], [], []>} : vector<16x128xbf16>, vector<128x128xbf16>, vector<16x128xf32> -> vector<16x128xf32>
    %8 = arith.addf %0, %7 : vector<16x128xf32>
    %c0_i32_7 = arith.constant 0 : i32
    %9 = arith.addi %arg2, %c0_i32_7 : i32
    %c0_8 = arith.constant 0 : index
    %c1 = arith.constant 1 : index
    %10 = arith.index_cast %9 : i32 to index
    %c0_9 = arith.constant 0 : index
    %c0_10 = arith.constant 0 : index
    %11 = vector.load %arg3[%c0_8, %c1, %10, %c0_9, %c0_10] : memref<1x4x19x19x128xbf16, #tpu.memory_space<vmem>>, vector<1x1x1x16x128xbf16>
    %12 = vector.shape_cast %11 : vector<1x1x1x16x128xbf16> to vector<16x128xbf16>
    %c1_11 = arith.constant 1 : index
    %c0_12 = arith.constant 0 : index
    %c0_13 = arith.constant 0 : index
    %13 = vector.load %arg4[%c1_11, %c0_12, %c0_13] : memref<49x128x128xbf16, #tpu.memory_space<vmem>>, vector<1x128x128xbf16>
    %14 = vector.shape_cast %13 : vector<1x128x128xbf16> to vector<128x128xbf16>
    %cst_14 = arith.constant dense<0.000000e+00> : vector<16x128xf32>
    %15 = tpu.matmul %12, %14, %cst_14 {dimension_numbers = #tpu.dot_dimension_numbers<[1], [0], [0], [1], [0, 0, 1, 1], [], []>} : vector<16x128xbf16>, vector<128x128xbf16>, vector<16x128xf32> -> vector<16x128xf32>
    %16 = arith.addf %8, %15 : vector<16x128xf32>
    %c0_i32_15 = arith.constant 0 : i32
    %17 = arith.addi %arg2, %c0_i32_15 : i32
    %c0_16 = arith.constant 0 : index
    %c0_17 = arith.constant 0 : index
    %18 = arith.index_cast %17 : i32 to index
    %c1_18 = arith.constant 1 : index
    %c0_19 = arith.constant 0 : index
    %19 = vector.load %arg3[%c0_16, %c0_17, %18, %c1_18, %c0_19] : memref<1x4x19x19x128xbf16, #tpu.memory_space<vmem>>, vector<1x1x1x16x128xbf16>
    %20 = vector.shape_cast %19 : vector<1x1x1x16x128xbf16> to vector<16x128xbf16>
    %c2 = arith.constant 2 : index
    %c0_20 = arith.constant 0 : index
    %c0_21 = arith.constant 0 : index
    %21 = vector.load %arg4[%c2, %c0_20, %c0_21] : memref<49x128x128xbf16, #tpu.memory_space<vmem>>, vector<1x128x128xbf16>
    %22 = vector.shape_cast %21 : vector<1x128x128xbf16> to vector<128x128xbf16>
    %cst_22 = arith.constant dense<0.000000e+00> : vector<16x128xf32>
    %23 = tpu.matmul %20, %22, %cst_22 {dimension_numbers = #tpu.dot_dimension_numbers<[1], [0], [0], [1], [0, 0, 1, 1], [], []>} : vector<16x128xbf16>, vector<128x128xbf16>, vector<16x128xf32> -> vector<16x128xf32>
    %24 = arith.addf %16, %23 : vector<16x128xf32>
    %c0_i32_23 = arith.constant 0 : i32
    %25 = arith.addi %arg2, %c0_i32_23 : i32
    %c0_24 = arith.constant 0 : index
    %c1_25 = arith.constant 1 : index
    %26 = arith.index_cast %25 : i32 to index
    %c1_26 = arith.constant 1 : index
    %c0_27 = arith.constant 0 : index
    %27 = vector.load %arg3[%c0_24, %c1_25, %26, %c1_26, %c0_27] : memref<1x4x19x19x128xbf16, #tpu.memory_space<vmem>>, vector<1x1x1x16x128xbf16>
    %28 = vector.shape_cast %27 : vector<1x1x1x16x128xbf16> to vector<16x128xbf16>
    %c3 = arith.constant 3 : index
    %c0_28 = arith.constant 0 : index
    %c0_29 = arith.constant 0 : index
    %29 = vector.load %arg4[%c3, %c0_28, %c0_29] : memref<49x128x128xbf16, #tpu.memory_space<vmem>>, vector<1x128x128xbf16>
    %30 = vector.shape_cast %29 : vector<1x128x128xbf16> to vector<128x128xbf16>
    %cst_30 = arith.constant dense<0.000000e+00> : vector<16x128xf32>
    %31 = tpu.matmul %28, %30, %cst_30 {dimension_numbers = #tpu.dot_dimension_numbers<[1], [0], [0], [1], [0, 0, 1, 1], [], []>} : vector<16x128xbf16>, vector<128x128xbf16>, vector<16x128xf32> -> vector<16x128xf32>
    %32 = arith.addf %24, %31 : vector<16x128xf32>
    %c0_i32_31 = arith.constant 0 : i32
    %33 = arith.addi %arg2, %c0_i32_31 : i32
    %c0_32 = arith.constant 0 : index
    %c0_33 = arith.constant 0 : index
    %34 = arith.index_cast %33 : i32 to index
    %c2_34 = arith.constant 2 : index
    %c0_35 = arith.constant 0 : index
    %35 = vector.load %arg3[%c0_32, %c0_33, %34, %c2_34, %c0_35] : memref<1x4x19x19x128xbf16, #tpu.memory_space<vmem>>, vector<1x1x1x16x128xbf16>
    %36 = vector.shape_cast %35 : vector<1x1x1x16x128xbf16> to vector<16x128xbf16>
    %c4 = arith.constant 4 : index
    %c0_36 = arith.constant 0 : index
    %c0_37 = arith.constant 0 : index
    %37 = vector.load %arg4[%c4, %c0_36, %c0_37] : memref<49x128x128xbf16, #tpu.memory_space<vmem>>, vector<1x128x128xbf16>
    %38 = vector.shape_cast %37 : vector<1x128x128xbf16> to vector<128x128xbf16>
    %cst_38 = arith.constant dense<0.000000e+00> : vector<16x128xf32>
    %39 = tpu.matmul %36, %38, %cst_38 {dimension_numbers = #tpu.dot_dimension_numbers<[1], [0], [0], [1], [0, 0, 1, 1], [], []>} : vector<16x128xbf16>, vector<128x128xbf16>, vector<16x128xf32> -> vector<16x128xf32>
    %40 = arith.addf %32, %39 : vector<16x128xf32>
    %c0_i32_39 = arith.constant 0 : i32
    %41 = arith.addi %arg2, %c0_i32_39 : i32
    %c0_40 = arith.constant 0 : index
    %c1_41 = arith.constant 1 : index
    %42 = arith.index_cast %41 : i32 to index
    %c2_42 = arith.constant 2 : index
    %c0_43 = arith.constant 0 : index
    %43 = vector.load %arg3[%c0_40, %c1_41, %42, %c2_42, %c0_43] : memref<1x4x19x19x128xbf16, #tpu.memory_space<vmem>>, vector<1x1x1x16x128xbf16>
    %44 = vector.shape_cast %43 : vector<1x1x1x16x128xbf16> to vector<16x128xbf16>
    %c5 = arith.constant 5 : index
    %c0_44 = arith.constant 0 : index
    %c0_45 = arith.constant 0 : index
    %45 = vector.load %arg4[%c5, %c0_44, %c0_45] : memref<49x128x128xbf16, #tpu.memory_space<vmem>>, vector<1x128x128xbf16>
    %46 = vector.shape_cast %45 : vector<1x128x128xbf16> to vector<128x128xbf16>
    %cst_46 = arith.constant dense<0.000000e+00> : vector<16x128xf32>
    %47 = tpu.matmul %44, %46, %cst_46 {dimension_numbers = #tpu.dot_dimension_numbers<[1], [0], [0], [1], [0, 0, 1, 1], [], []>} : vector<16x128xbf16>, vector<128x128xbf16>, vector<16x128xf32> -> vector<16x128xf32>
    %48 = arith.addf %40, %47 : vector<16x128xf32>
    %c0_i32_47 = arith.constant 0 : i32
    %49 = arith.addi %arg2, %c0_i32_47 : i32
    %c0_48 = arith.constant 0 : index
    %c0_49 = arith.constant 0 : index
    %50 = arith.index_cast %49 : i32 to index
    %c3_50 = arith.constant 3 : index
    %c0_51 = arith.constant 0 : index
    %51 = vector.load %arg3[%c0_48, %c0_49, %50, %c3_50, %c0_51] : memref<1x4x19x19x128xbf16, #tpu.memory_space<vmem>>, vector<1x1x1x16x128xbf16>
    %52 = vector.shape_cast %51 : vector<1x1x1x16x128xbf16> to vector<16x128xbf16>
    %c6 = arith.constant 6 : index
    %c0_52 = arith.constant 0 : index
    %c0_53 = arith.constant 0 : index
    %53 = vector.load %arg4[%c6, %c0_52, %c0_53] : memref<49x128x128xbf16, #tpu.memory_space<vmem>>, vector<1x128x128xbf16>
    %54 = vector.shape_cast %53 : vector<1x128x128xbf16> to vector<128x128xbf16>
    %cst_54 = arith.constant dense<0.000000e+00> : vector<16x128xf32>
    %55 = tpu.matmul %52, %54, %cst_54 {dimension_numbers = #tpu.dot_dimension_numbers<[1], [0], [0], [1], [0, 0, 1, 1], [], []>} : vector<16x128xbf16>, vector<128x128xbf16>, vector<16x128xf32> -> vector<16x128xf32>
    %56 = arith.addf %48, %55 : vector<16x128xf32>
    %c0_i32_55 = arith.constant 0 : i32
    %57 = arith.addi %arg2, %c0_i32_55 : i32
    %c0_56 = arith.constant 0 : index
    %c2_57 = arith.constant 2 : index
    %58 = arith.index_cast %57 : i32 to index
    %c0_58 = arith.constant 0 : index
    %c0_59 = arith.constant 0 : index
    %59 = vector.load %arg3[%c0_56, %c2_57, %58, %c0_58, %c0_59] : memref<1x4x19x19x128xbf16, #tpu.memory_space<vmem>>, vector<1x1x1x16x128xbf16>
    %60 = vector.shape_cast %59 : vector<1x1x1x16x128xbf16> to vector<16x128xbf16>
    %c7 = arith.constant 7 : index
    %c0_60 = arith.constant 0 : index
    %c0_61 = arith.constant 0 : index
    %61 = vector.load %arg4[%c7, %c0_60, %c0_61] : memref<49x128x128xbf16, #tpu.memory_space<vmem>>, vector<1x128x128xbf16>
    %62 = vector.shape_cast %61 : vector<1x128x128xbf16> to vector<128x128xbf16>
    %cst_62 = arith.constant dense<0.000000e+00> : vector<16x128xf32>
    %63 = tpu.matmul %60, %62, %cst_62 {dimension_numbers = #tpu.dot_dimension_numbers<[1], [0], [0], [1], [0, 0, 1, 1], [], []>} : vector<16x128xbf16>, vector<128x128xbf16>, vector<16x128xf32> -> vector<16x128xf32>
    %64 = arith.addf %56, %63 : vector<16x128xf32>
    %c0_i32_63 = arith.constant 0 : i32
    %65 = arith.addi %arg2, %c0_i32_63 : i32
    %c0_64 = arith.constant 0 : index
    %c3_65 = arith.constant 3 : index
    %66 = arith.index_cast %65 : i32 to index
    %c0_66 = arith.constant 0 : index
    %c0_67 = arith.constant 0 : index
    %67 = vector.load %arg3[%c0_64, %c3_65, %66, %c0_66, %c0_67] : memref<1x4x19x19x128xbf16, #tpu.memory_space<vmem>>, vector<1x1x1x16x128xbf16>
    %68 = vector.shape_cast %67 : vector<1x1x1x16x128xbf16> to vector<16x128xbf16>
    %c8 = arith.constant 8 : index
    %c0_68 = arith.constant 0 : index
    %c0_69 = arith.constant 0 : index
    %69 = vector.load %arg4[%c8, %c0_68, %c0_69] : memref<49x128x128xbf16, #tpu.memory_space<vmem>>, vector<1x128x128xbf16>
    %70 = vector.shape_cast %69 : vector<1x128x128xbf16> to vector<128x128xbf16>
    %cst_70 = arith.constant dense<0.000000e+00> : vector<16x128xf32>
    %71 = tpu.matmul %68, %70, %cst_70 {dimension_numbers = #tpu.dot_dimension_numbers<[1], [0], [0], [1], [0, 0, 1, 1], [], []>} : vector<16x128xbf16>, vector<128x128xbf16>, vector<16x128xf32> -> vector<16x128xf32>
    %72 = arith.addf %64, %71 : vector<16x128xf32>
    %c0_i32_71 = arith.constant 0 : i32
    %73 = arith.addi %arg2, %c0_i32_71 : i32
    %c0_72 = arith.constant 0 : index
    %c2_73 = arith.constant 2 : index
    %74 = arith.index_cast %73 : i32 to index
    %c1_74 = arith.constant 1 : index
    %c0_75 = arith.constant 0 : index
    %75 = vector.load %arg3[%c0_72, %c2_73, %74, %c1_74, %c0_75] : memref<1x4x19x19x128xbf16, #tpu.memory_space<vmem>>, vector<1x1x1x16x128xbf16>
    %76 = vector.shape_cast %75 : vector<1x1x1x16x128xbf16> to vector<16x128xbf16>
    %c9 = arith.constant 9 : index
    %c0_76 = arith.constant 0 : index
    %c0_77 = arith.constant 0 : index
    %77 = vector.load %arg4[%c9, %c0_76, %c0_77] : memref<49x128x128xbf16, #tpu.memory_space<vmem>>, vector<1x128x128xbf16>
    %78 = vector.shape_cast %77 : vector<1x128x128xbf16> to vector<128x128xbf16>
    %cst_78 = arith.constant dense<0.000000e+00> : vector<16x128xf32>
    %79 = tpu.matmul %76, %78, %cst_78 {dimension_numbers = #tpu.dot_dimension_numbers<[1], [0], [0], [1], [0, 0, 1, 1], [], []>} : vector<16x128xbf16>, vector<128x128xbf16>, vector<16x128xf32> -> vector<16x128xf32>
    %80 = arith.addf %72, %79 : vector<16x128xf32>
    %c0_i32_79 = arith.constant 0 : i32
    %81 = arith.addi %arg2, %c0_i32_79 : i32
    %c0_80 = arith.constant 0 : index
    %c3_81 = arith.constant 3 : index
    %82 = arith.index_cast %81 : i32 to index
    %c1_82 = arith.constant 1 : index
    %c0_83 = arith.constant 0 : index
    %83 = vector.load %arg3[%c0_80, %c3_81, %82, %c1_82, %c0_83] : memref<1x4x19x19x128xbf16, #tpu.memory_space<vmem>>, vector<1x1x1x16x128xbf16>
    %84 = vector.shape_cast %83 : vector<1x1x1x16x128xbf16> to vector<16x128xbf16>
    %c10 = arith.constant 10 : index
    %c0_84 = arith.constant 0 : index
    %c0_85 = arith.constant 0 : index
    %85 = vector.load %arg4[%c10, %c0_84, %c0_85] : memref<49x128x128xbf16, #tpu.memory_space<vmem>>, vector<1x128x128xbf16>
    %86 = vector.shape_cast %85 : vector<1x128x128xbf16> to vector<128x128xbf16>
    %cst_86 = arith.constant dense<0.000000e+00> : vector<16x128xf32>
    %87 = tpu.matmul %84, %86, %cst_86 {dimension_numbers = #tpu.dot_dimension_numbers<[1], [0], [0], [1], [0, 0, 1, 1], [], []>} : vector<16x128xbf16>, vector<128x128xbf16>, vector<16x128xf32> -> vector<16x128xf32>
    %88 = arith.addf %80, %87 : vector<16x128xf32>
    %c0_i32_87 = arith.constant 0 : i32
    %89 = arith.addi %arg2, %c0_i32_87 : i32
    %c0_88 = arith.constant 0 : index
    %c2_89 = arith.constant 2 : index
    %90 = arith.index_cast %89 : i32 to index
    %c2_90 = arith.constant 2 : index
    %c0_91 = arith.constant 0 : index
    %91 = vector.load %arg3[%c0_88, %c2_89, %90, %c2_90, %c0_91] : memref<1x4x19x19x128xbf16, #tpu.memory_space<vmem>>, vector<1x1x1x16x128xbf16>
    %92 = vector.shape_cast %91 : vector<1x1x1x16x128xbf16> to vector<16x128xbf16>
    %c11 = arith.constant 11 : index
    %c0_92 = arith.constant 0 : index
    %c0_93 = arith.constant 0 : index
    %93 = vector.load %arg4[%c11, %c0_92, %c0_93] : memref<49x128x128xbf16, #tpu.memory_space<vmem>>, vector<1x128x128xbf16>
    %94 = vector.shape_cast %93 : vector<1x128x128xbf16> to vector<128x128xbf16>
    %cst_94 = arith.constant dense<0.000000e+00> : vector<16x128xf32>
    %95 = tpu.matmul %92, %94, %cst_94 {dimension_numbers = #tpu.dot_dimension_numbers<[1], [0], [0], [1], [0, 0, 1, 1], [], []>} : vector<16x128xbf16>, vector<128x128xbf16>, vector<16x128xf32> -> vector<16x128xf32>
    %96 = arith.addf %88, %95 : vector<16x128xf32>
    %c0_i32_95 = arith.constant 0 : i32
    %97 = arith.addi %arg2, %c0_i32_95 : i32
    %c0_96 = arith.constant 0 : index
    %c3_97 = arith.constant 3 : index
    %98 = arith.index_cast %97 : i32 to index
    %c2_98 = arith.constant 2 : index
    %c0_99 = arith.constant 0 : index
    %99 = vector.load %arg3[%c0_96, %c3_97, %98, %c2_98, %c0_99] : memref<1x4x19x19x128xbf16, #tpu.memory_space<vmem>>, vector<1x1x1x16x128xbf16>
    %100 = vector.shape_cast %99 : vector<1x1x1x16x128xbf16> to vector<16x128xbf16>
    %c12 = arith.constant 12 : index
    %c0_100 = arith.constant 0 : index
    %c0_101 = arith.constant 0 : index
    %101 = vector.load %arg4[%c12, %c0_100, %c0_101] : memref<49x128x128xbf16, #tpu.memory_space<vmem>>, vector<1x128x128xbf16>
    %102 = vector.shape_cast %101 : vector<1x128x128xbf16> to vector<128x128xbf16>
    %cst_102 = arith.constant dense<0.000000e+00> : vector<16x128xf32>
    %103 = tpu.matmul %100, %102, %cst_102 {dimension_numbers = #tpu.dot_dimension_numbers<[1], [0], [0], [1], [0, 0, 1, 1], [], []>} : vector<16x128xbf16>, vector<128x128xbf16>, vector<16x128xf32> -> vector<16x128xf32>
    %104 = arith.addf %96, %103 : vector<16x128xf32>
    %c0_i32_103 = arith.constant 0 : i32
    %105 = arith.addi %arg2, %c0_i32_103 : i32
    %c0_104 = arith.constant 0 : index
    %c2_105 = arith.constant 2 : index
    %106 = arith.index_cast %105 : i32 to index
    %c3_106 = arith.constant 3 : index
    %c0_107 = arith.constant 0 : index
    %107 = vector.load %arg3[%c0_104, %c2_105, %106, %c3_106, %c0_107] : memref<1x4x19x19x128xbf16, #tpu.memory_space<vmem>>, vector<1x1x1x16x128xbf16>
    %108 = vector.shape_cast %107 : vector<1x1x1x16x128xbf16> to vector<16x128xbf16>
    %c13 = arith.constant 13 : index
    %c0_108 = arith.constant 0 : index
    %c0_109 = arith.constant 0 : index
    %109 = vector.load %arg4[%c13, %c0_108, %c0_109] : memref<49x128x128xbf16, #tpu.memory_space<vmem>>, vector<1x128x128xbf16>
    %110 = vector.shape_cast %109 : vector<1x128x128xbf16> to vector<128x128xbf16>
    %cst_110 = arith.constant dense<0.000000e+00> : vector<16x128xf32>
    %111 = tpu.matmul %108, %110, %cst_110 {dimension_numbers = #tpu.dot_dimension_numbers<[1], [0], [0], [1], [0, 0, 1, 1], [], []>} : vector<16x128xbf16>, vector<128x128xbf16>, vector<16x128xf32> -> vector<16x128xf32>
    %112 = arith.addf %104, %111 : vector<16x128xf32>
    %c1_i32 = arith.constant 1 : i32
    %113 = arith.addi %arg2, %c1_i32 : i32
    %c0_111 = arith.constant 0 : index
    %c0_112 = arith.constant 0 : index
    %114 = arith.index_cast %113 : i32 to index
    %c0_113 = arith.constant 0 : index
    %c0_114 = arith.constant 0 : index
    %115 = vector.load %arg3[%c0_111, %c0_112, %114, %c0_113, %c0_114] : memref<1x4x19x19x128xbf16, #tpu.memory_space<vmem>>, vector<1x1x1x16x128xbf16>
    %116 = vector.shape_cast %115 : vector<1x1x1x16x128xbf16> to vector<16x128xbf16>
    %c14 = arith.constant 14 : index
    %c0_115 = arith.constant 0 : index
    %c0_116 = arith.constant 0 : index
    %117 = vector.load %arg4[%c14, %c0_115, %c0_116] : memref<49x128x128xbf16, #tpu.memory_space<vmem>>, vector<1x128x128xbf16>
    %118 = vector.shape_cast %117 : vector<1x128x128xbf16> to vector<128x128xbf16>
    %cst_117 = arith.constant dense<0.000000e+00> : vector<16x128xf32>
    %119 = tpu.matmul %116, %118, %cst_117 {dimension_numbers = #tpu.dot_dimension_numbers<[1], [0], [0], [1], [0, 0, 1, 1], [], []>} : vector<16x128xbf16>, vector<128x128xbf16>, vector<16x128xf32> -> vector<16x128xf32>
    %120 = arith.addf %112, %119 : vector<16x128xf32>
    %c1_i32_118 = arith.constant 1 : i32
    %121 = arith.addi %arg2, %c1_i32_118 : i32
    %c0_119 = arith.constant 0 : index
    %c1_120 = arith.constant 1 : index
    %122 = arith.index_cast %121 : i32 to index
    %c0_121 = arith.constant 0 : index
    %c0_122 = arith.constant 0 : index
    %123 = vector.load %arg3[%c0_119, %c1_120, %122, %c0_121, %c0_122] : memref<1x4x19x19x128xbf16, #tpu.memory_space<vmem>>, vector<1x1x1x16x128xbf16>
    %124 = vector.shape_cast %123 : vector<1x1x1x16x128xbf16> to vector<16x128xbf16>
    %c15 = arith.constant 15 : index
    %c0_123 = arith.constant 0 : index
    %c0_124 = arith.constant 0 : index
    %125 = vector.load %arg4[%c15, %c0_123, %c0_124] : memref<49x128x128xbf16, #tpu.memory_space<vmem>>, vector<1x128x128xbf16>
    %126 = vector.shape_cast %125 : vector<1x128x128xbf16> to vector<128x128xbf16>
    %cst_125 = arith.constant dense<0.000000e+00> : vector<16x128xf32>
    %127 = tpu.matmul %124, %126, %cst_125 {dimension_numbers = #tpu.dot_dimension_numbers<[1], [0], [0], [1], [0, 0, 1, 1], [], []>} : vector<16x128xbf16>, vector<128x128xbf16>, vector<16x128xf32> -> vector<16x128xf32>
    %128 = arith.addf %120, %127 : vector<16x128xf32>
    %c1_i32_126 = arith.constant 1 : i32
    %129 = arith.addi %arg2, %c1_i32_126 : i32
    %c0_127 = arith.constant 0 : index
    %c0_128 = arith.constant 0 : index
    %130 = arith.index_cast %129 : i32 to index
    %c1_129 = arith.constant 1 : index
    %c0_130 = arith.constant 0 : index
    %131 = vector.load %arg3[%c0_127, %c0_128, %130, %c1_129, %c0_130] : memref<1x4x19x19x128xbf16, #tpu.memory_space<vmem>>, vector<1x1x1x16x128xbf16>
    %132 = vector.shape_cast %131 : vector<1x1x1x16x128xbf16> to vector<16x128xbf16>
    %c16 = arith.constant 16 : index
    %c0_131 = arith.constant 0 : index
    %c0_132 = arith.constant 0 : index
    %133 = vector.load %arg4[%c16, %c0_131, %c0_132] : memref<49x128x128xbf16, #tpu.memory_space<vmem>>, vector<1x128x128xbf16>
    %134 = vector.shape_cast %133 : vector<1x128x128xbf16> to vector<128x128xbf16>
    %cst_133 = arith.constant dense<0.000000e+00> : vector<16x128xf32>
    %135 = tpu.matmul %132, %134, %cst_133 {dimension_numbers = #tpu.dot_dimension_numbers<[1], [0], [0], [1], [0, 0, 1, 1], [], []>} : vector<16x128xbf16>, vector<128x128xbf16>, vector<16x128xf32> -> vector<16x128xf32>
    %136 = arith.addf %128, %135 : vector<16x128xf32>
    %c1_i32_134 = arith.constant 1 : i32
    %137 = arith.addi %arg2, %c1_i32_134 : i32
    %c0_135 = arith.constant 0 : index
    %c1_136 = arith.constant 1 : index
    %138 = arith.index_cast %137 : i32 to index
    %c1_137 = arith.constant 1 : index
    %c0_138 = arith.constant 0 : index
    %139 = vector.load %arg3[%c0_135, %c1_136, %138, %c1_137, %c0_138] : memref<1x4x19x19x128xbf16, #tpu.memory_space<vmem>>, vector<1x1x1x16x128xbf16>
    %140 = vector.shape_cast %139 : vector<1x1x1x16x128xbf16> to vector<16x128xbf16>
    %c17 = arith.constant 17 : index
    %c0_139 = arith.constant 0 : index
    %c0_140 = arith.constant 0 : index
    %141 = vector.load %arg4[%c17, %c0_139, %c0_140] : memref<49x128x128xbf16, #tpu.memory_space<vmem>>, vector<1x128x128xbf16>
    %142 = vector.shape_cast %141 : vector<1x128x128xbf16> to vector<128x128xbf16>
    %cst_141 = arith.constant dense<0.000000e+00> : vector<16x128xf32>
    %143 = tpu.matmul %140, %142, %cst_141 {dimension_numbers = #tpu.dot_dimension_numbers<[1], [0], [0], [1], [0, 0, 1, 1], [], []>} : vector<16x128xbf16>, vector<128x128xbf16>, vector<16x128xf32> -> vector<16x128xf32>
    %144 = arith.addf %136, %143 : vector<16x128xf32>
    %c1_i32_142 = arith.constant 1 : i32
    %145 = arith.addi %arg2, %c1_i32_142 : i32
    %c0_143 = arith.constant 0 : index
    %c0_144 = arith.constant 0 : index
    %146 = arith.index_cast %145 : i32 to index
    %c2_145 = arith.constant 2 : index
    %c0_146 = arith.constant 0 : index
    %147 = vector.load %arg3[%c0_143, %c0_144, %146, %c2_145, %c0_146] : memref<1x4x19x19x128xbf16, #tpu.memory_space<vmem>>, vector<1x1x1x16x128xbf16>
    %148 = vector.shape_cast %147 : vector<1x1x1x16x128xbf16> to vector<16x128xbf16>
    %c18 = arith.constant 18 : index
    %c0_147 = arith.constant 0 : index
    %c0_148 = arith.constant 0 : index
    %149 = vector.load %arg4[%c18, %c0_147, %c0_148] : memref<49x128x128xbf16, #tpu.memory_space<vmem>>, vector<1x128x128xbf16>
    %150 = vector.shape_cast %149 : vector<1x128x128xbf16> to vector<128x128xbf16>
    %cst_149 = arith.constant dense<0.000000e+00> : vector<16x128xf32>
    %151 = tpu.matmul %148, %150, %cst_149 {dimension_numbers = #tpu.dot_dimension_numbers<[1], [0], [0], [1], [0, 0, 1, 1], [], []>} : vector<16x128xbf16>, vector<128x128xbf16>, vector<16x128xf32> -> vector<16x128xf32>
    %152 = arith.addf %144, %151 : vector<16x128xf32>
    %c1_i32_150 = arith.constant 1 : i32
    %153 = arith.addi %arg2, %c1_i32_150 : i32
    %c0_151 = arith.constant 0 : index
    %c1_152 = arith.constant 1 : index
    %154 = arith.index_cast %153 : i32 to index
    %c2_153 = arith.constant 2 : index
    %c0_154 = arith.constant 0 : index
    %155 = vector.load %arg3[%c0_151, %c1_152, %154, %c2_153, %c0_154] : memref<1x4x19x19x128xbf16, #tpu.memory_space<vmem>>, vector<1x1x1x16x128xbf16>
    %156 = vector.shape_cast %155 : vector<1x1x1x16x128xbf16> to vector<16x128xbf16>
    %c19 = arith.constant 19 : index
    %c0_155 = arith.constant 0 : index
    %c0_156 = arith.constant 0 : index
    %157 = vector.load %arg4[%c19, %c0_155, %c0_156] : memref<49x128x128xbf16, #tpu.memory_space<vmem>>, vector<1x128x128xbf16>
    %158 = vector.shape_cast %157 : vector<1x128x128xbf16> to vector<128x128xbf16>
    %cst_157 = arith.constant dense<0.000000e+00> : vector<16x128xf32>
    %159 = tpu.matmul %156, %158, %cst_157 {dimension_numbers = #tpu.dot_dimension_numbers<[1], [0], [0], [1], [0, 0, 1, 1], [], []>} : vector<16x128xbf16>, vector<128x128xbf16>, vector<16x128xf32> -> vector<16x128xf32>
    %160 = arith.addf %152, %159 : vector<16x128xf32>
    %c1_i32_158 = arith.constant 1 : i32
    %161 = arith.addi %arg2, %c1_i32_158 : i32
    %c0_159 = arith.constant 0 : index
    %c0_160 = arith.constant 0 : index
    %162 = arith.index_cast %161 : i32 to index
    %c3_161 = arith.constant 3 : index
    %c0_162 = arith.constant 0 : index
    %163 = vector.load %arg3[%c0_159, %c0_160, %162, %c3_161, %c0_162] : memref<1x4x19x19x128xbf16, #tpu.memory_space<vmem>>, vector<1x1x1x16x128xbf16>
    %164 = vector.shape_cast %163 : vector<1x1x1x16x128xbf16> to vector<16x128xbf16>
    %c20 = arith.constant 20 : index
    %c0_163 = arith.constant 0 : index
    %c0_164 = arith.constant 0 : index
    %165 = vector.load %arg4[%c20, %c0_163, %c0_164] : memref<49x128x128xbf16, #tpu.memory_space<vmem>>, vector<1x128x128xbf16>
    %166 = vector.shape_cast %165 : vector<1x128x128xbf16> to vector<128x128xbf16>
    %cst_165 = arith.constant dense<0.000000e+00> : vector<16x128xf32>
    %167 = tpu.matmul %164, %166, %cst_165 {dimension_numbers = #tpu.dot_dimension_numbers<[1], [0], [0], [1], [0, 0, 1, 1], [], []>} : vector<16x128xbf16>, vector<128x128xbf16>, vector<16x128xf32> -> vector<16x128xf32>
    %168 = arith.addf %160, %167 : vector<16x128xf32>
    %c1_i32_166 = arith.constant 1 : i32
    %169 = arith.addi %arg2, %c1_i32_166 : i32
    %c0_167 = arith.constant 0 : index
    %c2_168 = arith.constant 2 : index
    %170 = arith.index_cast %169 : i32 to index
    %c0_169 = arith.constant 0 : index
    %c0_170 = arith.constant 0 : index
    %171 = vector.load %arg3[%c0_167, %c2_168, %170, %c0_169, %c0_170] : memref<1x4x19x19x128xbf16, #tpu.memory_space<vmem>>, vector<1x1x1x16x128xbf16>
    %172 = vector.shape_cast %171 : vector<1x1x1x16x128xbf16> to vector<16x128xbf16>
    %c21 = arith.constant 21 : index
    %c0_171 = arith.constant 0 : index
    %c0_172 = arith.constant 0 : index
    %173 = vector.load %arg4[%c21, %c0_171, %c0_172] : memref<49x128x128xbf16, #tpu.memory_space<vmem>>, vector<1x128x128xbf16>
    %174 = vector.shape_cast %173 : vector<1x128x128xbf16> to vector<128x128xbf16>
    %cst_173 = arith.constant dense<0.000000e+00> : vector<16x128xf32>
    %175 = tpu.matmul %172, %174, %cst_173 {dimension_numbers = #tpu.dot_dimension_numbers<[1], [0], [0], [1], [0, 0, 1, 1], [], []>} : vector<16x128xbf16>, vector<128x128xbf16>, vector<16x128xf32> -> vector<16x128xf32>
    %176 = arith.addf %168, %175 : vector<16x128xf32>
    %c1_i32_174 = arith.constant 1 : i32
    %177 = arith.addi %arg2, %c1_i32_174 : i32
    %c0_175 = arith.constant 0 : index
    %c3_176 = arith.constant 3 : index
    %178 = arith.index_cast %177 : i32 to index
    %c0_177 = arith.constant 0 : index
    %c0_178 = arith.constant 0 : index
    %179 = vector.load %arg3[%c0_175, %c3_176, %178, %c0_177, %c0_178] : memref<1x4x19x19x128xbf16, #tpu.memory_space<vmem>>, vector<1x1x1x16x128xbf16>
    %180 = vector.shape_cast %179 : vector<1x1x1x16x128xbf16> to vector<16x128xbf16>
    %c22 = arith.constant 22 : index
    %c0_179 = arith.constant 0 : index
    %c0_180 = arith.constant 0 : index
    %181 = vector.load %arg4[%c22, %c0_179, %c0_180] : memref<49x128x128xbf16, #tpu.memory_space<vmem>>, vector<1x128x128xbf16>
    %182 = vector.shape_cast %181 : vector<1x128x128xbf16> to vector<128x128xbf16>
    %cst_181 = arith.constant dense<0.000000e+00> : vector<16x128xf32>
    %183 = tpu.matmul %180, %182, %cst_181 {dimension_numbers = #tpu.dot_dimension_numbers<[1], [0], [0], [1], [0, 0, 1, 1], [], []>} : vector<16x128xbf16>, vector<128x128xbf16>, vector<16x128xf32> -> vector<16x128xf32>
    %184 = arith.addf %176, %183 : vector<16x128xf32>
    %c1_i32_182 = arith.constant 1 : i32
    %185 = arith.addi %arg2, %c1_i32_182 : i32
    %c0_183 = arith.constant 0 : index
    %c2_184 = arith.constant 2 : index
    %186 = arith.index_cast %185 : i32 to index
    %c1_185 = arith.constant 1 : index
    %c0_186 = arith.constant 0 : index
    %187 = vector.load %arg3[%c0_183, %c2_184, %186, %c1_185, %c0_186] : memref<1x4x19x19x128xbf16, #tpu.memory_space<vmem>>, vector<1x1x1x16x128xbf16>
    %188 = vector.shape_cast %187 : vector<1x1x1x16x128xbf16> to vector<16x128xbf16>
    %c23 = arith.constant 23 : index
    %c0_187 = arith.constant 0 : index
    %c0_188 = arith.constant 0 : index
    %189 = vector.load %arg4[%c23, %c0_187, %c0_188] : memref<49x128x128xbf16, #tpu.memory_space<vmem>>, vector<1x128x128xbf16>
    %190 = vector.shape_cast %189 : vector<1x128x128xbf16> to vector<128x128xbf16>
    %cst_189 = arith.constant dense<0.000000e+00> : vector<16x128xf32>
    %191 = tpu.matmul %188, %190, %cst_189 {dimension_numbers = #tpu.dot_dimension_numbers<[1], [0], [0], [1], [0, 0, 1, 1], [], []>} : vector<16x128xbf16>, vector<128x128xbf16>, vector<16x128xf32> -> vector<16x128xf32>
    %192 = arith.addf %184, %191 : vector<16x128xf32>
    %c1_i32_190 = arith.constant 1 : i32
    %193 = arith.addi %arg2, %c1_i32_190 : i32
    %c0_191 = arith.constant 0 : index
    %c3_192 = arith.constant 3 : index
    %194 = arith.index_cast %193 : i32 to index
    %c1_193 = arith.constant 1 : index
    %c0_194 = arith.constant 0 : index
    %195 = vector.load %arg3[%c0_191, %c3_192, %194, %c1_193, %c0_194] : memref<1x4x19x19x128xbf16, #tpu.memory_space<vmem>>, vector<1x1x1x16x128xbf16>
    %196 = vector.shape_cast %195 : vector<1x1x1x16x128xbf16> to vector<16x128xbf16>
    %c24 = arith.constant 24 : index
    %c0_195 = arith.constant 0 : index
    %c0_196 = arith.constant 0 : index
    %197 = vector.load %arg4[%c24, %c0_195, %c0_196] : memref<49x128x128xbf16, #tpu.memory_space<vmem>>, vector<1x128x128xbf16>
    %198 = vector.shape_cast %197 : vector<1x128x128xbf16> to vector<128x128xbf16>
    %cst_197 = arith.constant dense<0.000000e+00> : vector<16x128xf32>
    %199 = tpu.matmul %196, %198, %cst_197 {dimension_numbers = #tpu.dot_dimension_numbers<[1], [0], [0], [1], [0, 0, 1, 1], [], []>} : vector<16x128xbf16>, vector<128x128xbf16>, vector<16x128xf32> -> vector<16x128xf32>
    %200 = arith.addf %192, %199 : vector<16x128xf32>
    %c1_i32_198 = arith.constant 1 : i32
    %201 = arith.addi %arg2, %c1_i32_198 : i32
    %c0_199 = arith.constant 0 : index
    %c2_200 = arith.constant 2 : index
    %202 = arith.index_cast %201 : i32 to index
    %c2_201 = arith.constant 2 : index
    %c0_202 = arith.constant 0 : index
    %203 = vector.load %arg3[%c0_199, %c2_200, %202, %c2_201, %c0_202] : memref<1x4x19x19x128xbf16, #tpu.memory_space<vmem>>, vector<1x1x1x16x128xbf16>
    %204 = vector.shape_cast %203 : vector<1x1x1x16x128xbf16> to vector<16x128xbf16>
    %c25 = arith.constant 25 : index
    %c0_203 = arith.constant 0 : index
    %c0_204 = arith.constant 0 : index
    %205 = vector.load %arg4[%c25, %c0_203, %c0_204] : memref<49x128x128xbf16, #tpu.memory_space<vmem>>, vector<1x128x128xbf16>
    %206 = vector.shape_cast %205 : vector<1x128x128xbf16> to vector<128x128xbf16>
    %cst_205 = arith.constant dense<0.000000e+00> : vector<16x128xf32>
    %207 = tpu.matmul %204, %206, %cst_205 {dimension_numbers = #tpu.dot_dimension_numbers<[1], [0], [0], [1], [0, 0, 1, 1], [], []>} : vector<16x128xbf16>, vector<128x128xbf16>, vector<16x128xf32> -> vector<16x128xf32>
    %208 = arith.addf %200, %207 : vector<16x128xf32>
    %c1_i32_206 = arith.constant 1 : i32
    %209 = arith.addi %arg2, %c1_i32_206 : i32
    %c0_207 = arith.constant 0 : index
    %c3_208 = arith.constant 3 : index
    %210 = arith.index_cast %209 : i32 to index
    %c2_209 = arith.constant 2 : index
    %c0_210 = arith.constant 0 : index
    %211 = vector.load %arg3[%c0_207, %c3_208, %210, %c2_209, %c0_210] : memref<1x4x19x19x128xbf16, #tpu.memory_space<vmem>>, vector<1x1x1x16x128xbf16>
    %212 = vector.shape_cast %211 : vector<1x1x1x16x128xbf16> to vector<16x128xbf16>
    %c26 = arith.constant 26 : index
    %c0_211 = arith.constant 0 : index
    %c0_212 = arith.constant 0 : index
    %213 = vector.load %arg4[%c26, %c0_211, %c0_212] : memref<49x128x128xbf16, #tpu.memory_space<vmem>>, vector<1x128x128xbf16>
    %214 = vector.shape_cast %213 : vector<1x128x128xbf16> to vector<128x128xbf16>
    %cst_213 = arith.constant dense<0.000000e+00> : vector<16x128xf32>
    %215 = tpu.matmul %212, %214, %cst_213 {dimension_numbers = #tpu.dot_dimension_numbers<[1], [0], [0], [1], [0, 0, 1, 1], [], []>} : vector<16x128xbf16>, vector<128x128xbf16>, vector<16x128xf32> -> vector<16x128xf32>
    %216 = arith.addf %208, %215 : vector<16x128xf32>
    %c1_i32_214 = arith.constant 1 : i32
    %217 = arith.addi %arg2, %c1_i32_214 : i32
    %c0_215 = arith.constant 0 : index
    %c2_216 = arith.constant 2 : index
    %218 = arith.index_cast %217 : i32 to index
    %c3_217 = arith.constant 3 : index
    %c0_218 = arith.constant 0 : index
    %219 = vector.load %arg3[%c0_215, %c2_216, %218, %c3_217, %c0_218] : memref<1x4x19x19x128xbf16, #tpu.memory_space<vmem>>, vector<1x1x1x16x128xbf16>
    %220 = vector.shape_cast %219 : vector<1x1x1x16x128xbf16> to vector<16x128xbf16>
    %c27 = arith.constant 27 : index
    %c0_219 = arith.constant 0 : index
    %c0_220 = arith.constant 0 : index
    %221 = vector.load %arg4[%c27, %c0_219, %c0_220] : memref<49x128x128xbf16, #tpu.memory_space<vmem>>, vector<1x128x128xbf16>
    %222 = vector.shape_cast %221 : vector<1x128x128xbf16> to vector<128x128xbf16>
    %cst_221 = arith.constant dense<0.000000e+00> : vector<16x128xf32>
    %223 = tpu.matmul %220, %222, %cst_221 {dimension_numbers = #tpu.dot_dimension_numbers<[1], [0], [0], [1], [0, 0, 1, 1], [], []>} : vector<16x128xbf16>, vector<128x128xbf16>, vector<16x128xf32> -> vector<16x128xf32>
    %224 = arith.addf %216, %223 : vector<16x128xf32>
    %c2_i32 = arith.constant 2 : i32
    %225 = arith.addi %arg2, %c2_i32 : i32
    %c0_222 = arith.constant 0 : index
    %c0_223 = arith.constant 0 : index
    %226 = arith.index_cast %225 : i32 to index
    %c0_224 = arith.constant 0 : index
    %c0_225 = arith.constant 0 : index
    %227 = vector.load %arg3[%c0_222, %c0_223, %226, %c0_224, %c0_225] : memref<1x4x19x19x128xbf16, #tpu.memory_space<vmem>>, vector<1x1x1x16x128xbf16>
    %228 = vector.shape_cast %227 : vector<1x1x1x16x128xbf16> to vector<16x128xbf16>
    %c28 = arith.constant 28 : index
    %c0_226 = arith.constant 0 : index
    %c0_227 = arith.constant 0 : index
    %229 = vector.load %arg4[%c28, %c0_226, %c0_227] : memref<49x128x128xbf16, #tpu.memory_space<vmem>>, vector<1x128x128xbf16>
    %230 = vector.shape_cast %229 : vector<1x128x128xbf16> to vector<128x128xbf16>
    %cst_228 = arith.constant dense<0.000000e+00> : vector<16x128xf32>
    %231 = tpu.matmul %228, %230, %cst_228 {dimension_numbers = #tpu.dot_dimension_numbers<[1], [0], [0], [1], [0, 0, 1, 1], [], []>} : vector<16x128xbf16>, vector<128x128xbf16>, vector<16x128xf32> -> vector<16x128xf32>
    %232 = arith.addf %224, %231 : vector<16x128xf32>
    %c2_i32_229 = arith.constant 2 : i32
    %233 = arith.addi %arg2, %c2_i32_229 : i32
    %c0_230 = arith.constant 0 : index
    %c1_231 = arith.constant 1 : index
    %234 = arith.index_cast %233 : i32 to index
    %c0_232 = arith.constant 0 : index
    %c0_233 = arith.constant 0 : index
    %235 = vector.load %arg3[%c0_230, %c1_231, %234, %c0_232, %c0_233] : memref<1x4x19x19x128xbf16, #tpu.memory_space<vmem>>, vector<1x1x1x16x128xbf16>
    %236 = vector.shape_cast %235 : vector<1x1x1x16x128xbf16> to vector<16x128xbf16>
    %c29 = arith.constant 29 : index
    %c0_234 = arith.constant 0 : index
    %c0_235 = arith.constant 0 : index
    %237 = vector.load %arg4[%c29, %c0_234, %c0_235] : memref<49x128x128xbf16, #tpu.memory_space<vmem>>, vector<1x128x128xbf16>
    %238 = vector.shape_cast %237 : vector<1x128x128xbf16> to vector<128x128xbf16>
    %cst_236 = arith.constant dense<0.000000e+00> : vector<16x128xf32>
    %239 = tpu.matmul %236, %238, %cst_236 {dimension_numbers = #tpu.dot_dimension_numbers<[1], [0], [0], [1], [0, 0, 1, 1], [], []>} : vector<16x128xbf16>, vector<128x128xbf16>, vector<16x128xf32> -> vector<16x128xf32>
    %240 = arith.addf %232, %239 : vector<16x128xf32>
    %c2_i32_237 = arith.constant 2 : i32
    %241 = arith.addi %arg2, %c2_i32_237 : i32
    %c0_238 = arith.constant 0 : index
    %c0_239 = arith.constant 0 : index
    %242 = arith.index_cast %241 : i32 to index
    %c1_240 = arith.constant 1 : index
    %c0_241 = arith.constant 0 : index
    %243 = vector.load %arg3[%c0_238, %c0_239, %242, %c1_240, %c0_241] : memref<1x4x19x19x128xbf16, #tpu.memory_space<vmem>>, vector<1x1x1x16x128xbf16>
    %244 = vector.shape_cast %243 : vector<1x1x1x16x128xbf16> to vector<16x128xbf16>
    %c30 = arith.constant 30 : index
    %c0_242 = arith.constant 0 : index
    %c0_243 = arith.constant 0 : index
    %245 = vector.load %arg4[%c30, %c0_242, %c0_243] : memref<49x128x128xbf16, #tpu.memory_space<vmem>>, vector<1x128x128xbf16>
    %246 = vector.shape_cast %245 : vector<1x128x128xbf16> to vector<128x128xbf16>
    %cst_244 = arith.constant dense<0.000000e+00> : vector<16x128xf32>
    %247 = tpu.matmul %244, %246, %cst_244 {dimension_numbers = #tpu.dot_dimension_numbers<[1], [0], [0], [1], [0, 0, 1, 1], [], []>} : vector<16x128xbf16>, vector<128x128xbf16>, vector<16x128xf32> -> vector<16x128xf32>
    %248 = arith.addf %240, %247 : vector<16x128xf32>
    %c2_i32_245 = arith.constant 2 : i32
    %249 = arith.addi %arg2, %c2_i32_245 : i32
    %c0_246 = arith.constant 0 : index
    %c1_247 = arith.constant 1 : index
    %250 = arith.index_cast %249 : i32 to index
    %c1_248 = arith.constant 1 : index
    %c0_249 = arith.constant 0 : index
    %251 = vector.load %arg3[%c0_246, %c1_247, %250, %c1_248, %c0_249] : memref<1x4x19x19x128xbf16, #tpu.memory_space<vmem>>, vector<1x1x1x16x128xbf16>
    %252 = vector.shape_cast %251 : vector<1x1x1x16x128xbf16> to vector<16x128xbf16>
    %c31 = arith.constant 31 : index
    %c0_250 = arith.constant 0 : index
    %c0_251 = arith.constant 0 : index
    %253 = vector.load %arg4[%c31, %c0_250, %c0_251] : memref<49x128x128xbf16, #tpu.memory_space<vmem>>, vector<1x128x128xbf16>
    %254 = vector.shape_cast %253 : vector<1x128x128xbf16> to vector<128x128xbf16>
    %cst_252 = arith.constant dense<0.000000e+00> : vector<16x128xf32>
    %255 = tpu.matmul %252, %254, %cst_252 {dimension_numbers = #tpu.dot_dimension_numbers<[1], [0], [0], [1], [0, 0, 1, 1], [], []>} : vector<16x128xbf16>, vector<128x128xbf16>, vector<16x128xf32> -> vector<16x128xf32>
    %256 = arith.addf %248, %255 : vector<16x128xf32>
    %c2_i32_253 = arith.constant 2 : i32
    %257 = arith.addi %arg2, %c2_i32_253 : i32
    %c0_254 = arith.constant 0 : index
    %c0_255 = arith.constant 0 : index
    %258 = arith.index_cast %257 : i32 to index
    %c2_256 = arith.constant 2 : index
    %c0_257 = arith.constant 0 : index
    %259 = vector.load %arg3[%c0_254, %c0_255, %258, %c2_256, %c0_257] : memref<1x4x19x19x128xbf16, #tpu.memory_space<vmem>>, vector<1x1x1x16x128xbf16>
    %260 = vector.shape_cast %259 : vector<1x1x1x16x128xbf16> to vector<16x128xbf16>
    %c32 = arith.constant 32 : index
    %c0_258 = arith.constant 0 : index
    %c0_259 = arith.constant 0 : index
    %261 = vector.load %arg4[%c32, %c0_258, %c0_259] : memref<49x128x128xbf16, #tpu.memory_space<vmem>>, vector<1x128x128xbf16>
    %262 = vector.shape_cast %261 : vector<1x128x128xbf16> to vector<128x128xbf16>
    %cst_260 = arith.constant dense<0.000000e+00> : vector<16x128xf32>
    %263 = tpu.matmul %260, %262, %cst_260 {dimension_numbers = #tpu.dot_dimension_numbers<[1], [0], [0], [1], [0, 0, 1, 1], [], []>} : vector<16x128xbf16>, vector<128x128xbf16>, vector<16x128xf32> -> vector<16x128xf32>
    %264 = arith.addf %256, %263 : vector<16x128xf32>
    %c2_i32_261 = arith.constant 2 : i32
    %265 = arith.addi %arg2, %c2_i32_261 : i32
    %c0_262 = arith.constant 0 : index
    %c1_263 = arith.constant 1 : index
    %266 = arith.index_cast %265 : i32 to index
    %c2_264 = arith.constant 2 : index
    %c0_265 = arith.constant 0 : index
    %267 = vector.load %arg3[%c0_262, %c1_263, %266, %c2_264, %c0_265] : memref<1x4x19x19x128xbf16, #tpu.memory_space<vmem>>, vector<1x1x1x16x128xbf16>
    %268 = vector.shape_cast %267 : vector<1x1x1x16x128xbf16> to vector<16x128xbf16>
    %c33 = arith.constant 33 : index
    %c0_266 = arith.constant 0 : index
    %c0_267 = arith.constant 0 : index
    %269 = vector.load %arg4[%c33, %c0_266, %c0_267] : memref<49x128x128xbf16, #tpu.memory_space<vmem>>, vector<1x128x128xbf16>
    %270 = vector.shape_cast %269 : vector<1x128x128xbf16> to vector<128x128xbf16>
    %cst_268 = arith.constant dense<0.000000e+00> : vector<16x128xf32>
    %271 = tpu.matmul %268, %270, %cst_268 {dimension_numbers = #tpu.dot_dimension_numbers<[1], [0], [0], [1], [0, 0, 1, 1], [], []>} : vector<16x128xbf16>, vector<128x128xbf16>, vector<16x128xf32> -> vector<16x128xf32>
    %272 = arith.addf %264, %271 : vector<16x128xf32>
    %c2_i32_269 = arith.constant 2 : i32
    %273 = arith.addi %arg2, %c2_i32_269 : i32
    %c0_270 = arith.constant 0 : index
    %c0_271 = arith.constant 0 : index
    %274 = arith.index_cast %273 : i32 to index
    %c3_272 = arith.constant 3 : index
    %c0_273 = arith.constant 0 : index
    %275 = vector.load %arg3[%c0_270, %c0_271, %274, %c3_272, %c0_273] : memref<1x4x19x19x128xbf16, #tpu.memory_space<vmem>>, vector<1x1x1x16x128xbf16>
    %276 = vector.shape_cast %275 : vector<1x1x1x16x128xbf16> to vector<16x128xbf16>
    %c34 = arith.constant 34 : index
    %c0_274 = arith.constant 0 : index
    %c0_275 = arith.constant 0 : index
    %277 = vector.load %arg4[%c34, %c0_274, %c0_275] : memref<49x128x128xbf16, #tpu.memory_space<vmem>>, vector<1x128x128xbf16>
    %278 = vector.shape_cast %277 : vector<1x128x128xbf16> to vector<128x128xbf16>
    %cst_276 = arith.constant dense<0.000000e+00> : vector<16x128xf32>
    %279 = tpu.matmul %276, %278, %cst_276 {dimension_numbers = #tpu.dot_dimension_numbers<[1], [0], [0], [1], [0, 0, 1, 1], [], []>} : vector<16x128xbf16>, vector<128x128xbf16>, vector<16x128xf32> -> vector<16x128xf32>
    %280 = arith.addf %272, %279 : vector<16x128xf32>
    %c2_i32_277 = arith.constant 2 : i32
    %281 = arith.addi %arg2, %c2_i32_277 : i32
    %c0_278 = arith.constant 0 : index
    %c2_279 = arith.constant 2 : index
    %282 = arith.index_cast %281 : i32 to index
    %c0_280 = arith.constant 0 : index
    %c0_281 = arith.constant 0 : index
    %283 = vector.load %arg3[%c0_278, %c2_279, %282, %c0_280, %c0_281] : memref<1x4x19x19x128xbf16, #tpu.memory_space<vmem>>, vector<1x1x1x16x128xbf16>
    %284 = vector.shape_cast %283 : vector<1x1x1x16x128xbf16> to vector<16x128xbf16>
    %c35 = arith.constant 35 : index
    %c0_282 = arith.constant 0 : index
    %c0_283 = arith.constant 0 : index
    %285 = vector.load %arg4[%c35, %c0_282, %c0_283] : memref<49x128x128xbf16, #tpu.memory_space<vmem>>, vector<1x128x128xbf16>
    %286 = vector.shape_cast %285 : vector<1x128x128xbf16> to vector<128x128xbf16>
    %cst_284 = arith.constant dense<0.000000e+00> : vector<16x128xf32>
    %287 = tpu.matmul %284, %286, %cst_284 {dimension_numbers = #tpu.dot_dimension_numbers<[1], [0], [0], [1], [0, 0, 1, 1], [], []>} : vector<16x128xbf16>, vector<128x128xbf16>, vector<16x128xf32> -> vector<16x128xf32>
    %288 = arith.addf %280, %287 : vector<16x128xf32>
    %c2_i32_285 = arith.constant 2 : i32
    %289 = arith.addi %arg2, %c2_i32_285 : i32
    %c0_286 = arith.constant 0 : index
    %c3_287 = arith.constant 3 : index
    %290 = arith.index_cast %289 : i32 to index
    %c0_288 = arith.constant 0 : index
    %c0_289 = arith.constant 0 : index
    %291 = vector.load %arg3[%c0_286, %c3_287, %290, %c0_288, %c0_289] : memref<1x4x19x19x128xbf16, #tpu.memory_space<vmem>>, vector<1x1x1x16x128xbf16>
    %292 = vector.shape_cast %291 : vector<1x1x1x16x128xbf16> to vector<16x128xbf16>
    %c36 = arith.constant 36 : index
    %c0_290 = arith.constant 0 : index
    %c0_291 = arith.constant 0 : index
    %293 = vector.load %arg4[%c36, %c0_290, %c0_291] : memref<49x128x128xbf16, #tpu.memory_space<vmem>>, vector<1x128x128xbf16>
    %294 = vector.shape_cast %293 : vector<1x128x128xbf16> to vector<128x128xbf16>
    %cst_292 = arith.constant dense<0.000000e+00> : vector<16x128xf32>
    %295 = tpu.matmul %292, %294, %cst_292 {dimension_numbers = #tpu.dot_dimension_numbers<[1], [0], [0], [1], [0, 0, 1, 1], [], []>} : vector<16x128xbf16>, vector<128x128xbf16>, vector<16x128xf32> -> vector<16x128xf32>
    %296 = arith.addf %288, %295 : vector<16x128xf32>
    %c2_i32_293 = arith.constant 2 : i32
    %297 = arith.addi %arg2, %c2_i32_293 : i32
    %c0_294 = arith.constant 0 : index
    %c2_295 = arith.constant 2 : index
    %298 = arith.index_cast %297 : i32 to index
    %c1_296 = arith.constant 1 : index
    %c0_297 = arith.constant 0 : index
    %299 = vector.load %arg3[%c0_294, %c2_295, %298, %c1_296, %c0_297] : memref<1x4x19x19x128xbf16, #tpu.memory_space<vmem>>, vector<1x1x1x16x128xbf16>
    %300 = vector.shape_cast %299 : vector<1x1x1x16x128xbf16> to vector<16x128xbf16>
    %c37 = arith.constant 37 : index
    %c0_298 = arith.constant 0 : index
    %c0_299 = arith.constant 0 : index
    %301 = vector.load %arg4[%c37, %c0_298, %c0_299] : memref<49x128x128xbf16, #tpu.memory_space<vmem>>, vector<1x128x128xbf16>
    %302 = vector.shape_cast %301 : vector<1x128x128xbf16> to vector<128x128xbf16>
    %cst_300 = arith.constant dense<0.000000e+00> : vector<16x128xf32>
    %303 = tpu.matmul %300, %302, %cst_300 {dimension_numbers = #tpu.dot_dimension_numbers<[1], [0], [0], [1], [0, 0, 1, 1], [], []>} : vector<16x128xbf16>, vector<128x128xbf16>, vector<16x128xf32> -> vector<16x128xf32>
    %304 = arith.addf %296, %303 : vector<16x128xf32>
    %c2_i32_301 = arith.constant 2 : i32
    %305 = arith.addi %arg2, %c2_i32_301 : i32
    %c0_302 = arith.constant 0 : index
    %c3_303 = arith.constant 3 : index
    %306 = arith.index_cast %305 : i32 to index
    %c1_304 = arith.constant 1 : index
    %c0_305 = arith.constant 0 : index
    %307 = vector.load %arg3[%c0_302, %c3_303, %306, %c1_304, %c0_305] : memref<1x4x19x19x128xbf16, #tpu.memory_space<vmem>>, vector<1x1x1x16x128xbf16>
    %308 = vector.shape_cast %307 : vector<1x1x1x16x128xbf16> to vector<16x128xbf16>
    %c38 = arith.constant 38 : index
    %c0_306 = arith.constant 0 : index
    %c0_307 = arith.constant 0 : index
    %309 = vector.load %arg4[%c38, %c0_306, %c0_307] : memref<49x128x128xbf16, #tpu.memory_space<vmem>>, vector<1x128x128xbf16>
    %310 = vector.shape_cast %309 : vector<1x128x128xbf16> to vector<128x128xbf16>
    %cst_308 = arith.constant dense<0.000000e+00> : vector<16x128xf32>
    %311 = tpu.matmul %308, %310, %cst_308 {dimension_numbers = #tpu.dot_dimension_numbers<[1], [0], [0], [1], [0, 0, 1, 1], [], []>} : vector<16x128xbf16>, vector<128x128xbf16>, vector<16x128xf32> -> vector<16x128xf32>
    %312 = arith.addf %304, %311 : vector<16x128xf32>
    %c2_i32_309 = arith.constant 2 : i32
    %313 = arith.addi %arg2, %c2_i32_309 : i32
    %c0_310 = arith.constant 0 : index
    %c2_311 = arith.constant 2 : index
    %314 = arith.index_cast %313 : i32 to index
    %c2_312 = arith.constant 2 : index
    %c0_313 = arith.constant 0 : index
    %315 = vector.load %arg3[%c0_310, %c2_311, %314, %c2_312, %c0_313] : memref<1x4x19x19x128xbf16, #tpu.memory_space<vmem>>, vector<1x1x1x16x128xbf16>
    %316 = vector.shape_cast %315 : vector<1x1x1x16x128xbf16> to vector<16x128xbf16>
    %c39 = arith.constant 39 : index
    %c0_314 = arith.constant 0 : index
    %c0_315 = arith.constant 0 : index
    %317 = vector.load %arg4[%c39, %c0_314, %c0_315] : memref<49x128x128xbf16, #tpu.memory_space<vmem>>, vector<1x128x128xbf16>
    %318 = vector.shape_cast %317 : vector<1x128x128xbf16> to vector<128x128xbf16>
    %cst_316 = arith.constant dense<0.000000e+00> : vector<16x128xf32>
    %319 = tpu.matmul %316, %318, %cst_316 {dimension_numbers = #tpu.dot_dimension_numbers<[1], [0], [0], [1], [0, 0, 1, 1], [], []>} : vector<16x128xbf16>, vector<128x128xbf16>, vector<16x128xf32> -> vector<16x128xf32>
    %320 = arith.addf %312, %319 : vector<16x128xf32>
    %c2_i32_317 = arith.constant 2 : i32
    %321 = arith.addi %arg2, %c2_i32_317 : i32
    %c0_318 = arith.constant 0 : index
    %c3_319 = arith.constant 3 : index
    %322 = arith.index_cast %321 : i32 to index
    %c2_320 = arith.constant 2 : index
    %c0_321 = arith.constant 0 : index
    %323 = vector.load %arg3[%c0_318, %c3_319, %322, %c2_320, %c0_321] : memref<1x4x19x19x128xbf16, #tpu.memory_space<vmem>>, vector<1x1x1x16x128xbf16>
    %324 = vector.shape_cast %323 : vector<1x1x1x16x128xbf16> to vector<16x128xbf16>
    %c40 = arith.constant 40 : index
    %c0_322 = arith.constant 0 : index
    %c0_323 = arith.constant 0 : index
    %325 = vector.load %arg4[%c40, %c0_322, %c0_323] : memref<49x128x128xbf16, #tpu.memory_space<vmem>>, vector<1x128x128xbf16>
    %326 = vector.shape_cast %325 : vector<1x128x128xbf16> to vector<128x128xbf16>
    %cst_324 = arith.constant dense<0.000000e+00> : vector<16x128xf32>
    %327 = tpu.matmul %324, %326, %cst_324 {dimension_numbers = #tpu.dot_dimension_numbers<[1], [0], [0], [1], [0, 0, 1, 1], [], []>} : vector<16x128xbf16>, vector<128x128xbf16>, vector<16x128xf32> -> vector<16x128xf32>
    %328 = arith.addf %320, %327 : vector<16x128xf32>
    %c2_i32_325 = arith.constant 2 : i32
    %329 = arith.addi %arg2, %c2_i32_325 : i32
    %c0_326 = arith.constant 0 : index
    %c2_327 = arith.constant 2 : index
    %330 = arith.index_cast %329 : i32 to index
    %c3_328 = arith.constant 3 : index
    %c0_329 = arith.constant 0 : index
    %331 = vector.load %arg3[%c0_326, %c2_327, %330, %c3_328, %c0_329] : memref<1x4x19x19x128xbf16, #tpu.memory_space<vmem>>, vector<1x1x1x16x128xbf16>
    %332 = vector.shape_cast %331 : vector<1x1x1x16x128xbf16> to vector<16x128xbf16>
    %c41 = arith.constant 41 : index
    %c0_330 = arith.constant 0 : index
    %c0_331 = arith.constant 0 : index
    %333 = vector.load %arg4[%c41, %c0_330, %c0_331] : memref<49x128x128xbf16, #tpu.memory_space<vmem>>, vector<1x128x128xbf16>
    %334 = vector.shape_cast %333 : vector<1x128x128xbf16> to vector<128x128xbf16>
    %cst_332 = arith.constant dense<0.000000e+00> : vector<16x128xf32>
    %335 = tpu.matmul %332, %334, %cst_332 {dimension_numbers = #tpu.dot_dimension_numbers<[1], [0], [0], [1], [0, 0, 1, 1], [], []>} : vector<16x128xbf16>, vector<128x128xbf16>, vector<16x128xf32> -> vector<16x128xf32>
    %336 = arith.addf %328, %335 : vector<16x128xf32>
    %c3_i32 = arith.constant 3 : i32
    %337 = arith.addi %arg2, %c3_i32 : i32
    %c0_333 = arith.constant 0 : index
    %c0_334 = arith.constant 0 : index
    %338 = arith.index_cast %337 : i32 to index
    %c0_335 = arith.constant 0 : index
    %c0_336 = arith.constant 0 : index
    %339 = vector.load %arg3[%c0_333, %c0_334, %338, %c0_335, %c0_336] : memref<1x4x19x19x128xbf16, #tpu.memory_space<vmem>>, vector<1x1x1x16x128xbf16>
    %340 = vector.shape_cast %339 : vector<1x1x1x16x128xbf16> to vector<16x128xbf16>
    %c42 = arith.constant 42 : index
    %c0_337 = arith.constant 0 : index
    %c0_338 = arith.constant 0 : index
    %341 = vector.load %arg4[%c42, %c0_337, %c0_338] : memref<49x128x128xbf16, #tpu.memory_space<vmem>>, vector<1x128x128xbf16>
    %342 = vector.shape_cast %341 : vector<1x128x128xbf16> to vector<128x128xbf16>
    %cst_339 = arith.constant dense<0.000000e+00> : vector<16x128xf32>
    %343 = tpu.matmul %340, %342, %cst_339 {dimension_numbers = #tpu.dot_dimension_numbers<[1], [0], [0], [1], [0, 0, 1, 1], [], []>} : vector<16x128xbf16>, vector<128x128xbf16>, vector<16x128xf32> -> vector<16x128xf32>
    %344 = arith.addf %336, %343 : vector<16x128xf32>
    %c3_i32_340 = arith.constant 3 : i32
    %345 = arith.addi %arg2, %c3_i32_340 : i32
    %c0_341 = arith.constant 0 : index
    %c1_342 = arith.constant 1 : index
    %346 = arith.index_cast %345 : i32 to index
    %c0_343 = arith.constant 0 : index
    %c0_344 = arith.constant 0 : index
    %347 = vector.load %arg3[%c0_341, %c1_342, %346, %c0_343, %c0_344] : memref<1x4x19x19x128xbf16, #tpu.memory_space<vmem>>, vector<1x1x1x16x128xbf16>
    %348 = vector.shape_cast %347 : vector<1x1x1x16x128xbf16> to vector<16x128xbf16>
    %c43 = arith.constant 43 : index
    %c0_345 = arith.constant 0 : index
    %c0_346 = arith.constant 0 : index
    %349 = vector.load %arg4[%c43, %c0_345, %c0_346] : memref<49x128x128xbf16, #tpu.memory_space<vmem>>, vector<1x128x128xbf16>
    %350 = vector.shape_cast %349 : vector<1x128x128xbf16> to vector<128x128xbf16>
    %cst_347 = arith.constant dense<0.000000e+00> : vector<16x128xf32>
    %351 = tpu.matmul %348, %350, %cst_347 {dimension_numbers = #tpu.dot_dimension_numbers<[1], [0], [0], [1], [0, 0, 1, 1], [], []>} : vector<16x128xbf16>, vector<128x128xbf16>, vector<16x128xf32> -> vector<16x128xf32>
    %352 = arith.addf %344, %351 : vector<16x128xf32>
    %c3_i32_348 = arith.constant 3 : i32
    %353 = arith.addi %arg2, %c3_i32_348 : i32
    %c0_349 = arith.constant 0 : index
    %c0_350 = arith.constant 0 : index
    %354 = arith.index_cast %353 : i32 to index
    %c1_351 = arith.constant 1 : index
    %c0_352 = arith.constant 0 : index
    %355 = vector.load %arg3[%c0_349, %c0_350, %354, %c1_351, %c0_352] : memref<1x4x19x19x128xbf16, #tpu.memory_space<vmem>>, vector<1x1x1x16x128xbf16>
    %356 = vector.shape_cast %355 : vector<1x1x1x16x128xbf16> to vector<16x128xbf16>
    %c44 = arith.constant 44 : index
    %c0_353 = arith.constant 0 : index
    %c0_354 = arith.constant 0 : index
    %357 = vector.load %arg4[%c44, %c0_353, %c0_354] : memref<49x128x128xbf16, #tpu.memory_space<vmem>>, vector<1x128x128xbf16>
    %358 = vector.shape_cast %357 : vector<1x128x128xbf16> to vector<128x128xbf16>
    %cst_355 = arith.constant dense<0.000000e+00> : vector<16x128xf32>
    %359 = tpu.matmul %356, %358, %cst_355 {dimension_numbers = #tpu.dot_dimension_numbers<[1], [0], [0], [1], [0, 0, 1, 1], [], []>} : vector<16x128xbf16>, vector<128x128xbf16>, vector<16x128xf32> -> vector<16x128xf32>
    %360 = arith.addf %352, %359 : vector<16x128xf32>
    %c3_i32_356 = arith.constant 3 : i32
    %361 = arith.addi %arg2, %c3_i32_356 : i32
    %c0_357 = arith.constant 0 : index
    %c1_358 = arith.constant 1 : index
    %362 = arith.index_cast %361 : i32 to index
    %c1_359 = arith.constant 1 : index
    %c0_360 = arith.constant 0 : index
    %363 = vector.load %arg3[%c0_357, %c1_358, %362, %c1_359, %c0_360] : memref<1x4x19x19x128xbf16, #tpu.memory_space<vmem>>, vector<1x1x1x16x128xbf16>
    %364 = vector.shape_cast %363 : vector<1x1x1x16x128xbf16> to vector<16x128xbf16>
    %c45 = arith.constant 45 : index
    %c0_361 = arith.constant 0 : index
    %c0_362 = arith.constant 0 : index
    %365 = vector.load %arg4[%c45, %c0_361, %c0_362] : memref<49x128x128xbf16, #tpu.memory_space<vmem>>, vector<1x128x128xbf16>
    %366 = vector.shape_cast %365 : vector<1x128x128xbf16> to vector<128x128xbf16>
    %cst_363 = arith.constant dense<0.000000e+00> : vector<16x128xf32>
    %367 = tpu.matmul %364, %366, %cst_363 {dimension_numbers = #tpu.dot_dimension_numbers<[1], [0], [0], [1], [0, 0, 1, 1], [], []>} : vector<16x128xbf16>, vector<128x128xbf16>, vector<16x128xf32> -> vector<16x128xf32>
    %368 = arith.addf %360, %367 : vector<16x128xf32>
    %c3_i32_364 = arith.constant 3 : i32
    %369 = arith.addi %arg2, %c3_i32_364 : i32
    %c0_365 = arith.constant 0 : index
    %c0_366 = arith.constant 0 : index
    %370 = arith.index_cast %369 : i32 to index
    %c2_367 = arith.constant 2 : index
    %c0_368 = arith.constant 0 : index
    %371 = vector.load %arg3[%c0_365, %c0_366, %370, %c2_367, %c0_368] : memref<1x4x19x19x128xbf16, #tpu.memory_space<vmem>>, vector<1x1x1x16x128xbf16>
    %372 = vector.shape_cast %371 : vector<1x1x1x16x128xbf16> to vector<16x128xbf16>
    %c46 = arith.constant 46 : index
    %c0_369 = arith.constant 0 : index
    %c0_370 = arith.constant 0 : index
    %373 = vector.load %arg4[%c46, %c0_369, %c0_370] : memref<49x128x128xbf16, #tpu.memory_space<vmem>>, vector<1x128x128xbf16>
    %374 = vector.shape_cast %373 : vector<1x128x128xbf16> to vector<128x128xbf16>
    %cst_371 = arith.constant dense<0.000000e+00> : vector<16x128xf32>
    %375 = tpu.matmul %372, %374, %cst_371 {dimension_numbers = #tpu.dot_dimension_numbers<[1], [0], [0], [1], [0, 0, 1, 1], [], []>} : vector<16x128xbf16>, vector<128x128xbf16>, vector<16x128xf32> -> vector<16x128xf32>
    %376 = arith.addf %368, %375 : vector<16x128xf32>
    %c3_i32_372 = arith.constant 3 : i32
    %377 = arith.addi %arg2, %c3_i32_372 : i32
    %c0_373 = arith.constant 0 : index
    %c1_374 = arith.constant 1 : index
    %378 = arith.index_cast %377 : i32 to index
    %c2_375 = arith.constant 2 : index
    %c0_376 = arith.constant 0 : index
    %379 = vector.load %arg3[%c0_373, %c1_374, %378, %c2_375, %c0_376] : memref<1x4x19x19x128xbf16, #tpu.memory_space<vmem>>, vector<1x1x1x16x128xbf16>
    %380 = vector.shape_cast %379 : vector<1x1x1x16x128xbf16> to vector<16x128xbf16>
    %c47 = arith.constant 47 : index
    %c0_377 = arith.constant 0 : index
    %c0_378 = arith.constant 0 : index
    %381 = vector.load %arg4[%c47, %c0_377, %c0_378] : memref<49x128x128xbf16, #tpu.memory_space<vmem>>, vector<1x128x128xbf16>
    %382 = vector.shape_cast %381 : vector<1x128x128xbf16> to vector<128x128xbf16>
    %cst_379 = arith.constant dense<0.000000e+00> : vector<16x128xf32>
    %383 = tpu.matmul %380, %382, %cst_379 {dimension_numbers = #tpu.dot_dimension_numbers<[1], [0], [0], [1], [0, 0, 1, 1], [], []>} : vector<16x128xbf16>, vector<128x128xbf16>, vector<16x128xf32> -> vector<16x128xf32>
    %384 = arith.addf %376, %383 : vector<16x128xf32>
    %c3_i32_380 = arith.constant 3 : i32
    %385 = arith.addi %arg2, %c3_i32_380 : i32
    %c0_381 = arith.constant 0 : index
    %c0_382 = arith.constant 0 : index
    %386 = arith.index_cast %385 : i32 to index
    %c3_383 = arith.constant 3 : index
    %c0_384 = arith.constant 0 : index
    %387 = vector.load %arg3[%c0_381, %c0_382, %386, %c3_383, %c0_384] : memref<1x4x19x19x128xbf16, #tpu.memory_space<vmem>>, vector<1x1x1x16x128xbf16>
    %388 = vector.shape_cast %387 : vector<1x1x1x16x128xbf16> to vector<16x128xbf16>
    %c48 = arith.constant 48 : index
    %c0_385 = arith.constant 0 : index
    %c0_386 = arith.constant 0 : index
    %389 = vector.load %arg4[%c48, %c0_385, %c0_386] : memref<49x128x128xbf16, #tpu.memory_space<vmem>>, vector<1x128x128xbf16>
    %390 = vector.shape_cast %389 : vector<1x128x128xbf16> to vector<128x128xbf16>
    %cst_387 = arith.constant dense<0.000000e+00> : vector<16x128xf32>
    %391 = tpu.matmul %388, %390, %cst_387 {dimension_numbers = #tpu.dot_dimension_numbers<[1], [0], [0], [1], [0, 0, 1, 1], [], []>} : vector<16x128xbf16>, vector<128x128xbf16>, vector<16x128xf32> -> vector<16x128xf32>
    %392 = arith.addf %384, %391 : vector<16x128xf32>
    %c0_388 = arith.constant 0 : index
    %c0_389 = arith.constant 0 : index
    %393 = vector.load %arg5[%c0_388, %c0_389] : memref<1x128xf32, #tpu.memory_space<vmem>>, vector<1x128xf32>
    %394 = vector.broadcast %393 : vector<1x128xf32> to vector<16x128xf32>
    %395 = arith.addf %392, %394 : vector<16x128xf32>
    %cst_390 = arith.constant 0.000000e+00 : f32
    %396 = vector.broadcast %cst_390 : f32 to vector<16x128xf32>
    %397 = arith.maximumf %395, %396 : vector<16x128xf32>
    %398 = arith.truncf %397 : vector<16x128xf32> to vector<16x128xbf16>
    %c0_391 = arith.constant 0 : index
    %c0_392 = arith.constant 0 : index
    %c0_393 = arith.constant 0 : index
    %c0_394 = arith.constant 0 : index
    %399 = vector.load %arg6[%c0_391, %c0_392, %c0_393, %c0_394] : memref<1x1x16x128xbf16, #tpu.memory_space<vmem>>, vector<1x1x16x128xbf16>
    %400 = vector.shape_cast %399 : vector<1x1x16x128xbf16> to vector<16x128xbf16>
    %401 = vector.shape_cast %398 : vector<16x128xbf16> to vector<1x1x16x128xbf16>
    tpu.vector_store %arg6[%c0_391, %c0_392, %c0_393, %c0_394], %401 {strides = array<i32>} : memref<1x1x16x128xbf16, #tpu.memory_space<vmem>>, vector<1x1x16x128xbf16>,
    return
  }
  func.func @transform_0(%arg0: i32, %arg1: i32, %arg2: i32) -> (i32, i32, i32, i32, i32) {
    %c0_i32 = arith.constant 0 : i32
    %c0_i32_0 = arith.constant 0 : i32
    %c0_i32_1 = arith.constant 0 : i32
    %c0_i32_2 = arith.constant 0 : i32
    %c0_i32_3 = arith.constant 0 : i32
    return %arg0, %c0_i32, %c0_i32_0, %c0_i32_1, %c0_i32_2 : i32, i32, i32, i32, i32
  }
  func.func @transform_1(%arg0: i32, %arg1: i32, %arg2: i32) -> (i32, i32, i32) {
    %c0_i32 = arith.constant 0 : i32
    %c0_i32_0 = arith.constant 0 : i32
    %c0_i32_1 = arith.constant 0 : i32
    return %c0_i32, %c0_i32_0, %arg1 : i32, i32, i32
  }
  func.func @transform_2(%arg0: i32, %arg1: i32, %arg2: i32) -> (i32, i32) {
    %c0_i32 = arith.constant 0 : i32
    %c0_i32_0 = arith.constant 0 : i32
    return %c0_i32, %arg1 : i32, i32
  }
  func.func @transform_3(%arg0: i32, %arg1: i32, %arg2: i32) -> (i32, i32, i32, i32) {
    %c0_i32 = arith.constant 0 : i32
    %c0_i32_0 = arith.constant 0 : i32
    return %arg0, %arg2, %c0_i32, %arg1 : i32, i32, i32, i32
  }
}

</mosaic_0001>

<bundles_post_ra>
// kernel: tpu_custom_call.1
= control target key start
LH: loop header
LB: loop body
LE: loop exit
PB: predicated region body
PF: predicated region fallthrough
CT: control target
= control target key end

     0   :  { %8 = vsyncpa [#allocation3], 0  ;;  %s12031_s0 = inlined_call_operand.vmem [shape: bf16[2,4,19,19,128], index: 0, kind: input, shape index: {}]   ;;  %s12032_s1 = inlined_call_operand.vmem [shape: bf16[49,128,128], index: 1, kind: input, shape index: {}]   ;;  %s12033_s2 = inlined_call_operand.vmem [shape: f32[1,128], index: 2, kind: input, shape index: {}]   ;;  %s12034_s3 = inlined_call_operand.hbm [shape: bf16[2,16,16,128], index: 3, kind: output, shape index: {}]  }
   0x1   :  { %10 = vsyncpa [#allocation3 + $0x1], 0  ;;  %s9884_s12 = smov 0   ;;  %s9886_s13 = smov 0  }
   0x2   :  { %s9888_s14 = smov 0   ;;  %s9890_s15 = smov 0  }
   0x3   :  { %s9892_s16 = smov 0   ;;  %s9894_s17 = smov 0  }
   0x4   :  { %s9896_s18 = smov 0   ;;  %s9898_s19 = smov 0  }
   0x5 LB: > { %s6469_s20 = sadd.s32 4294967295, %s9857_s19   ;;  %s6470_s21 = sadd.s32 4294967294, %s9857_s19   ;;  %s9857_s19 = sphi %s9898_s19, %s16_s19   ;;  %s9853_s18 = sphi %s9896_s18, %s12043_s18   ;;  %s9849_s17 = sphi %s9894_s17, %s12042_s17   ;;  %s9845_s16 = sphi %s9892_s16, %s12041_s16   ;;  %s9841_s15 = sphi %s9890_s15, %s12040_s15   ;;  %s9837_s14 = sphi %s9888_s14, %s12039_s14   ;;  %s9833_s13 = sphi %s9886_s13, %s12038_s13   ;;  %s9829_s12 = sphi %s9884_s12, %s12037_s12  }
   0x6   : > { %s28_s22 = sadd.s32 1, %s9849_s17  ;;  %s35_s23 = sadd.s32 1, %s9853_s18 }
   0x7   : > { %p29_p0 = scmp.ge.s32.totalorder %s28_s22, 16  ;;  %p134_p1 = scmp.ne.s32.totalorder %s9837_s14, %s9833_s13 }
   0x8   : > { %p135_p2 = scmp.eq.s32.totalorder %s6469_s20, 31  ;;  %p140_p5 = scmp.ne.s32.totalorder %s9833_s13, %s9829_s12 }
   0x9   : > { %s12045_s22 = smov (%p29_p0, %s28_s22), 0  ;;  %s12047_s23 = smov (!%p29_p0, %s35_s23), %s9853_s18 }
   0xa   : > { %s118_s24 = ssub.s32 %s9849_s17, %s12045_s22  ;;  %p9935_p3 = por %p135_p2, %p134_p1 }
   0xb   : > { %p37_p4 = scmp.ge.s32.totalorder %s12047_s23, 2  ;;  %p141_p6 = scmp.eq.s32.totalorder %s6470_s21, 31 }
   0xc   : > { %p6475_p7 = scmp.ge.s32.totalorder %s9857_s19, 1  ;;  %p180_p9 = scmp.lt.s32.totalorder %s9857_s19, 33 }
   0xd   : > { %s12049_s23 = smov (%p37_p4, %s12047_s23), 0  ;;  %p9944_p8 = por %p141_p6, %p140_p5 }
   0xe   : > { %s117_s27 = ssub.s32 %s9853_s18, %s12049_s23  ;;  %s124_s28 = sadd.s32 1, %s9837_s14 }
   0xf   : > { %s119_s29 = sor.u32 %s118_s24, %s117_s27  ;;  %p181_p10 = pnand %p6475_p7, %p180_p9 }
  0x10   : > { %p122_p11 = scmp.eq.s32.totalorder %s119_s29, 0  ;;  %p211_p12 = scmp.lt.s32.totalorder (!%p181_p10), %s9845_s16, 1 }
  0x11   : > { %184 = sbr.rel (%p181_p10) target bundleno = 1042 (0x412), region = 32  ;;  %s7800_s24 = sshll.u32 (!%p181_p10), %s9841_s15, 1 }
  0x12   : > { %s9953_s30 = scalar_select %p122_p11, %s9837_s14, %s124_s28  }
  0x13   : > { %s7805_s8 = smul.u32 (!%p181_p10), 12, %s9841_s15  ;;  %s7801_s27 = sshll.u32 (!%p181_p10), %s9845_s16, 5 }
  0x16   : > { %v9310_v0 = vld [vmem:[%s12032_s1 + $0x78] sm:$0xff]   ;;  %v9859_v1 = vmov 0.0   ;;  %v9312_v3 = vld [vmem:[%s12032_s1 + $0x70] sm:$0xff]   ;;  %vm9860_vm0 = vmmov 0   ;;  %s212_s20 = scalar_select %p211_p12, %s9845_s16, 1  ;;  %v9314_v5 = vld [vmem:[%s12032_s1 + $0x68] sm:$0xff]  }
  0x17   : > { %8254 = vmatprep.subr.bf16.mxu0 %v9859_v1  ;;  %8274 = vmatprep.subr.bf16.mxu1 %v9859_v1  ;;  %v9311_v2 = vld [vmem:[%s12032_s1 + $0x38] sm:$0xff]   ;;  %v9313_v4 = vld [vmem:[%s12032_s1 + $0x30] sm:$0xff]   ;;  %v9315_v6 = vld [vmem:[%s12032_s1 + $0x28] sm:$0xff]   ;;  %vm485_vm1 = vsmask.f32 7424  ;;  %vm743_vm2 = vcmask 1046528  }
  0x18   : > { %8255 = vmatpush3.bf16.msra.mxu0 %v9310_v0  ;;  %8270 = vmatprep.mubr.msk.bf16.mxu0 %vm9860_vm0, %v9859_v1  ;;  %s9234_s29 = smul.u32 912, %s212_s20  ;;  %v9316_v7 = vld [vmem:[%s12032_s1 + $0x60] sm:$0xff]   ;;  %v9318_v9 = vld [vmem:[%s12032_s1 + $0x58] sm:$0xff]   ;;  %v9320_v11 = vld [vmem:[%s12032_s1 + $0x50] sm:$0xff]   ;;  %vm976_vm3 = vsmask.f32 6400 }
  0x19   : > { %8275 = vmatpush3.bf16.msra.mxu1 %v9311_v2  ;;  %8256 = vmatprep.subr.bf16.mxu0 %v9859_v1  ;;  %v9317_v8 = vld [vmem:[%s12032_s1 + $0x20] sm:$0xff]   ;;  %v9319_v10 = vld [vmem:[%s12032_s1 + $0x18] sm:$0xff]   ;;  %v9321_v12 = vld [vmem:[%s12032_s1 + $0x10] sm:$0xff]   ;;  %s208_s20 = sand.u32 1, %s9833_s13  }
  0x1a   : > { %8276 = vmatprep.subr.bf16.mxu1 %v9859_v1  ;;  %8290 = vmatprep.mubr.msk.bf16.mxu1 %vm9860_vm0, %v9859_v1  ;;  %s215_s11 = scalar_lea.vmem %s12031_s0, %s9234_s29  ;;  %v9322_v13 = vld [vmem:[%s12032_s1 + $0x48] sm:$0xff]   ;;  %v9324_v15 = vld [vmem:[%s12032_s1 + $0x40] sm:$0xff]   ;;  %v9328_v19 = vld [vmem:[%s12032_s1 + $0xb8] sm:$0xff]   ;;  %s6476_s21 = sshll.u32 %s208_s20, 3 }
  0x1b   : > { %s10004_s28 = scalar_lea.vmem %s215_s11, %s7805_s8  ;;  %v9323_v14 = vld [vmem:[%s12032_s1 + $0x8] sm:$0xff]   ;;  %v9325_v16 = vld [vmem:[%s12032_s1] sm:$0xff]   ;;  %v9329_v20 = vld [vmem:[%s12032_s1 + $0xf8] sm:$0xff]   ;;  %s6308_s29 = sadd.s32 %s7801_s27, %s7800_s24 }
  0x1c   : > { %8257 = vmatpush3.bf16.msra.mxu0 %v9312_v3  ;;  %v9326_v17 = vld [vmem:[%s10004_s28 + $0xe4] sm:$0xff]   ;;  %v9330_v21 = vld [vmem:[%s12032_s1 + $0xb0] sm:$0xff]   ;;  %v457_v27 = vld [vmem:[%s10004_s28] sm:$0xf]  ;;  %s7802_s6 = sshll.u32 %s6308_s29, 6  ;;  %s210_s7 = scalar_lea.vmem [#allocation2], %s6476_s21 }
  0x1d   : > { %8277 = vmatpush3.bf16.msra.mxu1 %v9313_v4  ;;  %8258 = vmatprep.subr.bf16.mxu0 %v9859_v1  ;;  %v9327_v18 = vld [vmem:[%s10004_s28] sm:$0xff]   ;;  %v9331_v22 = vld [vmem:[%s12032_s1 + $0xf0] sm:$0xff]   ;;  %v9332_v23 = vld [vmem:[%s12032_s1 + $0xa8] sm:$0xff]   ;;  %s6311_s8 = sshll.u32 %s210_s7, 4  ;;  %s11976_s9 = scalar_lea.hbm %s12034_s3, %s7802_s6  ;;  %s11978_s8 = int_to_ptr.vmem [resolvable:$true] %s6311_s8 }
  0x1e   : > { %8278 = vmatprep.subr.bf16.mxu1 %v9859_v1  ;;  %v9333_v24 = vld [vmem:[%s12032_s1 + $0xe8] sm:$0xff]   ;;  %v9334_v25 = vld [vmem:[%s12032_s1 + $0xa0] sm:$0xff]   ;;  %v9336_v31 = vld [vmem:[%s12032_s1 + $0x98] sm:$0xff]   ;;  %s11980_s10 = scalar_lea.sflag [#allocation3], %s208_s20  ;;  %s9861_s11 = smov [#allocation2]  }
  0x1f   : > { %v9335_v26 = vld [vmem:[%s12032_s1 + $0xe0] sm:$0xff]   ;;  %v10075_v30 = vld [vmem:[%s10004_s28 + $0xe8] sm:$0xf]  ;;  %v9337_v33 = vld [vmem:[%s12032_s1 + $0xd8] sm:$0xff]   ;;  %s9769_s21 = sshll.u32 %s9861_s11, 4  ;;  %s9770_s21 = int_to_ptr.vmem [resolvable:$false] %s9769_s21 }
  0x20   : > { %8259 = vmatpush3.bf16.msra.mxu0 %v9314_v5  ;;  %v10069_v28 = vld [vmem:[%s10004_s28 + $0x4] sm:$0xf]  ;;  %v10088_v35 = vld [vmem:[%s10004_s28 + $0x8] ss:$0 sps:$4 sm:$0x11]   ;;  %v9338_v37 = vld [vmem:[%s12032_s1 + $0x90] sm:$0xff]   ;;  %p9772_p2 = scmp.lt.s32.totalorder %s11978_s8, %s9770_s21 }
  0x21   : > { %8279 = vmatpush3.bf16.msra.mxu1 %v9315_v6  ;;  %8260 = vmatprep.subr.bf16.mxu0 %v9859_v1  ;;  %v6542_v29 = vld [vmem:[%s10004_s28 + $0xe4] sm:$0xf]  ;;  %v6532_v32 = vcombine.low %v457_v27, %v10069_v28  ;;  %v10091_v36 = vld [vmem:[%s10004_s28 + $0xec] ss:$0 sps:$4 sm:$0x11]   ;;  %v9339_v39 = vld [vmem:[%s12032_s1 + $0xd0] sm:$0xff]  }
  0x22   : > { %8280 = vmatprep.subr.bf16.mxu1 %v9859_v1  ;;  %v6561_v34 = vcombine.low %v6542_v29, %v10075_v30  ;;  %v9340_v41 = vld [vmem:[%s12032_s1 + $0x88] sm:$0xff]   ;;  %v494_v44 = vshll.u32 %v10088_v35, 16  ;;  %v626_v48 = vshll.u32 %v10091_v36, 16  ;;  %v9342_v49 = vld [vmem:[%s12032_s1 + $0x80] sm:$0xff]   ;;  %v9346_v56 = vld [vmem:[%s12032_s1 + $0x138] sm:$0xff]   ;;  %s9771_s24 = scalar_lea.vmem %s9770_s21, 256 }
  0x23   : > { %v489_v38 = vshll.u32 %v6532_v32, 16  ;;  %v487_v42 = vshrl.u32 %v6532_v32, 16  ;;  %v9341_v45 = vld [vmem:[%s12032_s1 + $0xc8] sm:$0xff]   ;;  %v9343_v52 = vld [vmem:[%s12032_s1 + $0xc0] sm:$0xff]   ;;  %v9349_v58 = vld [vmem:[%s12032_s1 + $0x178] sm:$0xff]  }
  0x24   : > { %8261 = vmatpush3.bf16.msra.mxu0 %v9316_v7  ;;  %v621_v40 = vshll.u32 %v6561_v34, 16  ;;  %v619_v46 = vshrl.u32 %v6561_v34, 16  ;;  %v496_v51 = vrot.slane %v494_v44, 1  ;;  %v628_v54 = vrot.slane %v626_v48, 1  ;;  %v9350_v59 = vld [vmem:[%s12032_s1 + $0x130] sm:$0xff]   ;;  %v9352_v61 = vld [vmem:[%s12032_s1 + $0x128] sm:$0xff]  }
  0x25   : > { %8281 = vmatpush3.bf16.msra.mxu1 %v9317_v8  ;;  %8262 = vmatprep.subr.bf16.mxu0 %v9859_v1  ;;  %v491_v43 = vrot.slane %v489_v38, 1  ;;  %v9351_v60 = vld [vmem:[%s12032_s1 + $0x170] sm:$0xff]   ;;  %v9353_v62 = vld [vmem:[%s12032_s1 + $0x168] sm:$0xff]   ;;  %v9354_v63 = vld [vmem:[%s12032_s1 + $0x120] sm:$0xff]  }
  0x26   : > { %8282 = vmatprep.subr.bf16.mxu1 %v9859_v1  ;;  %v623_v47 = vrot.slane %v621_v40, 1  ;;  %v9355_v0 = vld [vmem:[%s12032_s1 + $0x160] sm:$0xff]   ;;  %v9356_v2 = vld [vmem:[%s12032_s1 + $0x118] sm:$0xff]   ;;  %v9358_v4 = vld [vmem:[%s12032_s1 + $0x110] sm:$0xff]  }
  0x27   : > { %v492_v50 = vor.u32 %v491_v43, %v487_v42  ;;  %v9357_v3 = vld [vmem:[%s12032_s1 + $0x158] sm:$0xff]   ;;  %v9359_v5 = vld [vmem:[%s12032_s1 + $0x150] sm:$0xff]   ;;  %v722_v6 = vld [vmem:[%s10004_s28] sm:$0xe] }
  0x28   : > { %8263 = vmatpush3.bf16.msra.mxu0 %v9318_v9  ;;  %v624_v53 = vor.u32 %v623_v47, %v619_v46  ;;  %v6596_v7 = vld [vmem:[%s10004_s28 + $0xe4] sm:$0xe]  ;;  %v9360_v8 = vld [vmem:[%s12032_s1 + $0x108] sm:$0xff]   ;;  %v10179_v9 = vcombine.low %v722_v6, %v10069_v28  ;;  %v9374_v29 = vld [vmem:[%s12032_s1 + $0x198] sm:$0xff]  }
  0x29   : > { %8283 = vmatpush3.bf16.msra.mxu1 %v9319_v10  ;;  %8264 = vmatprep.subr.bf16.mxu0 %v9859_v1  ;;  %v497_v55 = vsel %vm485_vm1, %v492_v50, %v496_v51  ;;  %v9361_v10 = vld [vmem:[%s12032_s1 + $0x148] sm:$0xff]   ;;  %v9373_v27 = vld [vmem:[%s12032_s1 + $0x1e0] sm:$0xff]   ;;  %v9376_v32 = vld [vmem:[%s12032_s1 + $0x190] sm:$0xff]  }
  0x2a   : > { %8284 = vmatprep.subr.bf16.mxu1 %v9859_v1  ;;  %v629_v57 = vsel %vm485_vm1, %v624_v53, %v628_v54  ;;  %v9382_v28 = vld [vmem:[%s10004_s28 + $0x8] ss:$0 sps:$4 sm:$0x33]   ;;  %v9380_v43 = vld [vmem:[%s12032_s1 + $0x180] sm:$0xff]   ;;  %v9383_v48 = vld [vmem:[%s12032_s1 + $0x238] sm:$0xff]  }
  0x2b   : > { %v986_v34 = vshrl.u32 %v9382_v28, 16  ;;  %v9378_v38 = vld [vmem:[%s12032_s1 + $0x188] sm:$0xff]   ;;  %v9381_v44 = vld [vmem:[%s12032_s1 + $0x1c0] sm:$0xff]   ;;  %v9385_v50 = vld [vmem:[%s12032_s1 + $0x278] sm:$0xff]  }
  0x2c   : > { %8265 = vmatpush3.bf16.msra.mxu0 %v9320_v11  ;;  %v6613_v11 = vcombine.low %v6596_v7, %v10075_v30  ;;  %v9375_v30 = vld [vmem:[%s12032_s1 + $0x1d8] sm:$0xff]   ;;  %v9379_v42 = vld [vmem:[%s12032_s1 + $0x1c8] sm:$0xff]   ;;  %v9386_v51 = vld [vmem:[%s12032_s1 + $0x230] sm:$0xff]  }
  0x2d   : > { %8285 = vmatpush3.bf16.msra.mxu1 %v9321_v12  ;;  %8266 = vmatprep.subr.bf16.mxu0 %v9859_v1  ;;  %v745_v12 = vrot.slane %v10088_v35, 1  ;;  %v989_v35 = vshll.u32 %v9382_v28, 16  ;;  %v988_v40 = vrot.slane %v986_v34, 1  ;;  %v9388_v53 = vld [vmem:[%s12032_s1 + $0x228] sm:$0xff]   ;;  %v9413_v28 = vld [vmem:[%s12032_s1 + $0x290] sm:$0xff]  }
  0x2e   : > { %8286 = vmatprep.subr.bf16.mxu1 %v9859_v1  ;;  %v9389_v54 = vld [vmem:[%s12032_s1 + $0x268] sm:$0xff]  }
  0x30   : > { %8267 = vmatpush3.bf16.msra.mxu0 %v9322_v13  ;;  %v9362_v13 = vld [vmem:[%s12032_s1 + $0x100] sm:$0xff]  }
  0x31   : > { %8287 = vmatpush3.bf16.msra.mxu1 %v9323_v14  ;;  %8268 = vmatprep.subr.bf16.mxu0 %v9859_v1  ;;  %v744_v14 = vrot.slane %v10179_v9, 1 }
  0x32   : > { %8288 = vmatprep.subr.bf16.mxu1 %v9859_v1 }
  0x34   : > { %8269 = vmatpush3.bf16.msra.mxu0 %v9324_v15  ;;  %v9363_v15 = vld [vmem:[%s12032_s1 + $0x140] sm:$0xff]  }
  0x35   : > { %8289 = vmatpush3.bf16.msra.mxu1 %v9325_v16  ;;  %8294 = vmatprep.subr.bf16.mxu0 %v9859_v1  ;;  %v860_v16 = vrot.slane %v6613_v11, 1 }
  0x36   : > { %8314 = vmatprep.subr.bf16.mxu1 %v9859_v1 }
  0x37   : > { %8271 = vmatmul.mubr.bf16.vlgmr.msra.gmra.mxu0 %v9326_v17  ;;  %v861_v17 = vrot.slane %v10091_v36, 1  ;;  %v9377_v36 = vld [vmem:[%s12032_s1 + $0x1d0] sm:$0xff]  }
  0x38   : > { %8291 = vmatmul.mubr.bf16.vlgmr.msra.gmra.mxu1 %v9327_v18  ;;  %8295 = vmatpush3.bf16.msra.mxu0 %v9328_v19  ;;  %v746_v18 = vsel %vm743_vm2, %v744_v14, %v745_v12  ;;  %v9365_v19 = vld [vmem:[%s12032_s1 + $0x1b8] sm:$0xff]   ;;  %v9400_v12 = vld [vmem:[%s10004_s28 + $0x2ac] sm:$0xff]  }
  0x39   : > { %8315 = vmatpush3.bf16.msra.mxu1 %v9329_v20  ;;  %8296 = vmatprep.subr.bf16.mxu0 %v9859_v1  ;;  %v862_v20 = vsel %vm743_vm2, %v860_v16, %v861_v17  ;;  %v9405_v16 = vld [vmem:[%s12032_s1 + $0x2b0] sm:$0xff]  }
  0x3a   : > { %8316 = vmatprep.subr.bf16.mxu1 %v9859_v1  ;;  %8310 = vmatprep.mubr.msk.bf16.mxu0 %vm9860_vm0, %v9859_v1  ;;  %v9406_v17 = vld [vmem:[%s12032_s1 + $0x2f0] sm:$0xff]  }
  0x3b   : > { %8330 = vmatprep.mubr.msk.bf16.mxu1 %vm9860_vm0, %v9859_v1 }
  0x3c   : > { %8297 = vmatpush3.bf16.msra.mxu0 %v9330_v21  ;;  %v9367_v21 = vld [vmem:[%s12032_s1 + $0x1f8] sm:$0xff]  }
  0x3d   : > { %8317 = vmatpush3.bf16.msra.mxu1 %v9331_v22  ;;  %8298 = vmatprep.subr.bf16.mxu0 %v9859_v1  ;;  %v9368_v22 = vld [vmem:[%s12032_s1 + $0x1b0] sm:$0xff]  }
  0x3e   : > { %8318 = vmatprep.subr.bf16.mxu1 %v9859_v1 }
  0x40   : > { %8299 = vmatpush3.bf16.msra.mxu0 %v9332_v23  ;;  %v9369_v23 = vld [vmem:[%s12032_s1 + $0x1f0] sm:$0xff]  }
  0x41   : > { %8319 = vmatpush3.bf16.msra.mxu1 %v9333_v24  ;;  %8300 = vmatprep.subr.bf16.mxu0 %v9859_v1  ;;  %v9370_v24 = vld [vmem:[%s12032_s1 + $0x1a8] sm:$0xff]  }
  0x42   : > { %8320 = vmatprep.subr.bf16.mxu1 %v9859_v1 }
  0x44   : > { %8301 = vmatpush3.bf16.msra.mxu0 %v9334_v25  ;;  %v9371_v25 = vld [vmem:[%s12032_s1 + $0x1e8] sm:$0xff]  }
  0x45   : > { %8321 = vmatpush3.bf16.msra.mxu1 %v9335_v26  ;;  %8302 = vmatprep.subr.bf16.mxu0 %v9859_v1  ;;  %v9372_v26 = vld [vmem:[%s12032_s1 + $0x1a0] sm:$0xff]  }
  0x46   : > { %8322 = vmatprep.subr.bf16.mxu1 %v9859_v1 }
  0x48   : > { %8303 = vmatpush3.bf16.msra.mxu0 %v9336_v31  ;;  %v978_v31 = vshrl.u32 %v10179_v9, 16 }
  0x49   : > { %8323 = vmatpush3.bf16.msra.mxu1 %v9337_v33  ;;  %8304 = vmatprep.subr.bf16.mxu0 %v9859_v1  ;;  %v981_v33 = vshll.u32 %v10179_v9, 16  ;;  %v9399_v9 = vld [vmem:[%s12032_s1 + $0x240] sm:$0xff]  }
  0x4a   : > { %8324 = vmatprep.subr.bf16.mxu1 %v9859_v1 }
  0x4c   : > { %8305 = vmatpush3.bf16.msra.mxu0 %v9338_v37  ;;  %v980_v37 = vrot.slane %v978_v31, 1  ;;  %v9414_v31 = vld [vmem:[%s12032_s1 + $0x2d0] sm:$0xff]  }
  0x4d   : > { %8325 = vmatpush3.bf16.msra.mxu1 %v9339_v39  ;;  %8306 = vmatprep.subr.bf16.mxu0 %v9859_v1  ;;  %v983_v39 = vrot.slane %v981_v33, 2  ;;  %v9415_v33 = vld [vmem:[%s12032_s1 + $0x288] sm:$0xff]  }
  0x4e   : > { %8326 = vmatprep.subr.bf16.mxu1 %v9859_v1 }
  0x50   : > { %8307 = vmatpush3.bf16.msra.mxu0 %v9340_v41  ;;  %v991_v41 = vrot.slane %v989_v35, 2 }
  0x51   : > { %8327 = vmatpush3.bf16.msra.mxu1 %v9341_v45  ;;  %8308 = vmatprep.subr.bf16.mxu0 %v9859_v1  ;;  %v984_v45 = vor.u32 %v983_v39, %v980_v37  ;;  %v9417_v39 = vld [vmem:[%s12032_s1 + $0x280] sm:$0xff]  }
  0x52   : > { %8328 = vmatprep.subr.bf16.mxu1 %v9859_v1  ;;  %v992_v46 = vor.u32 %v991_v41, %v988_v40 }
  0x54   : > { %8309 = vmatpush3.bf16.msra.mxu0 %v9342_v49  ;;  %v993_v47 = vsel %vm976_vm3, %v984_v45, %v992_v46  ;;  %v9384_v49 = vld [vmem:[%s10004_s28 + $0x1c8] sm:$0xff]   ;;  %v9421_v45 = vld [vmem:[%s12032_s1 + $0x338] sm:$0xff]  }
  0x55   : > { %8329 = vmatpush3.bf16.msra.mxu1 %v9343_v52  ;;  %8334 = vmatprep.subr.bf16.mxu0 %v9859_v1  ;;  %v9387_v52 = vld [vmem:[%s12032_s1 + $0x270] sm:$0xff]  }
  0x56   : > { %8354 = vmatprep.subr.bf16.mxu1 %v9859_v1 }
  0x57   : > { %8311 = vmatmul.mubr.bf16.vlgmr.msra.gmra.mxu0 %v497_v55  ;;  %v9390_v55 = vld [vmem:[%s12032_s1 + $0x220] sm:$0xff]  }
  0x58   : > { %8335 = vmatpush3.bf16.msra.mxu0 %v9346_v56  ;;  %8331 = vmatmul.mubr.bf16.vlgmr.msra.gmra.mxu1 %v629_v57  ;;  %v9391_v56 = vld [vmem:[%s12032_s1 + $0x260] sm:$0xff]   ;;  %v6703_v57 = vld [vmem:[%s10004_s28 + $0x1c8] sm:$0xf] }
  0x59   : > { %8355 = vmatpush3.bf16.msra.mxu1 %v9349_v58  ;;  %8336 = vmatprep.subr.bf16.mxu0 %v9859_v1  ;;  %v10311_v58 = vld [vmem:[%s10004_s28 + $0x1cc] sm:$0xf] }
  0x5a   : > { %8356 = vmatprep.subr.bf16.mxu1 %v9859_v1  ;;  %8350 = vmatprep.mubr.msk.bf16.mxu0 %vm9860_vm0, %v9859_v1 }
  0x5b   : > { %8370 = vmatprep.mubr.msk.bf16.mxu1 %vm9860_vm0, %v9859_v1 }
  0x5c   : > { %8337 = vmatpush3.bf16.msra.mxu0 %v9350_v59  ;;  %v9392_v59 = vld [vmem:[%s12032_s1 + $0x218] sm:$0xff]  }
  0x5d   : > { %8357 = vmatpush3.bf16.msra.mxu1 %v9351_v60  ;;  %8338 = vmatprep.subr.bf16.mxu0 %v9859_v1  ;;  %v9393_v60 = vld [vmem:[%s12032_s1 + $0x258] sm:$0xff]  }
  0x5e   : > { %8358 = vmatprep.subr.bf16.mxu1 %v9859_v1 }
  0x60   : > { %8339 = vmatpush3.bf16.msra.mxu0 %v9352_v61  ;;  %v6722_v61 = vcombine.low %v6703_v57, %v10311_v58 }
  0x61   : > { %8359 = vmatpush3.bf16.msra.mxu1 %v9353_v62  ;;  %8340 = vmatprep.subr.bf16.mxu0 %v9859_v1  ;;  %v10323_v62 = vld [vmem:[%s10004_s28 + $0x1d0] ss:$0 sps:$4 sm:$0x11]  }
  0x62   : > { %8360 = vmatprep.subr.bf16.mxu1 %v9859_v1  ;;  %v1360_v7 = vshll.u32 %v10323_v62, 16 }
  0x64   : > { %8341 = vmatpush3.bf16.msra.mxu0 %v9354_v63  ;;  %v9394_v63 = vld [vmem:[%s12032_s1 + $0x210] sm:$0xff]   ;;  %v1362_v11 = vrot.slane %v1360_v7, 1 }
  0x65   : > { %8361 = vmatpush3.bf16.msra.mxu1 %v9355_v0  ;;  %8342 = vmatprep.subr.bf16.mxu0 %v9859_v1  ;;  %v9395_v0 = vld [vmem:[%s12032_s1 + $0x250] sm:$0xff]  }
  0x66   : > { %8362 = vmatprep.subr.bf16.mxu1 %v9859_v1 }
  0x68   : > { %8343 = vmatpush3.bf16.msra.mxu0 %v9356_v2  ;;  %v1355_v2 = vshll.u32 %v6722_v61, 16 }
  0x69   : > { %8363 = vmatpush3.bf16.msra.mxu1 %v9357_v3  ;;  %8344 = vmatprep.subr.bf16.mxu0 %v9859_v1  ;;  %v9396_v3 = vld [vmem:[%s12032_s1 + $0x208] sm:$0xff]  }
  0x6a   : > { %8364 = vmatprep.subr.bf16.mxu1 %v9859_v1  ;;  %v1357_v6 = vrot.slane %v1355_v2, 1  ;;  %v9434_v2 = vld [vmem:[%s12032_s1 + $0x308] sm:$0xff]  }
  0x6c   : > { %8345 = vmatpush3.bf16.msra.mxu0 %v9358_v4  ;;  %v9397_v4 = vld [vmem:[%s12032_s1 + $0x248] sm:$0xff]  }
  0x6d   : > { %8365 = vmatpush3.bf16.msra.mxu1 %v9359_v5  ;;  %8346 = vmatprep.subr.bf16.mxu0 %v9859_v1  ;;  %v1353_v5 = vshrl.u32 %v6722_v61, 16  ;;  %v9433_v61 = vld [vmem:[%s12032_s1 + $0x350] sm:$0xff]  }
  0x6e   : > { %8366 = vmatprep.subr.bf16.mxu1 %v9859_v1 }
  0x70   : > { %8347 = vmatpush3.bf16.msra.mxu0 %v9360_v8  ;;  %v9398_v8 = vld [vmem:[%s12032_s1 + $0x200] sm:$0xff]  }
  0x71   : > { %8367 = vmatpush3.bf16.msra.mxu1 %v9361_v10  ;;  %8348 = vmatprep.subr.bf16.mxu0 %v9859_v1  ;;  %v1358_v10 = vor.u32 %v1357_v6, %v1353_v5 }
  0x72   : > { %8368 = vmatprep.subr.bf16.mxu1 %v9859_v1 }
  0x73   : > { %v1363_v14 = vsel %vm485_vm1, %v1358_v10, %v1362_v11  ;;  %v9437_v11 = vld [vmem:[%s12032_s1 + $0x340] sm:$0xff]  }
  0x74   : > { %8349 = vmatpush3.bf16.msra.mxu0 %v9362_v13  ;;  %v9401_v13 = vld [vmem:[%s12032_s1 + $0x2b8] sm:$0xff]  }
  0x75   : > { %8369 = vmatpush3.bf16.msra.mxu1 %v9363_v15  ;;  %8374 = vmatprep.subr.bf16.mxu0 %v9859_v1  ;;  %v9404_v15 = vld [vmem:[%s12032_s1 + $0x2f8] sm:$0xff]  }
  0x76   : > { %8394 = vmatprep.subr.bf16.mxu1 %v9859_v1 }
  0x77   : > { %8351 = vmatmul.mubr.bf16.vlgmr.msra.gmra.mxu0 %v746_v18  ;;  %v9407_v18 = vld [vmem:[%s12032_s1 + $0x2a8] sm:$0xff]  }
  0x78   : > { %8375 = vmatpush3.bf16.msra.mxu0 %v9365_v19  ;;  %8371 = vmatmul.mubr.bf16.vlgmr.msra.gmra.mxu1 %v862_v20  ;;  %v9408_v19 = vld [vmem:[%s12032_s1 + $0x2e8] sm:$0xff]   ;;  %v9409_v20 = vld [vmem:[%s12032_s1 + $0x2a0] sm:$0xff]  }
  0x79   : > { %8395 = vmatpush3.bf16.msra.mxu1 %v9367_v21  ;;  %8376 = vmatprep.subr.bf16.mxu0 %v9859_v1  ;;  %v9410_v21 = vld [vmem:[%s12032_s1 + $0x2e0] sm:$0xff]  }
  0x7a   : > { %8396 = vmatprep.subr.bf16.mxu1 %v9859_v1  ;;  %8390 = vmatprep.mubr.msk.bf16.mxu0 %vm9860_vm0, %v9859_v1 }
  0x7b   : > { %8410 = vmatprep.mubr.msk.bf16.mxu1 %vm9860_vm0, %v9859_v1 }
  0x7c   : > { %8377 = vmatpush3.bf16.msra.mxu0 %v9368_v22  ;;  %v6732_v22 = vld [vmem:[%s10004_s28 + $0x2ac] sm:$0xf] }
  0x7d   : > { %8397 = vmatpush3.bf16.msra.mxu1 %v9369_v23  ;;  %8378 = vmatprep.subr.bf16.mxu0 %v9859_v1  ;;  %v10389_v23 = vld [vmem:[%s10004_s28 + $0x2b0] sm:$0xf] }
  0x7e   : > { %8398 = vmatprep.subr.bf16.mxu1 %v9859_v1 }
  0x80   : > { %8379 = vmatpush3.bf16.msra.mxu0 %v9370_v24  ;;  %v9411_v24 = vld [vmem:[%s12032_s1 + $0x298] sm:$0xff]  }
  0x81   : > { %8399 = vmatpush3.bf16.msra.mxu1 %v9371_v25  ;;  %8380 = vmatprep.subr.bf16.mxu0 %v9859_v1  ;;  %v6751_v25 = vcombine.low %v6732_v22, %v10389_v23 }
  0x82   : > { %8400 = vmatprep.subr.bf16.mxu1 %v9859_v1 }
  0x84   : > { %8381 = vmatpush3.bf16.msra.mxu0 %v9372_v26  ;;  %v9412_v26 = vld [vmem:[%s12032_s1 + $0x2d8] sm:$0xff]  }
  0x85   : > { %8401 = vmatpush3.bf16.msra.mxu1 %v9373_v27  ;;  %8382 = vmatprep.subr.bf16.mxu0 %v9859_v1  ;;  %v10402_v27 = vld [vmem:[%s10004_s28 + $0x2b4] ss:$0 sps:$4 sm:$0x11]  }
  0x86   : > { %8402 = vmatprep.subr.bf16.mxu1 %v9859_v1  ;;  %v1492_v35 = vshll.u32 %v10402_v27, 16 }
  0x88   : > { %8383 = vmatpush3.bf16.msra.mxu0 %v9374_v29  ;;  %v1487_v29 = vshll.u32 %v6751_v25, 16  ;;  %v1494_v41 = vrot.slane %v1492_v35, 1  ;;  %v9449_v35 = vld [vmem:[%s12032_s1 + $0x3d8] sm:$0xff]  }
  0x89   : > { %8403 = vmatpush3.bf16.msra.mxu1 %v9375_v30  ;;  %8384 = vmatprep.subr.bf16.mxu0 %v9859_v1  ;;  %v6761_v30 = vld [vmem:[%s10004_s28 + $0x1c8] sm:$0xe] }
  0x8a   : > { %8404 = vmatprep.subr.bf16.mxu1 %v9859_v1  ;;  %v1489_v34 = vrot.slane %v1487_v29, 1  ;;  %v10422_v37 = vcombine.low %v6761_v30, %v10311_v58  ;;  %v9431_v58 = vld [vmem:[%s12032_s1 + $0x358] sm:$0xff]   ;;  %v9445_v30 = vld [vmem:[%s12032_s1 + $0x3e8] sm:$0xff]  }
  0x8c   : > { %8385 = vmatpush3.bf16.msra.mxu0 %v9376_v32  ;;  %v1485_v32 = vshrl.u32 %v6751_v25, 16  ;;  %v1845_v57 = vshll.u32 %v10422_v37, 16 }
  0x8d   : > { %8405 = vmatpush3.bf16.msra.mxu1 %v9377_v36  ;;  %8386 = vmatprep.subr.bf16.mxu0 %v9859_v1  ;;  %v9416_v36 = vld [vmem:[%s12032_s1 + $0x2c8] sm:$0xff]  }
  0x8e   : > { %8406 = vmatprep.subr.bf16.mxu1 %v9859_v1  ;;  %v1490_v40 = vor.u32 %v1489_v34, %v1485_v32  ;;  %v1847_v5 = vrot.slane %v1845_v57, 2  ;;  %v9446_v32 = vld [vmem:[%s12032_s1 + $0x3a0] sm:$0xff]   ;;  %v9448_v34 = vld [vmem:[%s12032_s1 + $0x398] sm:$0xff]  }
  0x90   : > { %8387 = vmatpush3.bf16.msra.mxu0 %v9378_v38  ;;  %v1610_v38 = vrot.slane %v10323_v62, 1  ;;  %v6787_v62 = vld [vmem:[%s10004_s28 + $0x2ac] sm:$0xe] }
  0x91   : > { %8407 = vmatpush3.bf16.msra.mxu1 %v9379_v42  ;;  %8388 = vmatprep.subr.bf16.mxu0 %v9859_v1  ;;  %v9418_v42 = vld [vmem:[%s12032_s1 + $0x2c0] sm:$0xff]  }
  0x92   : > { %8408 = vmatprep.subr.bf16.mxu1 %v9859_v1 }
  0x94   : > { %8389 = vmatpush3.bf16.msra.mxu0 %v9380_v43  ;;  %v1609_v43 = vrot.slane %v10422_v37, 1 }
  0x95   : > { %8409 = vmatpush3.bf16.msra.mxu1 %v9381_v44  ;;  %8414 = vmatprep.subr.bf16.mxu0 %v9859_v1  ;;  %v1495_v44 = vsel %vm485_vm1, %v1490_v40, %v1494_v41  ;;  %v9454_v40 = vld [vmem:[%s12032_s1 + $0x380] sm:$0xff]  }
  0x96   : > { %8434 = vmatprep.subr.bf16.mxu1 %v9859_v1  ;;  %v1611_v46 = vsel %vm743_vm2, %v1609_v43, %v1610_v38  ;;  %v9452_v38 = vld [vmem:[%s12032_s1 + $0x388] sm:$0xff]   ;;  %v9455_v41 = vld [vmem:[%s12032_s1 + $0x3c0] sm:$0xff]   ;;  %v9457_v43 = vld [vmem:[%s12032_s1 + $0x438] sm:$0xff]  }
  0x97   : > { %8391 = vmatmul.mubr.bf16.vlgmr.msra.gmra.mxu0 %v993_v47  ;;  %v9423_v47 = vld [vmem:[%s12032_s1 + $0x378] sm:$0xff]  }
  0x98   : > { %8415 = vmatpush3.bf16.msra.mxu0 %v9383_v48  ;;  %8411 = vmatmul.mubr.bf16.vlgmr.msra.gmra.mxu1 %v9384_v49  ;;  %v9424_v48 = vld [vmem:[%s12032_s1 + $0x330] sm:$0xff]  }
  0x99   : > { %8435 = vmatpush3.bf16.msra.mxu1 %v9385_v50  ;;  %8416 = vmatprep.subr.bf16.mxu0 %v9859_v1  ;;  %v9425_v49 = vld [vmem:[%s12032_s1 + $0x370] sm:$0xff]   ;;  %v9426_v50 = vld [vmem:[%s12032_s1 + $0x328] sm:$0xff]  }
  0x9a   : > { %8436 = vmatprep.subr.bf16.mxu1 %v9859_v1  ;;  %8430 = vmatprep.mubr.msk.bf16.mxu0 %vm9860_vm0, %v9859_v1 }
  0x9b   : > { %8450 = vmatprep.mubr.msk.bf16.mxu1 %vm9860_vm0, %v9859_v1 }
  0x9c   : > { %8417 = vmatpush3.bf16.msra.mxu0 %v9386_v51  ;;  %v9427_v51 = vld [vmem:[%s12032_s1 + $0x368] sm:$0xff]  }
  0x9d   : > { %8437 = vmatpush3.bf16.msra.mxu1 %v9387_v52  ;;  %8418 = vmatprep.subr.bf16.mxu0 %v9859_v1  ;;  %v9428_v52 = vld [vmem:[%s12032_s1 + $0x320] sm:$0xff]  }
  0x9e   : > { %8438 = vmatprep.subr.bf16.mxu1 %v9859_v1 }
  0xa0   : > { %8419 = vmatpush3.bf16.msra.mxu0 %v9388_v53  ;;  %v9429_v53 = vld [vmem:[%s12032_s1 + $0x360] sm:$0xff]  }
  0xa1   : > { %8439 = vmatpush3.bf16.msra.mxu1 %v9389_v54  ;;  %8420 = vmatprep.subr.bf16.mxu0 %v9859_v1  ;;  %v1842_v54 = vshrl.u32 %v10422_v37, 16  ;;  %v9451_v37 = vld [vmem:[%s12032_s1 + $0x3d0] sm:$0xff]  }
  0xa2   : > { %8440 = vmatprep.subr.bf16.mxu1 %v9859_v1 }
  0xa4   : > { %8421 = vmatpush3.bf16.msra.mxu0 %v9390_v55  ;;  %v9440_v55 = vld [vmem:[%s10004_s28 + $0x1d0] ss:$0 sps:$4 sm:$0x33]  }
  0xa5   : > { %8441 = vmatpush3.bf16.msra.mxu1 %v9391_v56  ;;  %8422 = vmatprep.subr.bf16.mxu0 %v9859_v1  ;;  %v9430_v56 = vld [vmem:[%s12032_s1 + $0x318] sm:$0xff]  }
  0xa6   : > { %8442 = vmatprep.subr.bf16.mxu1 %v9859_v1 }
  0xa8   : > { %8423 = vmatpush3.bf16.msra.mxu0 %v9392_v59  ;;  %v1844_v59 = vrot.slane %v1842_v54, 1 }
  0xa9   : > { %8443 = vmatpush3.bf16.msra.mxu1 %v9393_v60  ;;  %8424 = vmatprep.subr.bf16.mxu0 %v9859_v1  ;;  %v9432_v60 = vld [vmem:[%s12032_s1 + $0x310] sm:$0xff]  }
  0xaa   : > { %8444 = vmatprep.subr.bf16.mxu1 %v9859_v1 }
  0xac   : > { %8425 = vmatpush3.bf16.msra.mxu0 %v9394_v63  ;;  %v1850_v63 = vshrl.u32 %v9440_v55, 16 }
  0xad   : > { %8445 = vmatpush3.bf16.msra.mxu1 %v9395_v0  ;;  %8426 = vmatprep.subr.bf16.mxu0 %v9859_v1  ;;  %v1853_v0 = vshll.u32 %v9440_v55, 16  ;;  %v9462_v55 = vld [vmem:[%s12032_s1 + $0x428] sm:$0xff]  }
  0xae   : > { %8446 = vmatprep.subr.bf16.mxu1 %v9859_v1  ;;  %v1852_v6 = vrot.slane %v1850_v63, 1  ;;  %v9465_v63 = vld [vmem:[%s12032_s1 + $0x460] sm:$0xff]  }
  0xaf   : > { %v1855_v7 = vrot.slane %v1853_v0, 2  ;;  %v6894_v0 = vld [vmem:[%s10004_s28 + $0xc] sm:$0xf] }
  0xb0   : > { %8427 = vmatpush3.bf16.msra.mxu0 %v9396_v3  ;;  %v9435_v3 = vld [vmem:[%s12032_s1 + $0x348] sm:$0xff]  }
  0xb1   : > { %8447 = vmatpush3.bf16.msra.mxu1 %v9397_v4  ;;  %8428 = vmatprep.subr.bf16.mxu0 %v9859_v1  ;;  %v6804_v4 = vcombine.low %v6787_v62, %v10389_v23  ;;  %v9443_v23 = vld [vmem:[%s12032_s1 + $0x3f0] sm:$0xff]  }
  0xb2   : > { %8448 = vmatprep.subr.bf16.mxu1 %v9859_v1 }
  0xb3   : > { %v1725_v10 = vrot.slane %v6804_v4, 1  ;;  %v10631_v4 = vld [vmem:[%s10004_s28 + $0xf4] sm:$0xf] }
  0xb4   : > { %8429 = vmatpush3.bf16.msra.mxu0 %v9398_v8  ;;  %v1726_v8 = vrot.slane %v10402_v27, 1 }
  0xb5   : > { %8449 = vmatpush3.bf16.msra.mxu1 %v9399_v9  ;;  %8454 = vmatprep.subr.bf16.mxu0 %v9859_v1  ;;  %v9436_v9 = vld [vmem:[%s12032_s1 + $0x300] sm:$0xff]  }
  0xb6   : > { %8474 = vmatprep.subr.bf16.mxu1 %v9859_v1 }
  0xb7   : > { %8431 = vmatmul.mubr.bf16.vlgmr.msra.gmra.mxu0 %v9400_v12  ;;  %v1848_v12 = vor.u32 %v1847_v5, %v1844_v59  ;;  %v9463_v59 = vld [vmem:[%s12032_s1 + $0x468] sm:$0xff]   ;;  %v10635_v5 = vld [vmem:[%s10004_s28 + $0x14] ss:$0 sps:$4 sm:$0x11]  }
  0xb8   : > { %8455 = vmatpush3.bf16.msra.mxu0 %v9401_v13  ;;  %8451 = vmatmul.mubr.bf16.vlgmr.msra.gmra.mxu1 %v1363_v14  ;;  %v1856_v13 = vor.u32 %v1855_v7, %v1852_v6  ;;  %v9439_v14 = vld [vmem:[%s12032_s1 + $0x3b8] sm:$0xff]  }
  0xb9   : > { %8475 = vmatpush3.bf16.msra.mxu1 %v9404_v15  ;;  %8456 = vmatprep.subr.bf16.mxu0 %v9859_v1  ;;  %v1727_v15 = vsel %vm743_vm2, %v1725_v10, %v1726_v8  ;;  %v9466_v6 = vld [vmem:[%s12032_s1 + $0x418] sm:$0xff]   ;;  %v9468_v10 = vld [vmem:[%s12032_s1 + $0x410] sm:$0xff]  }
  0xba   : > { %8476 = vmatprep.subr.bf16.mxu1 %v9859_v1  ;;  %8470 = vmatprep.mubr.msk.bf16.mxu0 %vm9860_vm0, %v9859_v1  ;;  %v9467_v8 = vld [vmem:[%s12032_s1 + $0x458] sm:$0xff]  }
  0xbb   : > { %8490 = vmatprep.mubr.msk.bf16.mxu1 %vm9860_vm0, %v9859_v1 }
  0xbc   : > { %8457 = vmatpush3.bf16.msra.mxu0 %v9405_v16  ;;  %v9441_v16 = vld [vmem:[%s12032_s1 + $0x3f8] sm:$0xff]  }
  0xbd   : > { %8477 = vmatpush3.bf16.msra.mxu1 %v9406_v17  ;;  %8458 = vmatprep.subr.bf16.mxu0 %v9859_v1  ;;  %v1857_v17 = vsel %vm976_vm3, %v1848_v12, %v1856_v13  ;;  %v10654_v12 = vld [vmem:[%s10004_s28 + $0xf8] ss:$0 sps:$4 sm:$0x11]  }
  0xbe   : > { %8478 = vmatprep.subr.bf16.mxu1 %v9859_v1 }
  0xc0   : > { %8459 = vmatpush3.bf16.msra.mxu0 %v9407_v18 }
  0xc1   : > { %8479 = vmatpush3.bf16.msra.mxu1 %v9408_v19  ;;  %8460 = vmatprep.subr.bf16.mxu0 %v9859_v1 }
  0xc2   : > { %8480 = vmatprep.subr.bf16.mxu1 %v9859_v1 }
  0xc4   : > { %8461 = vmatpush3.bf16.msra.mxu0 %v9409_v20  ;;  %v9442_v20 = vld [vmem:[%s12032_s1 + $0x3b0] sm:$0xff]  }
  0xc5   : > { %8481 = vmatpush3.bf16.msra.mxu1 %v9410_v21  ;;  %8462 = vmatprep.subr.bf16.mxu0 %v9859_v1 }
  0xc6   : > { %8482 = vmatprep.subr.bf16.mxu1 %v9859_v1 }
  0xc8   : > { %8463 = vmatpush3.bf16.msra.mxu0 %v9411_v24 }
  0xc9   : > { %8483 = vmatpush3.bf16.msra.mxu1 %v9412_v26  ;;  %8464 = vmatprep.subr.bf16.mxu0 %v9859_v1  ;;  %v9444_v26 = vld [vmem:[%s12032_s1 + $0x3a8] sm:$0xff]  }
  0xca   : > { %8484 = vmatprep.subr.bf16.mxu1 %v9859_v1 }
  0xcc   : > { %8465 = vmatpush3.bf16.msra.mxu0 %v9413_v28 }
  0xcd   : > { %8485 = vmatpush3.bf16.msra.mxu1 %v9414_v31  ;;  %8466 = vmatprep.subr.bf16.mxu0 %v9859_v1 }
  0xce   : > { %8486 = vmatprep.subr.bf16.mxu1 %v9859_v1 }
  0xd0   : > { %8467 = vmatpush3.bf16.msra.mxu0 %v9415_v33  ;;  %v9447_v33 = vld [vmem:[%s12032_s1 + $0x3e0] sm:$0xff]  }
  0xd1   : > { %8487 = vmatpush3.bf16.msra.mxu1 %v9416_v36  ;;  %8468 = vmatprep.subr.bf16.mxu0 %v9859_v1  ;;  %v9450_v36 = vld [vmem:[%s12032_s1 + $0x390] sm:$0xff]  }
  0xd2   : > { %8488 = vmatprep.subr.bf16.mxu1 %v9859_v1 }
  0xd4   : > { %8469 = vmatpush3.bf16.msra.mxu0 %v9417_v39  ;;  %v9453_v39 = vld [vmem:[%s12032_s1 + $0x3c8] sm:$0xff]  }
  0xd5   : > { %8489 = vmatpush3.bf16.msra.mxu1 %v9418_v42  ;;  %8494 = vmatprep.subr.bf16.mxu0 %v9859_v1  ;;  %v9456_v42 = vld [vmem:[%s10004_s28 + $0xc] sm:$0xff]  }
  0xd6   : > { %8514 = vmatprep.subr.bf16.mxu1 %v9859_v1 }
  0xd7   : > { %8471 = vmatmul.mubr.bf16.vlgmr.msra.gmra.mxu0 %v1495_v44  ;;  %v9458_v44 = vld [vmem:[%s10004_s28 + $0xf0] sm:$0xff]  }
  0xd8   : > { %8495 = vmatpush3.bf16.msra.mxu0 %v9421_v45  ;;  %8491 = vmatmul.mubr.bf16.vlgmr.msra.gmra.mxu1 %v1611_v46  ;;  %v9459_v45 = vld [vmem:[%s12032_s1 + $0x478] sm:$0xff]  }
  0xd9   : > { %8515 = vmatpush3.bf16.msra.mxu1 %v9423_v47  ;;  %8496 = vmatprep.subr.bf16.mxu0 %v9859_v1  ;;  %v9460_v47 = vld [vmem:[%s12032_s1 + $0x430] sm:$0xff]  }
  0xda   : > { %8516 = vmatprep.subr.bf16.mxu1 %v9859_v1  ;;  %8510 = vmatprep.mubr.msk.bf16.mxu0 %vm9860_vm0, %v9859_v1 }
  0xdb   : > { %8530 = vmatprep.mubr.msk.bf16.mxu1 %vm9860_vm0, %v9859_v1 }
  0xdc   : > { %8497 = vmatpush3.bf16.msra.mxu0 %v9424_v48 }
  0xdd   : > { %8517 = vmatpush3.bf16.msra.mxu1 %v9425_v49  ;;  %8498 = vmatprep.subr.bf16.mxu0 %v9859_v1 }
  0xde   : > { %8518 = vmatprep.subr.bf16.mxu1 %v9859_v1 }
  0xe0   : > { %8499 = vmatpush3.bf16.msra.mxu0 %v9426_v50 }
  0xe1   : > { %8519 = vmatpush3.bf16.msra.mxu1 %v9427_v51  ;;  %8500 = vmatprep.subr.bf16.mxu0 %v9859_v1  ;;  %v9461_v51 = vld [vmem:[%s12032_s1 + $0x470] sm:$0xff]  }
  0xe2   : > { %8520 = vmatprep.subr.bf16.mxu1 %v9859_v1 }
  0xe4   : > { %8501 = vmatpush3.bf16.msra.mxu0 %v9428_v52 }
  0xe5   : > { %8521 = vmatpush3.bf16.msra.mxu1 %v9429_v53  ;;  %8502 = vmatprep.subr.bf16.mxu0 %v9859_v1 }
  0xe6   : > { %8522 = vmatprep.subr.bf16.mxu1 %v9859_v1 }
  0xe8   : > { %8503 = vmatpush3.bf16.msra.mxu0 %v9430_v56 }
  0xe9   : > { %8523 = vmatpush3.bf16.msra.mxu1 %v9431_v58  ;;  %8504 = vmatprep.subr.bf16.mxu0 %v9859_v1 }
  0xea   : > { %8524 = vmatprep.subr.bf16.mxu1 %v9859_v1 }
  0xec   : > { %8505 = vmatpush3.bf16.msra.mxu0 %v9432_v60 }
  0xed   : > { %8525 = vmatpush3.bf16.msra.mxu1 %v9433_v61  ;;  %8506 = vmatprep.subr.bf16.mxu0 %v9859_v1  ;;  %v9464_v61 = vld [vmem:[%s12032_s1 + $0x420] sm:$0xff]  }
  0xee   : > { %8526 = vmatprep.subr.bf16.mxu1 %v9859_v1 }
  0xf0   : > { %8507 = vmatpush3.bf16.msra.mxu0 %v9434_v2  ;;  %v10626_v2 = vld [vmem:[%s10004_s28 + $0x10] sm:$0xf] }
  0xf1   : > { %8527 = vmatpush3.bf16.msra.mxu1 %v9435_v3  ;;  %8508 = vmatprep.subr.bf16.mxu0 %v9859_v1  ;;  %v6923_v3 = vld [vmem:[%s10004_s28 + $0xf0] sm:$0xf]  ;;  %v6913_v7 = vcombine.low %v6894_v0, %v10626_v2  ;;  %v9493_v0 = vld [vmem:[%s12032_s1 + $0x4c0] sm:$0xff]  }
  0xf2   : > { %8528 = vmatprep.subr.bf16.mxu1 %v9859_v1 }
  0xf3   : > { %v2218_v13 = vshrl.u32 %v6913_v7, 16 }
  0xf4   : > { %8509 = vmatpush3.bf16.msra.mxu0 %v9436_v9  ;;  %v6942_v9 = vcombine.low %v6923_v3, %v10631_v4  ;;  %v2591_v3 = vrot.slane %v10654_v12, 1 }
  0xf5   : > { %8529 = vmatpush3.bf16.msra.mxu1 %v9437_v11  ;;  %8534 = vmatprep.subr.bf16.mxu0 %v9859_v1  ;;  %v9469_v11 = vld [vmem:[%s12032_s1 + $0x450] sm:$0xff]  }
  0xf6   : > { %8554 = vmatprep.subr.bf16.mxu1 %v9859_v1 }
  0xf7   : > { %v355_v18 = vpop.f32.mrf.mxu0  ;;  %8511 = vmatmul.mubr.bf16.vlgmr.msra.gmra.mxu0 %v1727_v15  ;;  %v2225_v15 = vshll.u32 %v10635_v5, 16 }
  0xf8   : > { %v450_v19 = vpop.f32.mrf.mxu1  ;;  %8535 = vmatpush3.bf16.msra.mxu0 %v9439_v14  ;;  %8531 = vmatmul.mubr.bf16.vlgmr.msra.gmra.mxu1 %v1857_v17  ;;  %v2220_v14 = vshll.u32 %v6913_v7, 16  ;;  %v9470_v17 = vld [vmem:[%s12032_s1 + $0x408] sm:$0xff]   ;;  %v9497_v7 = vld [vmem:[%s12032_s1 + $0x578] sm:$0xff]  }
  0xf9   : > { %v451_v21 = vadd.f32 %v450_v19, %v355_v18  ;;  %v8272_v22 = vpop.f32.mrf.mxu0  ;;  %8555 = vmatpush3.bf16.msra.mxu1 %v9441_v16  ;;  %8536 = vmatprep.subr.bf16.mxu0 %v9859_v1  ;;  %v2352_v16 = vshll.u32 %v6942_v9, 16  ;;  %v9471_v18 = vld [vmem:[%s12032_s1 + $0x448] sm:$0xff]  }
  0xfa   : > { %v8292_v24 = vpop.f32.mrf.mxu1  ;;  %8556 = vmatprep.subr.bf16.mxu1 %v9859_v1  ;;  %8550 = vmatprep.mubr.msk.bf16.mxu0 %vm9860_vm0, %v9859_v1  ;;  %v2222_v19 = vrot.slane %v2220_v14, 1  ;;  %v2357_v22 = vshll.u32 %v10654_v12, 16 }
  0xfb   : > { %v358_v25 = vpop.f32.mrf.mxu0  ;;  %8570 = vmatprep.mubr.msk.bf16.mxu1 %vm9860_vm0, %v9859_v1 }
  0xfc   : > { %v453_v27 = vpop.f32.mrf.mxu1  ;;  %8537 = vmatpush3.bf16.msra.mxu0 %v9442_v20  ;;  %v2350_v20 = vshrl.u32 %v6942_v9, 16  ;;  %v2223_v24 = vor.u32 %v2222_v19, %v2218_v13  ;;  %v9498_v9 = vld [vmem:[%s12032_s1 + $0x530] sm:$0xff]  }
  0xfd   : > { %v10536_v28 = vadd.f32 %v453_v27, %v358_v25  ;;  %v8273_v29 = vpop.f32.mrf.mxu0  ;;  %8557 = vmatpush3.bf16.msra.mxu1 %v9443_v23  ;;  %8538 = vmatprep.subr.bf16.mxu0 %v9859_v1  ;;  %v9472_v23 = vld [vmem:[%s12032_s1 + $0x400] sm:$0xff]   ;;  %v2227_v25 = vrot.slane %v2225_v15, 1  ;;  %v9499_v13 = vld [vmem:[%s12032_s1 + $0x570] sm:$0xff]  }
  0xfe   : > { %8558 = vmatprep.subr.bf16.mxu1 %v9859_v1  ;;  %v8293_v31 = vpop.f32.mrf.mxu1 }
  0xff   : > { %v2228_v29 = vsel %vm485_vm1, %v2223_v24, %v2227_v25  ;;  %v9502_v24 = vld [vmem:[%s12032_s1 + $0x520] sm:$0xff]  }
 0x100   : > { %8539 = vmatpush3.bf16.msra.mxu0 %v9444_v26  ;;  %v9473_v26 = vld [vmem:[%s12032_s1 + $0x440] sm:$0xff]  }
 0x101   : > { %8559 = vmatpush3.bf16.msra.mxu1 %v9445_v30  ;;  %8540 = vmatprep.subr.bf16.mxu0 %v9859_v1  ;;  %v9476_v30 = vld [vmem:[%s12032_s1 + $0x4b8] sm:$0xff]   ;;  %v9503_v25 = vld [vmem:[%s12032_s1 + $0x560] sm:$0xff]  }
 0x102   : > { %8560 = vmatprep.subr.bf16.mxu1 %v9859_v1 }
 0x104   : > { %8541 = vmatpush3.bf16.msra.mxu0 %v9446_v32  ;;  %v9479_v32 = vld [vmem:[%s12032_s1 + $0x4f8] sm:$0xff]  }
 0x105   : > { %8561 = vmatpush3.bf16.msra.mxu1 %v9447_v33  ;;  %8542 = vmatprep.subr.bf16.mxu0 %v9859_v1 }
 0x106   : > { %8562 = vmatprep.subr.bf16.mxu1 %v9859_v1 }
 0x108   : > { %8543 = vmatpush3.bf16.msra.mxu0 %v9448_v34  ;;  %v9480_v34 = vld [vmem:[%s12032_s1 + $0x4b0] sm:$0xff]  }
 0x109   : > { %8563 = vmatpush3.bf16.msra.mxu1 %v9449_v35  ;;  %8544 = vmatprep.subr.bf16.mxu0 %v9859_v1 }
 0x10a   : > { %8564 = vmatprep.subr.bf16.mxu1 %v9859_v1 }
 0x10c   : > { %8545 = vmatpush3.bf16.msra.mxu0 %v9450_v36 }
 0x10d   : > { %8565 = vmatpush3.bf16.msra.mxu1 %v9451_v37  ;;  %8546 = vmatprep.subr.bf16.mxu0 %v9859_v1 }
 0x10e   : > { %8566 = vmatprep.subr.bf16.mxu1 %v9859_v1 }
 0x110   : > { %8547 = vmatpush3.bf16.msra.mxu0 %v9452_v38  ;;  %v9481_v38 = vld [vmem:[%s12032_s1 + $0x4f0] sm:$0xff]  }
 0x111   : > { %8567 = vmatpush3.bf16.msra.mxu1 %v9453_v39  ;;  %8548 = vmatprep.subr.bf16.mxu0 %v9859_v1 }
 0x112   : > { %8568 = vmatprep.subr.bf16.mxu1 %v9859_v1 }
 0x114   : > { %8549 = vmatpush3.bf16.msra.mxu0 %v9454_v40 }
 0x115   : > { %8569 = vmatpush3.bf16.msra.mxu1 %v9455_v41  ;;  %8574 = vmatprep.subr.bf16.mxu0 %v9859_v1 }
 0x116   : > { %8594 = vmatprep.subr.bf16.mxu1 %v9859_v1 }
 0x117   : > { %v581_v46 = vpop.f32.mrf.mxu0  ;;  %8551 = vmatmul.mubr.bf16.vlgmr.msra.gmra.mxu0 %v9456_v42  ;;  %v9482_v42 = vld [vmem:[%s12032_s1 + $0x4a8] sm:$0xff]  }
 0x118   : > { %v588_v48 = vadd.f32 %v581_v46, %v451_v21  ;;  %8575 = vmatpush3.bf16.msra.mxu0 %v9457_v43  ;;  %v713_v49 = vpop.f32.mrf.mxu1  ;;  %8571 = vmatmul.mubr.bf16.vlgmr.msra.gmra.mxu1 %v9458_v44  ;;  %v2354_v21 = vrot.slane %v2352_v16, 1  ;;  %v9483_v46 = vld [vmem:[%s12032_s1 + $0x4e8] sm:$0xff]  }
 0x119   : > { %v8312_v50 = vpop.f32.mrf.mxu0  ;;  %8595 = vmatpush3.bf16.msra.mxu1 %v9459_v45  ;;  %8576 = vmatprep.subr.bf16.mxu0 %v9859_v1 }
 0x11a   : > { %v10600_v52 = vadd.f32 %v713_v49, %v588_v48  ;;  %v8332_v53 = vpop.f32.mrf.mxu1  ;;  %8596 = vmatprep.subr.bf16.mxu1 %v9859_v1  ;;  %8590 = vmatprep.mubr.msk.bf16.mxu0 %vm9860_vm0, %v9859_v1  ;;  %v2355_v27 = vor.u32 %v2354_v21, %v2350_v20  ;;  %v9484_v49 = vld [vmem:[%s12032_s1 + $0x4a0] sm:$0xff]   ;;  %v9501_v21 = vld [vmem:[%s12032_s1 + $0x568] sm:$0xff]  }
 0x11b   : > { %v584_v54 = vpop.f32.mrf.mxu0  ;;  %8610 = vmatprep.mubr.msk.bf16.mxu1 %vm9860_vm0, %v9859_v1  ;;  %v9485_v50 = vld [vmem:[%s12032_s1 + $0x4e0] sm:$0xff]   ;;  %v9488_v53 = vld [vmem:[%s12032_s1 + $0x490] sm:$0xff]  }
 0x11c   : > { %v589_v56 = vadd.f32 %v584_v54, %v10536_v28  ;;  %8577 = vmatpush3.bf16.msra.mxu0 %v9460_v47  ;;  %v716_v57 = vpop.f32.mrf.mxu1  ;;  %v2359_v28 = vrot.slane %v2357_v22, 1  ;;  %v9489_v54 = vld [vmem:[%s12032_s1 + $0x4d0] sm:$0xff]  }
 0x11d   : > { %v8313_v58 = vpop.f32.mrf.mxu0  ;;  %8597 = vmatpush3.bf16.msra.mxu1 %v9461_v51  ;;  %8578 = vmatprep.subr.bf16.mxu0 %v9859_v1  ;;  %v9486_v51 = vld [vmem:[%s12032_s1 + $0x498] sm:$0xff]  }
 0x11e   : > { %v10615_v60 = vadd.f32 %v716_v57, %v589_v56  ;;  %8598 = vmatprep.subr.bf16.mxu1 %v9859_v1  ;;  %v8333_v62 = vpop.f32.mrf.mxu1  ;;  %v2360_v31 = vsel %vm485_vm1, %v2355_v27, %v2359_v28  ;;  %v6978_v56 = vld [vmem:[%s10004_s28 + $0xf0] sm:$0xe]  ;;  %v9490_v57 = vld [vmem:[%s12032_s1 + $0x488] sm:$0xff]   ;;  %v9512_v27 = vld [vmem:[%s10004_s28 + $0x14] ss:$0 sps:$4 sm:$0x33]  }
 0x11f   : > { %v9505_v28 = vld [vmem:[%s12032_s1 + $0x558] sm:$0xff]  }
 0x120   : > { %8579 = vmatpush3.bf16.msra.mxu0 %v9462_v55  ;;  %v6952_v55 = vld [vmem:[%s10004_s28 + $0xc] sm:$0xe] }
 0x121   : > { %8599 = vmatpush3.bf16.msra.mxu1 %v9463_v59  ;;  %8580 = vmatprep.subr.bf16.mxu0 %v9859_v1  ;;  %v10742_v58 = vcombine.low %v6952_v55, %v10626_v2  ;;  %v9491_v59 = vld [vmem:[%s12032_s1 + $0x4c8] sm:$0xff]  }
 0x122   : > { %8600 = vmatprep.subr.bf16.mxu1 %v9859_v1 }
 0x123   : > { %v2474_v62 = vrot.slane %v10742_v58, 1 }
 0x124   : > { %8581 = vmatpush3.bf16.msra.mxu0 %v9464_v61  ;;  %v9492_v61 = vld [vmem:[%s12032_s1 + $0x480] sm:$0xff]  }
 0x125   : > { %8601 = vmatpush3.bf16.msra.mxu1 %v9465_v63  ;;  %8582 = vmatprep.subr.bf16.mxu0 %v9859_v1  ;;  %v2475_v63 = vrot.slane %v10635_v5, 1 }
 0x126   : > { %8602 = vmatprep.subr.bf16.mxu1 %v9859_v1 }
 0x128   : > { %8583 = vmatpush3.bf16.msra.mxu0 %v9466_v6  ;;  %v9495_v6 = vld [vmem:[%s12032_s1 + $0x538] sm:$0xff]  }
 0x129   : > { %8603 = vmatpush3.bf16.msra.mxu1 %v9467_v8  ;;  %8584 = vmatprep.subr.bf16.mxu0 %v9859_v1 }
 0x12a   : > { %8604 = vmatprep.subr.bf16.mxu1 %v9859_v1 }
 0x12c   : > { %8585 = vmatpush3.bf16.msra.mxu0 %v9468_v10 }
 0x12d   : > { %8605 = vmatpush3.bf16.msra.mxu1 %v9469_v11  ;;  %8586 = vmatprep.subr.bf16.mxu0 %v9859_v1 }
 0x12e   : > { %8606 = vmatprep.subr.bf16.mxu1 %v9859_v1 }
 0x130   : > { %8587 = vmatpush3.bf16.msra.mxu0 %v9470_v17  ;;  %v9500_v17 = vld [vmem:[%s12032_s1 + $0x528] sm:$0xff]  }
 0x131   : > { %8607 = vmatpush3.bf16.msra.mxu1 %v9471_v18  ;;  %8588 = vmatprep.subr.bf16.mxu0 %v9859_v1 }
 0x132   : > { %8608 = vmatprep.subr.bf16.mxu1 %v9859_v1 }
 0x134   : > { %8589 = vmatpush3.bf16.msra.mxu0 %v9472_v23 }
 0x135   : > { %8609 = vmatpush3.bf16.msra.mxu1 %v9473_v26  ;;  %8614 = vmatprep.subr.bf16.mxu0 %v9859_v1  ;;  %v9504_v26 = vld [vmem:[%s12032_s1 + $0x518] sm:$0xff]  }
 0x136   : > { %8634 = vmatprep.subr.bf16.mxu1 %v9859_v1 }
 0x137   : > { %v830_v33 = vpop.f32.mrf.mxu0  ;;  %8591 = vmatmul.mubr.bf16.vlgmr.msra.gmra.mxu0 %v2228_v29  ;;  %v2707_v29 = vshrl.u32 %v10742_v58, 16 }
 0x138   : > { %v837_v35 = vadd.f32 %v830_v33, %v10600_v52  ;;  %8615 = vmatpush3.bf16.msra.mxu0 %v9476_v30  ;;  %v946_v36 = vpop.f32.mrf.mxu1  ;;  %8611 = vmatmul.mubr.bf16.vlgmr.msra.gmra.mxu1 %v2360_v31  ;;  %v9487_v52 = vld [vmem:[%s12032_s1 + $0x4d8] sm:$0xff]   ;;  %v2710_v30 = vshll.u32 %v10742_v58, 16  ;;  %v9506_v31 = vld [vmem:[%s12032_s1 + $0x510] sm:$0xff]   ;;  %v2715_v33 = vshrl.u32 %v9512_v27, 16  ;;  %v9518_v58 = vld [vmem:[%s12032_s1 + $0x5a8] sm:$0xff]  }
 0x139   : > { %v8352_v37 = vpop.f32.mrf.mxu0  ;;  %8635 = vmatpush3.bf16.msra.mxu1 %v9479_v32  ;;  %8616 = vmatprep.subr.bf16.mxu0 %v9859_v1  ;;  %v9507_v32 = vld [vmem:[%s12032_s1 + $0x550] sm:$0xff]  }
 0x13a   : > { %v10694_v39 = vadd.f32 %v946_v36, %v837_v35  ;;  %v8372_v40 = vpop.f32.mrf.mxu1  ;;  %8636 = vmatprep.subr.bf16.mxu1 %v9859_v1  ;;  %8630 = vmatprep.mubr.msk.bf16.mxu0 %vm9860_vm0, %v9859_v1  ;;  %v2709_v35 = vrot.slane %v2707_v29, 1  ;;  %v2712_v36 = vrot.slane %v2710_v30, 2  ;;  %v9508_v37 = vld [vmem:[%s12032_s1 + $0x508] sm:$0xff]  }
 0x13b   : > { %v833_v41 = vpop.f32.mrf.mxu0  ;;  %8650 = vmatprep.mubr.msk.bf16.mxu1 %vm9860_vm0, %v9859_v1  ;;  %v9509_v40 = vld [vmem:[%s12032_s1 + $0x548] sm:$0xff]  }
 0x13c   : > { %v838_v43 = vadd.f32 %v833_v41, %v10615_v60  ;;  %8617 = vmatpush3.bf16.msra.mxu0 %v9480_v34  ;;  %v949_v44 = vpop.f32.mrf.mxu1  ;;  %v6995_v60 = vcombine.low %v6978_v56, %v10631_v4  ;;  %v2476_v4 = vsel %vm743_vm2, %v2474_v62, %v2475_v63  ;;  %v2718_v34 = vshll.u32 %v9512_v27, 16  ;;  %v9510_v41 = vld [vmem:[%s12032_s1 + $0x500] sm:$0xff]   ;;  %v9519_v62 = vld [vmem:[%s12032_s1 + $0x5e8] sm:$0xff]   ;;  %v9535_v27 = vld [vmem:[%s12032_s1 + $0x630] sm:$0xff]  }
 0x13d   : > { %v8353_v45 = vpop.f32.mrf.mxu0  ;;  %8637 = vmatpush3.bf16.msra.mxu1 %v9481_v38  ;;  %8618 = vmatprep.subr.bf16.mxu0 %v9859_v1  ;;  %v2717_v38 = vrot.slane %v2715_v33, 1 }
 0x13e   : > { %v10709_v47 = vadd.f32 %v949_v44, %v838_v43  ;;  %8638 = vmatprep.subr.bf16.mxu1 %v9859_v1  ;;  %v8373_v48 = vpop.f32.mrf.mxu1  ;;  %v2590_v2 = vrot.slane %v6995_v60, 1  ;;  %v9511_v44 = vld [vmem:[%s12032_s1 + $0x540] sm:$0xff]   ;;  %v9513_v45 = vld [vmem:[%s12032_s1 + $0x5b8] sm:$0xff]  }
 0x13f   : > { %v9515_v48 = vld [vmem:[%s12032_s1 + $0x5f8] sm:$0xff]  }
 0x140   : > { %8619 = vmatpush3.bf16.msra.mxu0 %v9482_v42  ;;  %v2592_v5 = vsel %vm743_vm2, %v2590_v2, %v2591_v3  ;;  %v2713_v42 = vor.u32 %v2712_v36, %v2709_v35  ;;  %v9521_v3 = vld [vmem:[%s12032_s1 + $0x5e0] sm:$0xff]   ;;  %v9537_v35 = vld [vmem:[%s12032_s1 + $0x628] sm:$0xff]  }
 0x141   : > { %8639 = vmatpush3.bf16.msra.mxu1 %v9483_v46  ;;  %8620 = vmatprep.subr.bf16.mxu0 %v9859_v1  ;;  %v9514_v46 = vld [vmem:[%s10004_s28 + $0x1d4] sm:$0xff]  }
 0x142   : > { %8640 = vmatprep.subr.bf16.mxu1 %v9859_v1 }
 0x144   : > { %8621 = vmatpush3.bf16.msra.mxu0 %v9484_v49 }
 0x145   : > { %8641 = vmatpush3.bf16.msra.mxu1 %v9485_v50  ;;  %8622 = vmatprep.subr.bf16.mxu0 %v9859_v1 }
 0x146   : > { %8642 = vmatprep.subr.bf16.mxu1 %v9859_v1 }
 0x148   : > { %8623 = vmatpush3.bf16.msra.mxu0 %v9486_v51 }
 0x149   : > { %8643 = vmatpush3.bf16.msra.mxu1 %v9487_v52  ;;  %8624 = vmatprep.subr.bf16.mxu0 %v9859_v1  ;;  %v9516_v52 = vld [vmem:[%s12032_s1 + $0x5b0] sm:$0xff]  }
 0x14a   : > { %8644 = vmatprep.subr.bf16.mxu1 %v9859_v1 }
 0x14c   : > { %8625 = vmatpush3.bf16.msra.mxu0 %v9488_v53 }
 0x14d   : > { %8645 = vmatpush3.bf16.msra.mxu1 %v9489_v54  ;;  %8626 = vmatprep.subr.bf16.mxu0 %v9859_v1  ;;  %v9517_v54 = vld [vmem:[%s12032_s1 + $0x5f0] sm:$0xff]  }
 0x14e   : > { %8646 = vmatprep.subr.bf16.mxu1 %v9859_v1 }
 0x150   : > { %8627 = vmatpush3.bf16.msra.mxu0 %v9490_v57 }
 0x151   : > { %8647 = vmatpush3.bf16.msra.mxu1 %v9491_v59  ;;  %8628 = vmatprep.subr.bf16.mxu0 %v9859_v1 }
 0x152   : > { %8648 = vmatprep.subr.bf16.mxu1 %v9859_v1 }
 0x154   : > { %8629 = vmatpush3.bf16.msra.mxu0 %v9492_v61 }
 0x155   : > { %8649 = vmatpush3.bf16.msra.mxu1 %v9493_v0  ;;  %8654 = vmatprep.subr.bf16.mxu0 %v9859_v1  ;;  %v9520_v0 = vld [vmem:[%s12032_s1 + $0x5a0] sm:$0xff]  }
 0x156   : > { %8674 = vmatprep.subr.bf16.mxu1 %v9859_v1 }
 0x157   : > { %v1077_v8 = vpop.f32.mrf.mxu0  ;;  %8631 = vmatmul.mubr.bf16.vlgmr.msra.gmra.mxu0 %v2476_v4  ;;  %v7086_v4 = vld [vmem:[%s10004_s28 + $0x1d4] sm:$0xf] }
 0x158   : > { %v1084_v10 = vadd.f32 %v1077_v8, %v10694_v39  ;;  %8655 = vmatpush3.bf16.msra.mxu0 %v9495_v6  ;;  %v1196_v11 = vpop.f32.mrf.mxu1  ;;  %8651 = vmatmul.mubr.bf16.vlgmr.msra.gmra.mxu1 %v2592_v5  ;;  %v2720_v39 = vrot.slane %v2718_v34, 2  ;;  %v10885_v6 = vld [vmem:[%s10004_s28 + $0x1d8] sm:$0xf] }
 0x159   : > { %v8392_v12 = vpop.f32.mrf.mxu0  ;;  %8675 = vmatpush3.bf16.msra.mxu1 %v9497_v7  ;;  %8656 = vmatprep.subr.bf16.mxu0 %v9859_v1  ;;  %v9522_v5 = vld [vmem:[%s12032_s1 + $0x598] sm:$0xff]   ;;  %v7105_v8 = vcombine.low %v7086_v4, %v10885_v6 }
 0x15a   : > { %v10779_v14 = vadd.f32 %v1196_v11, %v1084_v10  ;;  %v8412_v15 = vpop.f32.mrf.mxu1  ;;  %8676 = vmatprep.subr.bf16.mxu1 %v9859_v1  ;;  %8670 = vmatprep.mubr.msk.bf16.mxu0 %vm9860_vm0, %v9859_v1  ;;  %v2721_v43 = vor.u32 %v2720_v39, %v2717_v38  ;;  %v9523_v7 = vld [vmem:[%s12032_s1 + $0x5d8] sm:$0xff]   ;;  %v9524_v10 = vld [vmem:[%s12032_s1 + $0x590] sm:$0xff]   ;;  %v9538_v39 = vld [vmem:[%s12032_s1 + $0x668] sm:$0xff]  }
 0x15b   : > { %v1080_v16 = vpop.f32.mrf.mxu0  ;;  %8690 = vmatprep.mubr.msk.bf16.mxu1 %vm9860_vm0, %v9859_v1  ;;  %v9525_v11 = vld [vmem:[%s12032_s1 + $0x5d0] sm:$0xff]   ;;  %v3084_v12 = vshll.u32 %v7105_v8, 16  ;;  %v3082_v15 = vshrl.u32 %v7105_v8, 16  ;;  %v9551_v4 = vld [vmem:[%s12032_s1 + $0x6b8] sm:$0xff]  }
 0x15c   : > { %v1085_v18 = vadd.f32 %v1080_v16, %v10709_v47  ;;  %8657 = vmatpush3.bf16.msra.mxu0 %v9498_v9  ;;  %v1199_v19 = vpop.f32.mrf.mxu1  ;;  %v2722_v47 = vsel %vm976_vm3, %v2713_v42, %v2721_v43  ;;  %v10898_v9 = vld [vmem:[%s10004_s28 + $0x1dc] ss:$0 sps:$4 sm:$0x11]   ;;  %v9540_v43 = vld [vmem:[%s12032_s1 + $0x660] sm:$0xff]  }
 0x15d   : > { %v8393_v20 = vpop.f32.mrf.mxu0  ;;  %8677 = vmatpush3.bf16.msra.mxu1 %v9499_v13  ;;  %8658 = vmatprep.subr.bf16.mxu0 %v9859_v1  ;;  %v9526_v13 = vld [vmem:[%s12032_s1 + $0x588] sm:$0xff]   ;;  %v3086_v16 = vrot.slane %v3084_v12, 1  ;;  %v9555_v12 = vld [vmem:[%s12032_s1 + $0x6f0] sm:$0xff]  }
 0x15e   : > { %v10794_v22 = vadd.f32 %v1199_v19, %v1085_v18  ;;  %8678 = vmatprep.subr.bf16.mxu1 %v9859_v1  ;;  %v8413_v23 = vpop.f32.mrf.mxu1  ;;  %v9528_v18 = vld [vmem:[%s12032_s1 + $0x580] sm:$0xff]  }
 0x15f   : > { %v9529_v19 = vld [vmem:[%s12032_s1 + $0x5c0] sm:$0xff]   ;;  %v3087_v20 = vor.u32 %v3086_v16, %v3082_v15  ;;  %v9531_v23 = vld [vmem:[%s12032_s1 + $0x638] sm:$0xff]  }
 0x160   : > { %8659 = vmatpush3.bf16.msra.mxu0 %v9500_v17  ;;  %v3089_v17 = vshll.u32 %v10898_v9, 16 }
 0x161   : > { %8679 = vmatpush3.bf16.msra.mxu1 %v9501_v21  ;;  %8660 = vmatprep.subr.bf16.mxu0 %v9859_v1 }
 0x162   : > { %8680 = vmatprep.subr.bf16.mxu1 %v9859_v1  ;;  %v3091_v21 = vrot.slane %v3089_v17, 1 }
 0x164   : > { %8661 = vmatpush3.bf16.msra.mxu0 %v9502_v24  ;;  %v3092_v24 = vsel %vm485_vm1, %v3087_v20, %v3091_v21  ;;  %v9557_v20 = vld [vmem:[%s12032_s1 + $0x6e8] sm:$0xff]  }
 0x165   : > { %8681 = vmatpush3.bf16.msra.mxu1 %v9503_v25  ;;  %8662 = vmatprep.subr.bf16.mxu0 %v9859_v1  ;;  %v9534_v25 = vld [vmem:[%s12032_s1 + $0x678] sm:$0xff]  }
 0x166   : > { %8682 = vmatprep.subr.bf16.mxu1 %v9859_v1 }
 0x168   : > { %8663 = vmatpush3.bf16.msra.mxu0 %v9504_v26 }
 0x169   : > { %8683 = vmatpush3.bf16.msra.mxu1 %v9505_v28  ;;  %8664 = vmatprep.subr.bf16.mxu0 %v9859_v1 }
 0x16a   : > { %8684 = vmatprep.subr.bf16.mxu1 %v9859_v1 }
 0x16c   : > { %8665 = vmatpush3.bf16.msra.mxu0 %v9506_v31  ;;  %v9536_v31 = vld [vmem:[%s12032_s1 + $0x670] sm:$0xff]  }
 0x16d   : > { %8685 = vmatpush3.bf16.msra.mxu1 %v9507_v32  ;;  %8666 = vmatprep.subr.bf16.mxu0 %v9859_v1 }
 0x16e   : > { %8686 = vmatprep.subr.bf16.mxu1 %v9859_v1 }
 0x170   : > { %8667 = vmatpush3.bf16.msra.mxu0 %v9508_v37 }
 0x171   : > { %8687 = vmatpush3.bf16.msra.mxu1 %v9509_v40  ;;  %8668 = vmatprep.subr.bf16.mxu0 %v9859_v1 }
 0x172   : > { %8688 = vmatprep.subr.bf16.mxu1 %v9859_v1 }
 0x174   : > { %8669 = vmatpush3.bf16.msra.mxu0 %v9510_v41  ;;  %v9539_v41 = vld [vmem:[%s12032_s1 + $0x620] sm:$0xff]  }
 0x175   : > { %8689 = vmatpush3.bf16.msra.mxu1 %v9511_v44  ;;  %8694 = vmatprep.subr.bf16.mxu0 %v9859_v1  ;;  %v7115_v44 = vld [vmem:[%s10004_s28 + $0x2b8] sm:$0xf] }
 0x176   : > { %8714 = vmatprep.subr.bf16.mxu1 %v9859_v1 }
 0x177   : > { %v1315_v49 = vpop.f32.mrf.mxu0  ;;  %8671 = vmatmul.mubr.bf16.vlgmr.msra.gmra.mxu0 %v2722_v47 }
 0x178   : > { %v1322_v50 = vadd.f32 %v1315_v49, %v10779_v14  ;;  %8695 = vmatpush3.bf16.msra.mxu0 %v9513_v45  ;;  %v1447_v51 = vpop.f32.mrf.mxu1  ;;  %8691 = vmatmul.mubr.bf16.vlgmr.msra.gmra.mxu1 %v9514_v46  ;;  %v9527_v14 = vld [vmem:[%s12032_s1 + $0x5c8] sm:$0xff]   ;;  %v10970_v45 = vld [vmem:[%s10004_s28 + $0x2bc] sm:$0xf]  ;;  %v9543_v49 = vld [vmem:[%s12032_s1 + $0x610] sm:$0xff]  }
 0x179   : > { %v8432_v53 = vpop.f32.mrf.mxu0  ;;  %8715 = vmatpush3.bf16.msra.mxu1 %v9515_v48  ;;  %8696 = vmatprep.subr.bf16.mxu0 %v9859_v1  ;;  %v9541_v46 = vld [vmem:[%s12032_s1 + $0x618] sm:$0xff]   ;;  %v7134_v47 = vcombine.low %v7115_v44, %v10970_v45 }
 0x17a   : > { %v10858_v55 = vadd.f32 %v1447_v51, %v1322_v50  ;;  %v8452_v56 = vpop.f32.mrf.mxu1  ;;  %8716 = vmatprep.subr.bf16.mxu1 %v9859_v1  ;;  %8710 = vmatprep.mubr.msk.bf16.mxu0 %vm9860_vm0, %v9859_v1  ;;  %v9542_v48 = vld [vmem:[%s12032_s1 + $0x658] sm:$0xff]   ;;  %v10986_v50 = vld [vmem:[%s10004_s28 + $0x2c0] ss:$0 sps:$4 sm:$0x11]   ;;  %v7144_v53 = vld [vmem:[%s10004_s28 + $0x1d4] sm:$0xe] }
 0x17b   : > { %v1318_v57 = vpop.f32.mrf.mxu0  ;;  %8730 = vmatprep.mubr.msk.bf16.mxu1 %vm9860_vm0, %v9859_v1  ;;  %v3216_v51 = vshll.u32 %v7134_v47, 16  ;;  %v3455_v44 = vrot.slane %v10986_v50, 1 }
 0x17c   : > { %v1323_v59 = vadd.f32 %v1318_v57, %v10794_v22  ;;  %8697 = vmatpush3.bf16.msra.mxu0 %v9516_v52  ;;  %v1450_v60 = vpop.f32.mrf.mxu1  ;;  %v9530_v22 = vld [vmem:[%s10004_s28 + $0x2b8] sm:$0xff]   ;;  %v9544_v52 = vld [vmem:[%s12032_s1 + $0x650] sm:$0xff]   ;;  %v3221_v57 = vshll.u32 %v10986_v50, 16 }
 0x17d   : > { %v8433_v61 = vpop.f32.mrf.mxu0  ;;  %8717 = vmatpush3.bf16.msra.mxu1 %v9517_v54  ;;  %8698 = vmatprep.subr.bf16.mxu0 %v9859_v1  ;;  %v9545_v54 = vld [vmem:[%s12032_s1 + $0x608] sm:$0xff]   ;;  %v3218_v56 = vrot.slane %v3216_v51, 1  ;;  %v9571_v51 = vld [vmem:[%s12032_s1 + $0x778] sm:$0xff]  }
 0x17e   : > { %v10873_v63 = vadd.f32 %v1450_v60, %v1323_v59  ;;  %8718 = vmatprep.subr.bf16.mxu1 %v9859_v1  ;;  %v8453_v2 = vpop.f32.mrf.mxu1  ;;  %v11003_v59 = vcombine.low %v7144_v53, %v10885_v6  ;;  %v9547_v60 = vld [vmem:[%s12032_s1 + $0x600] sm:$0xff]  }
 0x17f   : > { %v3339_v2 = vrot.slane %v10898_v9, 1 }
 0x180   : > { %8699 = vmatpush3.bf16.msra.mxu0 %v9518_v58  ;;  %v9546_v58 = vld [vmem:[%s12032_s1 + $0x648] sm:$0xff]  }
 0x181   : > { %8719 = vmatpush3.bf16.msra.mxu1 %v9519_v62  ;;  %8700 = vmatprep.subr.bf16.mxu0 %v9859_v1  ;;  %v3223_v62 = vrot.slane %v3221_v57, 1  ;;  %v9573_v57 = vld [vmem:[%s12032_s1 + $0x770] sm:$0xff]  }
 0x182   : > { %8720 = vmatprep.subr.bf16.mxu1 %v9859_v1 }
 0x184   : > { %8701 = vmatpush3.bf16.msra.mxu0 %v9520_v0  ;;  %v3338_v0 = vrot.slane %v11003_v59, 1 }
 0x185   : > { %8721 = vmatpush3.bf16.msra.mxu1 %v9521_v3  ;;  %8702 = vmatprep.subr.bf16.mxu0 %v9859_v1 }
 0x186   : > { %8722 = vmatprep.subr.bf16.mxu1 %v9859_v1  ;;  %v3340_v6 = vsel %vm743_vm2, %v3338_v0, %v3339_v2  ;;  %v9575_v2 = vld [vmem:[%s12032_s1 + $0x768] sm:$0xff]  }
 0x188   : > { %8703 = vmatpush3.bf16.msra.mxu0 %v9522_v5  ;;  %v9553_v5 = vld [vmem:[%s12032_s1 + $0x6f8] sm:$0xff]  }
 0x189   : > { %8723 = vmatpush3.bf16.msra.mxu1 %v9523_v7  ;;  %8704 = vmatprep.subr.bf16.mxu0 %v9859_v1 }
 0x18a   : > { %8724 = vmatprep.subr.bf16.mxu1 %v9859_v1 }
 0x18c   : > { %8705 = vmatpush3.bf16.msra.mxu0 %v9524_v10  ;;  %v9554_v10 = vld [vmem:[%s12032_s1 + $0x6b0] sm:$0xff]  }
 0x18d   : > { %8725 = vmatpush3.bf16.msra.mxu1 %v9525_v11  ;;  %8706 = vmatprep.subr.bf16.mxu0 %v9859_v1 }
 0x18e   : > { %8726 = vmatprep.subr.bf16.mxu1 %v9859_v1 }
 0x190   : > { %8707 = vmatpush3.bf16.msra.mxu0 %v9526_v13 }
 0x191   : > { %8727 = vmatpush3.bf16.msra.mxu1 %v9527_v14  ;;  %8708 = vmatprep.subr.bf16.mxu0 %v9859_v1 }
 0x192   : > { %8728 = vmatprep.subr.bf16.mxu1 %v9859_v1 }
 0x194   : > { %8709 = vmatpush3.bf16.msra.mxu0 %v9528_v18  ;;  %v9556_v18 = vld [vmem:[%s12032_s1 + $0x6a8] sm:$0xff]  }
 0x195   : > { %8729 = vmatpush3.bf16.msra.mxu1 %v9529_v19  ;;  %8734 = vmatprep.subr.bf16.mxu0 %v9859_v1 }
 0x196   : > { %8754 = vmatprep.subr.bf16.mxu1 %v9859_v1 }
 0x197   : > { %v1579_v26 = vpop.f32.mrf.mxu0  ;;  %8711 = vmatmul.mubr.bf16.vlgmr.msra.gmra.mxu0 %v9530_v22 }
 0x198   : > { %v1586_v28 = vadd.f32 %v1579_v26, %v10858_v55  ;;  %8735 = vmatpush3.bf16.msra.mxu0 %v9531_v23  ;;  %v1695_v29 = vpop.f32.mrf.mxu1  ;;  %8731 = vmatmul.mubr.bf16.vlgmr.msra.gmra.mxu1 %v3092_v24  ;;  %v3214_v55 = vshrl.u32 %v7134_v47, 16  ;;  %v9558_v23 = vld [vmem:[%s12032_s1 + $0x6a0] sm:$0xff]   ;;  %v9561_v26 = vld [vmem:[%s12032_s1 + $0x6d8] sm:$0xff]  }
 0x199   : > { %v8472_v30 = vpop.f32.mrf.mxu0  ;;  %8755 = vmatpush3.bf16.msra.mxu1 %v9534_v25  ;;  %8736 = vmatprep.subr.bf16.mxu0 %v9859_v1  ;;  %v9559_v24 = vld [vmem:[%s12032_s1 + $0x6e0] sm:$0xff]   ;;  %v9560_v25 = vld [vmem:[%s12032_s1 + $0x698] sm:$0xff]  }
 0x19a   : > { %v10943_v32 = vadd.f32 %v1695_v29, %v1586_v28  ;;  %v8492_v33 = vpop.f32.mrf.mxu1  ;;  %8756 = vmatprep.subr.bf16.mxu1 %v9859_v1  ;;  %8750 = vmatprep.mubr.msk.bf16.mxu0 %vm9860_vm0, %v9859_v1  ;;  %v3219_v61 = vor.u32 %v3218_v56, %v3214_v55  ;;  %v9562_v28 = vld [vmem:[%s12032_s1 + $0x690] sm:$0xff]   ;;  %v7170_v30 = vld [vmem:[%s10004_s28 + $0x2b8] sm:$0xe] }
 0x19b   : > { %v1582_v34 = vpop.f32.mrf.mxu0  ;;  %8770 = vmatprep.mubr.msk.bf16.mxu1 %vm9860_vm0, %v9859_v1  ;;  %v9563_v29 = vld [vmem:[%s12032_s1 + $0x6d0] sm:$0xff]  }
 0x19c   : > { %v1587_v36 = vadd.f32 %v1582_v34, %v10873_v63  ;;  %8737 = vmatpush3.bf16.msra.mxu0 %v9535_v27  ;;  %v1698_v37 = vpop.f32.mrf.mxu1  ;;  %v9548_v63 = vld [vmem:[%s12032_s1 + $0x640] sm:$0xff]   ;;  %v3224_v3 = vsel %vm485_vm1, %v3219_v61, %v3223_v62  ;;  %v9570_v27 = vld [vmem:[%s10004_s28 + $0x1dc] ss:$0 sps:$4 sm:$0x33]   ;;  %v9572_v55 = vld [vmem:[%s12032_s1 + $0x730] sm:$0xff]  }
 0x19d   : > { %v8473_v38 = vpop.f32.mrf.mxu0  ;;  %8757 = vmatpush3.bf16.msra.mxu1 %v9536_v31  ;;  %8738 = vmatprep.subr.bf16.mxu0 %v9859_v1  ;;  %v3571_v31 = vshrl.u32 %v11003_v59, 16  ;;  %v3579_v33 = vshrl.u32 %v9570_v27, 16  ;;  %v3582_v34 = vshll.u32 %v9570_v27, 16 }
 0x19e   : > { %v10958_v40 = vadd.f32 %v1698_v37, %v1587_v36  ;;  %8758 = vmatprep.subr.bf16.mxu1 %v9859_v1  ;;  %v8493_v42 = vpop.f32.mrf.mxu1  ;;  %v7187_v36 = vcombine.low %v7170_v30, %v10970_v45  ;;  %v9565_v37 = vld [vmem:[%s12032_s1 + $0x6c8] sm:$0xff]   ;;  %v9567_v45 = vld [vmem:[%s12032_s1 + $0x6c0] sm:$0xff]  }
 0x19f   : > { %v3573_v38 = vrot.slane %v3571_v31, 1  ;;  %v9566_v42 = vld [vmem:[%s12032_s1 + $0x680] sm:$0xff]   ;;  %v9592_v30 = vld [vmem:[%s12032_s1 + $0x7a8] sm:$0xff]  }
 0x1a0   : > { %8739 = vmatpush3.bf16.msra.mxu0 %v9537_v35  ;;  %v9564_v35 = vld [vmem:[%s12032_s1 + $0x688] sm:$0xff]  }
 0x1a1   : > { %8759 = vmatpush3.bf16.msra.mxu1 %v9538_v39  ;;  %8740 = vmatprep.subr.bf16.mxu0 %v9859_v1 }
 0x1a2   : > { %8760 = vmatprep.subr.bf16.mxu1 %v9859_v1 }
 0x1a4   : > { %8741 = vmatpush3.bf16.msra.mxu0 %v9539_v41  ;;  %v3584_v41 = vrot.slane %v3582_v34, 2 }
 0x1a5   : > { %8761 = vmatpush3.bf16.msra.mxu1 %v9540_v43  ;;  %8742 = vmatprep.subr.bf16.mxu0 %v9859_v1  ;;  %v3454_v43 = vrot.slane %v7187_v36, 1  ;;  %v9595_v36 = vld [vmem:[%s12032_s1 + $0x7e0] sm:$0xff]  }
 0x1a6   : > { %8762 = vmatprep.subr.bf16.mxu1 %v9859_v1 }
 0x1a8   : > { %8743 = vmatpush3.bf16.msra.mxu0 %v9541_v46 }
 0x1a9   : > { %8763 = vmatpush3.bf16.msra.mxu1 %v9542_v48  ;;  %8744 = vmatprep.subr.bf16.mxu0 %v9859_v1  ;;  %v3456_v48 = vsel %vm743_vm2, %v3454_v43, %v3455_v44  ;;  %v9597_v43 = vld [vmem:[%s12032_s1 + $0x7d8] sm:$0xff]  }
 0x1aa   : > { %8764 = vmatprep.subr.bf16.mxu1 %v9859_v1 }
 0x1ac   : > { %8745 = vmatpush3.bf16.msra.mxu0 %v9543_v49  ;;  %v9569_v49 = vld [vmem:[%s12032_s1 + $0x738] sm:$0xff]  }
 0x1ad   : > { %8765 = vmatpush3.bf16.msra.mxu1 %v9544_v52  ;;  %8746 = vmatprep.subr.bf16.mxu0 %v9859_v1 }
 0x1ae   : > { %8766 = vmatprep.subr.bf16.mxu1 %v9859_v1 }
 0x1b0   : > { %8747 = vmatpush3.bf16.msra.mxu0 %v9545_v54 }
 0x1b1   : > { %8767 = vmatpush3.bf16.msra.mxu1 %v9546_v58  ;;  %8748 = vmatprep.subr.bf16.mxu0 %v9859_v1 }
 0x1b2   : > { %8768 = vmatprep.subr.bf16.mxu1 %v9859_v1 }
 0x1b4   : > { %8749 = vmatpush3.bf16.msra.mxu0 %v9547_v60 }
 0x1b5   : > { %8769 = vmatpush3.bf16.msra.mxu1 %v9548_v63  ;;  %8774 = vmatprep.subr.bf16.mxu0 %v9859_v1  ;;  %v9574_v63 = vld [vmem:[%s12032_s1 + $0x728] sm:$0xff]  }
 0x1b6   : > { %8794 = vmatprep.subr.bf16.mxu1 %v9859_v1 }
 0x1b7   : > { %v1811_v7 = vpop.f32.mrf.mxu0  ;;  %8751 = vmatmul.mubr.bf16.vlgmr.msra.gmra.mxu0 %v3224_v3 }
 0x1b8   : > { %v1818_v8 = vadd.f32 %v1811_v7, %v10943_v32  ;;  %8775 = vmatpush3.bf16.msra.mxu0 %v9551_v4  ;;  %v1941_v9 = vpop.f32.mrf.mxu1  ;;  %8771 = vmatmul.mubr.bf16.vlgmr.msra.gmra.mxu1 %v3340_v6  ;;  %v3574_v32 = vshll.u32 %v11003_v59, 16  ;;  %v9576_v6 = vld [vmem:[%s12032_s1 + $0x720] sm:$0xff]   ;;  %v9578_v7 = vld [vmem:[%s12032_s1 + $0x718] sm:$0xff]  }
 0x1b9   : > { %v8512_v11 = vpop.f32.mrf.mxu0  ;;  %8795 = vmatpush3.bf16.msra.mxu1 %v9553_v5  ;;  %8776 = vmatprep.subr.bf16.mxu0 %v9859_v1  ;;  %v9577_v5 = vld [vmem:[%s12032_s1 + $0x760] sm:$0xff]  }
 0x1ba   : > { %v11034_v13 = vadd.f32 %v1941_v9, %v1818_v8  ;;  %v8532_v14 = vpop.f32.mrf.mxu1  ;;  %8796 = vmatprep.subr.bf16.mxu1 %v9859_v1  ;;  %8790 = vmatprep.mubr.msk.bf16.mxu0 %vm9860_vm0, %v9859_v1  ;;  %v3576_v39 = vrot.slane %v3574_v32, 2  ;;  %v9579_v8 = vld [vmem:[%s12032_s1 + $0x758] sm:$0xff]   ;;  %v9580_v9 = vld [vmem:[%s12032_s1 + $0x710] sm:$0xff]   ;;  %v9582_v11 = vld [vmem:[%s12032_s1 + $0x708] sm:$0xff]  }
 0x1bb   : > { %v1814_v15 = vpop.f32.mrf.mxu0  ;;  %8810 = vmatprep.mubr.msk.bf16.mxu1 %vm9860_vm0, %v9859_v1  ;;  %v9585_v14 = vld [vmem:[%s12032_s1 + $0x740] sm:$0xff]   ;;  %v9593_v32 = vld [vmem:[%s12032_s1 + $0x7e8] sm:$0xff]  }
 0x1bc   : > { %v1819_v16 = vadd.f32 %v1814_v15, %v10958_v40  ;;  %8777 = vmatpush3.bf16.msra.mxu0 %v9554_v10  ;;  %v1944_v17 = vpop.f32.mrf.mxu1  ;;  %v3581_v40 = vrot.slane %v3579_v33, 1  ;;  %v3577_v46 = vor.u32 %v3576_v39, %v3573_v38  ;;  %v9581_v10 = vld [vmem:[%s12032_s1 + $0x750] sm:$0xff]   ;;  %v9586_v15 = vld [vmem:[%s10004_s28 + $0x18] sm:$0xff]  }
 0x1bd   : > { %v8513_v19 = vpop.f32.mrf.mxu0  ;;  %8797 = vmatpush3.bf16.msra.mxu1 %v9555_v12  ;;  %8778 = vmatprep.subr.bf16.mxu0 %v9859_v1  ;;  %v9583_v12 = vld [vmem:[%s12032_s1 + $0x748] sm:$0xff]   ;;  %v11213_v38 = vld [vmem:[%s10004_s28 + $0x1c] sm:$0xf] }
 0x1be   : > { %v11049_v21 = vadd.f32 %v1944_v17, %v1819_v16  ;;  %8798 = vmatprep.subr.bf16.mxu1 %v9859_v1  ;;  %v8533_v22 = vpop.f32.mrf.mxu1  ;;  %v3585_v47 = vor.u32 %v3584_v41, %v3581_v40  ;;  %v9587_v16 = vld [vmem:[%s12032_s1 + $0x7b8] sm:$0xff]   ;;  %v11218_v40 = vld [vmem:[%s10004_s28 + $0x100] sm:$0xf] }
 0x1bf   : > { %v9588_v17 = vld [vmem:[%s10004_s28 + $0xfc] sm:$0xff]   ;;  %v9590_v22 = vld [vmem:[%s12032_s1 + $0x7b0] sm:$0xff]  }
 0x1c0   : > { %8779 = vmatpush3.bf16.msra.mxu0 %v9556_v18  ;;  %v3586_v50 = vsel %vm976_vm3, %v3577_v46, %v3585_v47  ;;  %v9589_v18 = vld [vmem:[%s12032_s1 + $0x7f8] sm:$0xff]   ;;  %v11234_v46 = vld [vmem:[%s10004_s28 + $0x20] ss:$0 sps:$4 sm:$0x11]  }
 0x1c1   : > { %8799 = vmatpush3.bf16.msra.mxu1 %v9557_v20  ;;  %8780 = vmatprep.subr.bf16.mxu0 %v9859_v1  ;;  %v7306_v39 = vld [vmem:[%s10004_s28 + $0xfc] sm:$0xf] }
 0x1c2   : > { %8800 = vmatprep.subr.bf16.mxu1 %v9859_v1  ;;  %v9596_v41 = vld [vmem:[%s12032_s1 + $0x798] sm:$0xff]   ;;  %v7325_v44 = vcombine.low %v7306_v39, %v11218_v40 }
 0x1c4   : > { %8781 = vmatpush3.bf16.msra.mxu0 %v9558_v23 }
 0x1c5   : > { %8801 = vmatpush3.bf16.msra.mxu1 %v9559_v24  ;;  %8782 = vmatprep.subr.bf16.mxu0 %v9859_v1  ;;  %v9591_v24 = vld [vmem:[%s12032_s1 + $0x7f0] sm:$0xff]  }
 0x1c6   : > { %8802 = vmatprep.subr.bf16.mxu1 %v9859_v1 }
 0x1c8   : > { %8783 = vmatpush3.bf16.msra.mxu0 %v9560_v25 }
 0x1c9   : > { %8803 = vmatpush3.bf16.msra.mxu1 %v9561_v26  ;;  %8784 = vmatprep.subr.bf16.mxu0 %v9859_v1 }
 0x1ca   : > { %8804 = vmatprep.subr.bf16.mxu1 %v9859_v1 }
 0x1cc   : > { %8785 = vmatpush3.bf16.msra.mxu0 %v9562_v28 }
 0x1cd   : > { %8805 = vmatpush3.bf16.msra.mxu1 %v9563_v29  ;;  %8786 = vmatprep.subr.bf16.mxu0 %v9859_v1 }
 0x1ce   : > { %8806 = vmatprep.subr.bf16.mxu1 %v9859_v1 }
 0x1d0   : > { %8787 = vmatpush3.bf16.msra.mxu0 %v9564_v35  ;;  %v9594_v35 = vld [vmem:[%s12032_s1 + $0x7a0] sm:$0xff]  }
 0x1d1   : > { %8807 = vmatpush3.bf16.msra.mxu1 %v9565_v37  ;;  %8788 = vmatprep.subr.bf16.mxu0 %v9859_v1  ;;  %v7277_v37 = vld [vmem:[%s10004_s28 + $0x18] sm:$0xf] }
 0x1d2   : > { %8808 = vmatprep.subr.bf16.mxu1 %v9859_v1 }
 0x1d4   : > { %8789 = vmatpush3.bf16.msra.mxu0 %v9566_v42  ;;  %v7296_v42 = vcombine.low %v7277_v37, %v11213_v38  ;;  %v9623_v37 = vld [vmem:[%s12032_s1 + $0x840] sm:$0xff]  }
 0x1d5   : > { %8809 = vmatpush3.bf16.msra.mxu1 %v9567_v45  ;;  %8814 = vmatprep.subr.bf16.mxu0 %v9859_v1  ;;  %v9598_v45 = vld [vmem:[%s12032_s1 + $0x790] sm:$0xff]  }
 0x1d6   : > { %8834 = vmatprep.subr.bf16.mxu1 %v9859_v1  ;;  %v3949_v47 = vshll.u32 %v7296_v42, 16 }
 0x1d7   : > { %v2061_v52 = vpop.f32.mrf.mxu0  ;;  %8791 = vmatmul.mubr.bf16.vlgmr.msra.gmra.mxu0 %v3456_v48  ;;  %v9599_v48 = vld [vmem:[%s12032_s1 + $0x7d0] sm:$0xff]  }
 0x1d8   : > { %v2068_v53 = vadd.f32 %v2061_v52, %v11034_v13  ;;  %8815 = vmatpush3.bf16.msra.mxu0 %v9569_v49  ;;  %v2180_v54 = vpop.f32.mrf.mxu1  ;;  %8811 = vmatmul.mubr.bf16.vlgmr.msra.gmra.mxu1 %v3586_v50  ;;  %v9584_v13 = vld [vmem:[%s12032_s1 + $0x700] sm:$0xff]   ;;  %v4081_v50 = vshll.u32 %v7325_v44, 16  ;;  %v3947_v52 = vshrl.u32 %v7296_v42, 16 }
 0x1d9   : > { %v8552_v56 = vpop.f32.mrf.mxu0  ;;  %8835 = vmatpush3.bf16.msra.mxu1 %v9571_v51  ;;  %8816 = vmatprep.subr.bf16.mxu0 %v9859_v1  ;;  %v11241_v49 = vld [vmem:[%s10004_s28 + $0x104] ss:$0 sps:$4 sm:$0x11]   ;;  %v9600_v51 = vld [vmem:[%s12032_s1 + $0x788] sm:$0xff]  }
 0x1da   : > { %v2187_v58 = vadd.f32 %v2180_v54, %v2068_v53  ;;  %v8572_v59 = vpop.f32.mrf.mxu1  ;;  %8836 = vmatprep.subr.bf16.mxu1 %v9859_v1  ;;  %8830 = vmatprep.mubr.msk.bf16.mxu0 %vm9860_vm0, %v9859_v1  ;;  %v3951_v53 = vrot.slane %v3949_v47, 1  ;;  %v3954_v54 = vshll.u32 %v11234_v46, 16  ;;  %v4079_v56 = vshrl.u32 %v7325_v44, 16  ;;  %v9628_v47 = vld [vmem:[%s12032_s1 + $0x8b0] sm:$0xff]  }
 0x1db   : > { %v2064_v60 = vpop.f32.mrf.mxu0  ;;  %8850 = vmatprep.mubr.msk.bf16.mxu1 %vm9860_vm0, %v9859_v1  ;;  %v9602_v59 = vld [vmem:[%s12032_s1 + $0x780] sm:$0xff]   ;;  %v4320_v39 = vrot.slane %v11241_v49, 1 }
 0x1dc   : > { %v2069_v61 = vadd.f32 %v2064_v60, %v11049_v21  ;;  %8817 = vmatpush3.bf16.msra.mxu0 %v9572_v55  ;;  %v2183_v62 = vpop.f32.mrf.mxu1  ;;  %v9601_v55 = vld [vmem:[%s12032_s1 + $0x7c8] sm:$0xff]   ;;  %v3952_v60 = vor.u32 %v3951_v53, %v3947_v52 }
 0x1dd   : > { %v8553_v0 = vpop.f32.mrf.mxu0  ;;  %8837 = vmatpush3.bf16.msra.mxu1 %v9573_v57  ;;  %8818 = vmatprep.subr.bf16.mxu0 %v9859_v1  ;;  %v4083_v57 = vrot.slane %v4081_v50, 1 }
 0x1de   : > { %v2188_v3 = vadd.f32 %v2183_v62, %v2069_v61  ;;  %8838 = vmatprep.subr.bf16.mxu1 %v9859_v1  ;;  %v8573_v4 = vpop.f32.mrf.mxu1  ;;  %v3956_v61 = vrot.slane %v3954_v54, 1  ;;  %v9603_v62 = vld [vmem:[%s12032_s1 + $0x7c0] sm:$0xff]  }
 0x1e0   : > { %8819 = vmatpush3.bf16.msra.mxu0 %v9574_v63  ;;  %v4084_v63 = vor.u32 %v4083_v57, %v4079_v56  ;;  %v9631_v57 = vld [vmem:[%s12032_s1 + $0x8e8] sm:$0xff]  }
 0x1e1   : > { %8839 = vmatpush3.bf16.msra.mxu1 %v9575_v2  ;;  %8820 = vmatprep.subr.bf16.mxu0 %v9859_v1  ;;  %v3957_v2 = vsel %vm485_vm1, %v3952_v60, %v3956_v61  ;;  %v9632_v60 = vld [vmem:[%s12032_s1 + $0x8a0] sm:$0xff]  }
 0x1e2   : > { %8840 = vmatprep.subr.bf16.mxu1 %v9859_v1  ;;  %v9633_v61 = vld [vmem:[%s12032_s1 + $0x8e0] sm:$0xff]  }
 0x1e4   : > { %8821 = vmatpush3.bf16.msra.mxu0 %v9576_v6  ;;  %v9609_v6 = vld [vmem:[%s12032_s1 + $0x878] sm:$0xff]  }
 0x1e5   : > { %8841 = vmatpush3.bf16.msra.mxu1 %v9577_v5  ;;  %8822 = vmatprep.subr.bf16.mxu0 %v9859_v1 }
 0x1e6   : > { %8842 = vmatprep.subr.bf16.mxu1 %v9859_v1 }
 0x1e8   : > { %8823 = vmatpush3.bf16.msra.mxu0 %v9578_v7 }
 0x1e9   : > { %8843 = vmatpush3.bf16.msra.mxu1 %v9579_v8  ;;  %8824 = vmatprep.subr.bf16.mxu0 %v9859_v1 }
 0x1ea   : > { %8844 = vmatprep.subr.bf16.mxu1 %v9859_v1 }
 0x1ec   : > { %8825 = vmatpush3.bf16.msra.mxu0 %v9580_v9  ;;  %v9610_v9 = vld [vmem:[%s12032_s1 + $0x830] sm:$0xff]  }
 0x1ed   : > { %8845 = vmatpush3.bf16.msra.mxu1 %v9581_v10  ;;  %8826 = vmatprep.subr.bf16.mxu0 %v9859_v1 }
 0x1ee   : > { %8846 = vmatprep.subr.bf16.mxu1 %v9859_v1 }
 0x1f0   : > { %8827 = vmatpush3.bf16.msra.mxu0 %v9582_v11  ;;  %v9611_v11 = vld [vmem:[%s12032_s1 + $0x870] sm:$0xff]  }
 0x1f1   : > { %8847 = vmatpush3.bf16.msra.mxu1 %v9583_v12  ;;  %8828 = vmatprep.subr.bf16.mxu0 %v9859_v1 }
 0x1f2   : > { %8848 = vmatprep.subr.bf16.mxu1 %v9859_v1 }
 0x1f4   : > { %8829 = vmatpush3.bf16.msra.mxu0 %v9584_v13 }
 0x1f5   : > { %8849 = vmatpush3.bf16.msra.mxu1 %v9585_v14  ;;  %8854 = vmatprep.subr.bf16.mxu0 %v9859_v1 }
 0x1f6   : > { %8874 = vmatprep.subr.bf16.mxu1 %v9859_v1 }
 0x1f7   : > { %v2312_v19 = vpop.f32.mrf.mxu0  ;;  %8831 = vmatmul.mubr.bf16.vlgmr.msra.gmra.mxu0 %v9586_v15 }
 0x1f8   : > { %v2319_v20 = vadd.f32 %v2312_v19, %v2187_v58  ;;  %8855 = vmatpush3.bf16.msra.mxu0 %v9587_v16  ;;  %v2444_v21 = vpop.f32.mrf.mxu1  ;;  %8851 = vmatmul.mubr.bf16.vlgmr.msra.gmra.mxu1 %v9588_v17  ;;  %v4086_v58 = vshll.u32 %v11241_v49, 16  ;;  %v9612_v17 = vld [vmem:[%s12032_s1 + $0x828] sm:$0xff]   ;;  %v9629_v49 = vld [vmem:[%s12032_s1 + $0x8f0] sm:$0xff]  }
 0x1f9   : > { %v8592_v23 = vpop.f32.mrf.mxu0  ;;  %8875 = vmatpush3.bf16.msra.mxu1 %v9589_v18  ;;  %8856 = vmatprep.subr.bf16.mxu0 %v9859_v1  ;;  %v9613_v19 = vld [vmem:[%s12032_s1 + $0x868] sm:$0xff]  }
 0x1fa   : > { %v11187_v25 = vadd.f32 %v2444_v21, %v2319_v20  ;;  %v8612_v26 = vpop.f32.mrf.mxu1  ;;  %8876 = vmatprep.subr.bf16.mxu1 %v9859_v1  ;;  %8870 = vmatprep.mubr.msk.bf16.mxu0 %vm9860_vm0, %v9859_v1  ;;  %v4088_v0 = vrot.slane %v4086_v58, 1  ;;  %v9615_v23 = vld [vmem:[%s12032_s1 + $0x860] sm:$0xff]  }
 0x1fb   : > { %v2315_v27 = vpop.f32.mrf.mxu0  ;;  %8890 = vmatprep.mubr.msk.bf16.mxu1 %vm9860_vm0, %v9859_v1  ;;  %v9618_v26 = vld [vmem:[%s12032_s1 + $0x810] sm:$0xff]  }
 0x1fc   : > { %v2320_v28 = vadd.f32 %v2315_v27, %v2188_v3  ;;  %8857 = vmatpush3.bf16.msra.mxu0 %v9590_v22  ;;  %v2447_v29 = vpop.f32.mrf.mxu1  ;;  %v9606_v3 = vld [vmem:[%s12032_s1 + $0x838] sm:$0xff]   ;;  %v4089_v4 = vsel %vm485_vm1, %v4084_v63, %v4088_v0  ;;  %v9614_v22 = vld [vmem:[%s12032_s1 + $0x820] sm:$0xff]   ;;  %v9619_v27 = vld [vmem:[%s12032_s1 + $0x850] sm:$0xff]  }
 0x1fd   : > { %v8593_v31 = vpop.f32.mrf.mxu0  ;;  %8877 = vmatpush3.bf16.msra.mxu1 %v9591_v24  ;;  %8858 = vmatprep.subr.bf16.mxu0 %v9859_v1  ;;  %v9616_v24 = vld [vmem:[%s12032_s1 + $0x818] sm:$0xff]   ;;  %v9642_v63 = vld [vmem:[%s10004_s28 + $0x20] ss:$0 sps:$4 sm:$0x33]  }
 0x1fe   : > { %v11201_v33 = vadd.f32 %v2447_v29, %v2320_v28  ;;  %8878 = vmatprep.subr.bf16.mxu1 %v9859_v1  ;;  %v8613_v34 = vpop.f32.mrf.mxu1  ;;  %v7335_v28 = vld [vmem:[%s10004_s28 + $0x18] sm:$0xe]  ;;  %v7361_v29 = vld [vmem:[%s10004_s28 + $0xfc] sm:$0xe] }
 0x1ff   : > { %v11328_v31 = vcombine.low %v7335_v28, %v11213_v38  ;;  %v9622_v34 = vld [vmem:[%s12032_s1 + $0x800] sm:$0xff]   ;;  %v9635_v0 = vld [vmem:[%s12032_s1 + $0x8d8] sm:$0xff]  }
 0x200   : > { %8859 = vmatpush3.bf16.msra.mxu0 %v9592_v30  ;;  %v9620_v30 = vld [vmem:[%s12032_s1 + $0x808] sm:$0xff]  }
 0x201   : > { %8879 = vmatpush3.bf16.msra.mxu1 %v9593_v32  ;;  %8860 = vmatprep.subr.bf16.mxu0 %v9859_v1  ;;  %v9621_v32 = vld [vmem:[%s12032_s1 + $0x848] sm:$0xff]  }
 0x202   : > { %8880 = vmatprep.subr.bf16.mxu1 %v9859_v1 }
 0x204   : > { %8861 = vmatpush3.bf16.msra.mxu0 %v9594_v35  ;;  %v4203_v35 = vrot.slane %v11328_v31, 1 }
 0x205   : > { %8881 = vmatpush3.bf16.msra.mxu1 %v9595_v36  ;;  %8862 = vmatprep.subr.bf16.mxu0 %v9859_v1  ;;  %v4204_v36 = vrot.slane %v11234_v46, 1 }
 0x206   : > { %8882 = vmatprep.subr.bf16.mxu1 %v9859_v1 }
 0x208   : > { %8863 = vmatpush3.bf16.msra.mxu0 %v9596_v41  ;;  %v9625_v41 = vld [vmem:[%s12032_s1 + $0x8b8] sm:$0xff]  }
 0x209   : > { %8883 = vmatpush3.bf16.msra.mxu1 %v9597_v43  ;;  %8864 = vmatprep.subr.bf16.mxu0 %v9859_v1  ;;  %v9627_v43 = vld [vmem:[%s12032_s1 + $0x8f8] sm:$0xff]  }
 0x20a   : > { %8884 = vmatprep.subr.bf16.mxu1 %v9859_v1 }
 0x20c   : > { %8865 = vmatpush3.bf16.msra.mxu0 %v9598_v45 }
 0x20d   : > { %8885 = vmatpush3.bf16.msra.mxu1 %v9599_v48  ;;  %8866 = vmatprep.subr.bf16.mxu0 %v9859_v1 }
 0x20e   : > { %8886 = vmatprep.subr.bf16.mxu1 %v9859_v1 }
 0x210   : > { %8867 = vmatpush3.bf16.msra.mxu0 %v9600_v51 }
 0x211   : > { %8887 = vmatpush3.bf16.msra.mxu1 %v9601_v55  ;;  %8868 = vmatprep.subr.bf16.mxu0 %v9859_v1  ;;  %v9630_v55 = vld [vmem:[%s12032_s1 + $0x8a8] sm:$0xff]  }
 0x212   : > { %8888 = vmatprep.subr.bf16.mxu1 %v9859_v1 }
 0x214   : > { %8869 = vmatpush3.bf16.msra.mxu0 %v9602_v59 }
 0x215   : > { %8889 = vmatpush3.bf16.msra.mxu1 %v9603_v62  ;;  %8894 = vmatprep.subr.bf16.mxu0 %v9859_v1  ;;  %v9634_v62 = vld [vmem:[%s12032_s1 + $0x898] sm:$0xff]  }
 0x216   : > { %8914 = vmatprep.subr.bf16.mxu1 %v9859_v1 }
 0x217   : > { %v2560_v5 = vpop.f32.mrf.mxu0  ;;  %8871 = vmatmul.mubr.bf16.vlgmr.msra.gmra.mxu0 %v3957_v2  ;;  %v9636_v2 = vld [vmem:[%s12032_s1 + $0x890] sm:$0xff]  }
 0x218   : > { %v2567_v7 = vadd.f32 %v2560_v5, %v11187_v25  ;;  %8895 = vmatpush3.bf16.msra.mxu0 %v9606_v3  ;;  %v2676_v8 = vpop.f32.mrf.mxu1  ;;  %8891 = vmatmul.mubr.bf16.vlgmr.msra.gmra.mxu1 %v4089_v4  ;;  %v9617_v25 = vld [vmem:[%s12032_s1 + $0x858] sm:$0xff]   ;;  %v4436_v3 = vshrl.u32 %v11328_v31, 16  ;;  %v4439_v4 = vshll.u32 %v11328_v31, 16  ;;  %v4447_v5 = vshll.u32 %v9642_v63, 16 }
 0x219   : > { %v8632_v10 = vpop.f32.mrf.mxu0  ;;  %8915 = vmatpush3.bf16.msra.mxu1 %v9609_v6  ;;  %8896 = vmatprep.subr.bf16.mxu0 %v9859_v1  ;;  %v4444_v6 = vshrl.u32 %v9642_v63, 16 }
 0x21a   : > { %v11280_v12 = vadd.f32 %v2676_v8, %v2567_v7  ;;  %v8652_v13 = vpop.f32.mrf.mxu1  ;;  %8916 = vmatprep.subr.bf16.mxu1 %v9859_v1  ;;  %8910 = vmatprep.mubr.msk.bf16.mxu0 %vm9860_vm0, %v9859_v1  ;;  %v9637_v7 = vld [vmem:[%s12032_s1 + $0x8d0] sm:$0xff]   ;;  %v9638_v8 = vld [vmem:[%s12032_s1 + $0x888] sm:$0xff]   ;;  %v4441_v10 = vrot.slane %v4439_v4, 2 }
 0x21b   : > { %v2563_v14 = vpop.f32.mrf.mxu0  ;;  %8930 = vmatprep.mubr.msk.bf16.mxu1 %vm9860_vm0, %v9859_v1  ;;  %v9639_v13 = vld [vmem:[%s12032_s1 + $0x8c8] sm:$0xff]   ;;  %v9666_v4 = vld [vmem:[%s12032_s1 + $0x9f0] sm:$0xff]  }
 0x21c   : > { %v2568_v15 = vadd.f32 %v2563_v14, %v11201_v33  ;;  %8897 = vmatpush3.bf16.msra.mxu0 %v9610_v9  ;;  %v2679_v16 = vpop.f32.mrf.mxu1  ;;  %v7378_v33 = vcombine.low %v7361_v29, %v11218_v40  ;;  %v4205_v40 = vsel %vm743_vm2, %v4203_v35, %v4204_v36  ;;  %v4438_v9 = vrot.slane %v4436_v3, 1  ;;  %v9640_v14 = vld [vmem:[%s12032_s1 + $0x880] sm:$0xff]   ;;  %v9649_v35 = vld [vmem:[%s12032_s1 + $0x968] sm:$0xff]  }
 0x21d   : > { %v8633_v18 = vpop.f32.mrf.mxu0  ;;  %8917 = vmatpush3.bf16.msra.mxu1 %v9611_v11  ;;  %8898 = vmatprep.subr.bf16.mxu0 %v9859_v1  ;;  %v4446_v11 = vrot.slane %v4444_v6, 1 }
 0x21e   : > { %v11295_v20 = vadd.f32 %v2679_v16, %v2568_v15  ;;  %8918 = vmatprep.subr.bf16.mxu1 %v9859_v1  ;;  %v8653_v21 = vpop.f32.mrf.mxu1  ;;  %v4319_v38 = vrot.slane %v7378_v33, 1  ;;  %v4442_v15 = vor.u32 %v4441_v10, %v4438_v9  ;;  %v9648_v33 = vld [vmem:[%s12032_s1 + $0x928] sm:$0xff]  }
 0x21f   : > { %v9645_v21 = vld [vmem:[%s12032_s1 + $0x978] sm:$0xff]   ;;  %v9667_v10 = vld [vmem:[%s12032_s1 + $0x9a8] sm:$0xff]  }
 0x220   : > { %8899 = vmatpush3.bf16.msra.mxu0 %v9612_v17  ;;  %v4321_v42 = vsel %vm743_vm2, %v4319_v38, %v4320_v39  ;;  %v9641_v17 = vld [vmem:[%s12032_s1 + $0x8c0] sm:$0xff]  }
 0x221   : > { %8919 = vmatpush3.bf16.msra.mxu1 %v9613_v19  ;;  %8900 = vmatprep.subr.bf16.mxu0 %v9859_v1  ;;  %v9643_v19 = vld [vmem:[%s12032_s1 + $0x938] sm:$0xff]   ;;  %v9650_v38 = vld [vmem:[%s12032_s1 + $0x920] sm:$0xff]  }
 0x222   : > { %8920 = vmatprep.subr.bf16.mxu1 %v9859_v1  ;;  %v9651_v39 = vld [vmem:[%s12032_s1 + $0x960] sm:$0xff]  }
 0x224   : > { %8901 = vmatpush3.bf16.msra.mxu0 %v9614_v22 }
 0x225   : > { %8921 = vmatpush3.bf16.msra.mxu1 %v9615_v23  ;;  %8902 = vmatprep.subr.bf16.mxu0 %v9859_v1 }
 0x226   : > { %8922 = vmatprep.subr.bf16.mxu1 %v9859_v1 }
 0x228   : > { %8903 = vmatpush3.bf16.msra.mxu0 %v9616_v24 }
 0x229   : > { %8923 = vmatpush3.bf16.msra.mxu1 %v9617_v25  ;;  %8904 = vmatprep.subr.bf16.mxu0 %v9859_v1  ;;  %v9646_v25 = vld [vmem:[%s12032_s1 + $0x930] sm:$0xff]  }
 0x22a   : > { %8924 = vmatprep.subr.bf16.mxu1 %v9859_v1 }
 0x22c   : > { %8905 = vmatpush3.bf16.msra.mxu0 %v9618_v26 }
 0x22d   : > { %8925 = vmatpush3.bf16.msra.mxu1 %v9619_v27  ;;  %8906 = vmatprep.subr.bf16.mxu0 %v9859_v1  ;;  %v9647_v27 = vld [vmem:[%s12032_s1 + $0x970] sm:$0xff]  }
 0x22e   : > { %8926 = vmatprep.subr.bf16.mxu1 %v9859_v1 }
 0x230   : > { %8907 = vmatpush3.bf16.msra.mxu0 %v9620_v30 }
 0x231   : > { %8927 = vmatpush3.bf16.msra.mxu1 %v9621_v32  ;;  %8908 = vmatprep.subr.bf16.mxu0 %v9859_v1 }
 0x232   : > { %8928 = vmatprep.subr.bf16.mxu1 %v9859_v1 }
 0x234   : > { %8909 = vmatpush3.bf16.msra.mxu0 %v9622_v34 }
 0x235   : > { %8929 = vmatpush3.bf16.msra.mxu1 %v9623_v37  ;;  %8934 = vmatprep.subr.bf16.mxu0 %v9859_v1 }
 0x236   : > { %8954 = vmatprep.subr.bf16.mxu1 %v9859_v1 }
 0x237   : > { %v2806_v44 = vpop.f32.mrf.mxu0  ;;  %8911 = vmatmul.mubr.bf16.vlgmr.msra.gmra.mxu0 %v4205_v40  ;;  %v7469_v40 = vld [vmem:[%s10004_s28 + $0x1e0] sm:$0xf] }
 0x238   : > { %v2813_v45 = vadd.f32 %v2806_v44, %v11280_v12  ;;  %8935 = vmatpush3.bf16.msra.mxu0 %v9625_v41  ;;  %v2925_v46 = vpop.f32.mrf.mxu1  ;;  %8931 = vmatmul.mubr.bf16.vlgmr.msra.gmra.mxu1 %v4321_v42  ;;  %v4449_v12 = vrot.slane %v4447_v5, 2  ;;  %v11472_v41 = vld [vmem:[%s10004_s28 + $0x1e4] sm:$0xf]  ;;  %v9652_v42 = vld [vmem:[%s12032_s1 + $0x918] sm:$0xff]  }
 0x239   : > { %v8672_v48 = vpop.f32.mrf.mxu0  ;;  %8955 = vmatpush3.bf16.msra.mxu1 %v9627_v43  ;;  %8936 = vmatprep.subr.bf16.mxu0 %v9859_v1  ;;  %v9653_v43 = vld [vmem:[%s12032_s1 + $0x958] sm:$0xff]   ;;  %v7488_v44 = vcombine.low %v7469_v40, %v11472_v41 }
 0x23a   : > { %v11365_v50 = vadd.f32 %v2925_v46, %v2813_v45  ;;  %v8692_v51 = vpop.f32.mrf.mxu1  ;;  %8956 = vmatprep.subr.bf16.mxu1 %v9859_v1  ;;  %8950 = vmatprep.mubr.msk.bf16.mxu0 %vm9860_vm0, %v9859_v1  ;;  %v4450_v16 = vor.u32 %v4449_v12, %v4446_v11  ;;  %v9654_v45 = vld [vmem:[%s12032_s1 + $0x910] sm:$0xff]   ;;  %v9668_v12 = vld [vmem:[%s12032_s1 + $0x9e8] sm:$0xff]   ;;  %v9681_v40 = vld [vmem:[%s12032_s1 + $0xa38] sm:$0xff]  }
 0x23b   : > { %v2809_v52 = vpop.f32.mrf.mxu0  ;;  %8970 = vmatprep.mubr.msk.bf16.mxu1 %vm9860_vm0, %v9859_v1  ;;  %v9655_v46 = vld [vmem:[%s12032_s1 + $0x950] sm:$0xff]   ;;  %v4813_v48 = vshll.u32 %v7488_v44, 16  ;;  %v4811_v51 = vshrl.u32 %v7488_v44, 16 }
 0x23c   : > { %v2814_v53 = vadd.f32 %v2809_v52, %v11295_v20  ;;  %8937 = vmatpush3.bf16.msra.mxu0 %v9628_v47  ;;  %v2928_v54 = vpop.f32.mrf.mxu1  ;;  %v4451_v18 = vsel %vm976_vm3, %v4442_v15, %v4450_v16  ;;  %v9644_v20 = vld [vmem:[%s10004_s28 + $0x1e0] sm:$0xff]   ;;  %v11491_v47 = vld [vmem:[%s10004_s28 + $0x1e8] ss:$0 sps:$4 sm:$0x11]  }
 0x23d   : > { %v8673_v56 = vpop.f32.mrf.mxu0  ;;  %8957 = vmatpush3.bf16.msra.mxu1 %v9629_v49  ;;  %8938 = vmatprep.subr.bf16.mxu0 %v9859_v1  ;;  %v9656_v49 = vld [vmem:[%s12032_s1 + $0x908] sm:$0xff]   ;;  %v4815_v52 = vrot.slane %v4813_v48, 1  ;;  %v9669_v15 = vld [vmem:[%s12032_s1 + $0x9a0] sm:$0xff]   ;;  %v9685_v48 = vld [vmem:[%s12032_s1 + $0xa70] sm:$0xff]  }
 0x23e   : > { %v11380_v58 = vadd.f32 %v2928_v54, %v2814_v53  ;;  %8958 = vmatprep.subr.bf16.mxu1 %v9859_v1  ;;  %v8693_v59 = vpop.f32.mrf.mxu1  ;;  %v4818_v53 = vshll.u32 %v11491_v47, 16  ;;  %v9658_v54 = vld [vmem:[%s12032_s1 + $0x900] sm:$0xff]  }
 0x23f   : > { %v4816_v56 = vor.u32 %v4815_v52, %v4811_v51  ;;  %v9661_v59 = vld [vmem:[%s12032_s1 + $0x9b8] sm:$0xff]   ;;  %v9670_v16 = vld [vmem:[%s12032_s1 + $0x9e0] sm:$0xff]  }
 0x240   : > { %8939 = vmatpush3.bf16.msra.mxu0 %v9630_v55  ;;  %v9659_v55 = vld [vmem:[%s12032_s1 + $0x940] sm:$0xff]  }
 0x241   : > { %8959 = vmatpush3.bf16.msra.mxu1 %v9631_v57  ;;  %8940 = vmatprep.subr.bf16.mxu0 %v9859_v1  ;;  %v4820_v57 = vrot.slane %v4818_v53, 1 }
 0x242   : > { %8960 = vmatprep.subr.bf16.mxu1 %v9859_v1 }
 0x244   : > { %8941 = vmatpush3.bf16.msra.mxu0 %v9632_v60  ;;  %v4821_v60 = vsel %vm485_vm1, %v4816_v56, %v4820_v57  ;;  %v9687_v56 = vld [vmem:[%s12032_s1 + $0xa68] sm:$0xff]  }
 0x245   : > { %8961 = vmatpush3.bf16.msra.mxu1 %v9633_v61  ;;  %8942 = vmatprep.subr.bf16.mxu0 %v9859_v1  ;;  %v9664_v61 = vld [vmem:[%s12032_s1 + $0x9f8] sm:$0xff]  }
 0x246   : > { %8962 = vmatprep.subr.bf16.mxu1 %v9859_v1 }
 0x248   : > { %8943 = vmatpush3.bf16.msra.mxu0 %v9634_v62 }
 0x249   : > { %8963 = vmatpush3.bf16.msra.mxu1 %v9635_v0  ;;  %8944 = vmatprep.subr.bf16.mxu0 %v9859_v1 }
 0x24a   : > { %8964 = vmatprep.subr.bf16.mxu1 %v9859_v1 }
 0x24c   : > { %8945 = vmatpush3.bf16.msra.mxu0 %v9636_v2  ;;  %v9665_v2 = vld [vmem:[%s12032_s1 + $0x9b0] sm:$0xff]  }
 0x24d   : > { %8965 = vmatpush3.bf16.msra.mxu1 %v9637_v7  ;;  %8946 = vmatprep.subr.bf16.mxu0 %v9859_v1 }
 0x24e   : > { %8966 = vmatprep.subr.bf16.mxu1 %v9859_v1 }
 0x250   : > { %8947 = vmatpush3.bf16.msra.mxu0 %v9638_v8 }
 0x251   : > { %8967 = vmatpush3.bf16.msra.mxu1 %v9639_v13  ;;  %8948 = vmatprep.subr.bf16.mxu0 %v9859_v1 }
 0x252   : > { %8968 = vmatprep.subr.bf16.mxu1 %v9859_v1 }
 0x254   : > { %8949 = vmatpush3.bf16.msra.mxu0 %v9640_v14 }
 0x255   : > { %8969 = vmatpush3.bf16.msra.mxu1 %v9641_v17  ;;  %8974 = vmatprep.subr.bf16.mxu0 %v9859_v1  ;;  %v7498_v17 = vld [vmem:[%s10004_s28 + $0x2c4] sm:$0xf] }
 0x256   : > { %8994 = vmatprep.subr.bf16.mxu1 %v9859_v1 }
 0x257   : > { %v3044_v22 = vpop.f32.mrf.mxu0  ;;  %8951 = vmatmul.mubr.bf16.vlgmr.msra.gmra.mxu0 %v4451_v18  ;;  %v11556_v18 = vld [vmem:[%s10004_s28 + $0x2c8] sm:$0xf] }
 0x258   : > { %v3051_v23 = vadd.f32 %v3044_v22, %v11365_v50  ;;  %8975 = vmatpush3.bf16.msra.mxu0 %v9643_v19  ;;  %v3176_v24 = vpop.f32.mrf.mxu1  ;;  %8971 = vmatmul.mubr.bf16.vlgmr.msra.gmra.mxu1 %v9644_v20  ;;  %v9657_v50 = vld [vmem:[%s12032_s1 + $0x948] sm:$0xff]   ;;  %v9671_v19 = vld [vmem:[%s12032_s1 + $0x998] sm:$0xff]   ;;  %v7517_v20 = vcombine.low %v7498_v17, %v11556_v18  ;;  %v9673_v22 = vld [vmem:[%s12032_s1 + $0x990] sm:$0xff]  }
 0x259   : > { %v8712_v26 = vpop.f32.mrf.mxu0  ;;  %8995 = vmatpush3.bf16.msra.mxu1 %v9645_v21  ;;  %8976 = vmatprep.subr.bf16.mxu0 %v9859_v1  ;;  %v9672_v21 = vld [vmem:[%s12032_s1 + $0x9d8] sm:$0xff]  }
 0x25a   : > { %v11444_v28 = vadd.f32 %v3176_v24, %v3051_v23  ;;  %v8732_v29 = vpop.f32.mrf.mxu1  ;;  %8996 = vmatprep.subr.bf16.mxu1 %v9859_v1  ;;  %8990 = vmatprep.mubr.msk.bf16.mxu0 %vm9860_vm0, %v9859_v1  ;;  %v11572_v23 = vld [vmem:[%s10004_s28 + $0x2cc] ss:$0 sps:$4 sm:$0x11]   ;;  %v4945_v24 = vshll.u32 %v7517_v20, 16  ;;  %v7527_v26 = vld [vmem:[%s10004_s28 + $0x1e0] sm:$0xe] }
 0x25b   : > { %v3047_v30 = vpop.f32.mrf.mxu0  ;;  %9010 = vmatprep.mubr.msk.bf16.mxu1 %vm9860_vm0, %v9859_v1  ;;  %v5184_v17 = vrot.slane %v11572_v23, 1 }
 0x25c   : > { %v3052_v31 = vadd.f32 %v3047_v30, %v11380_v58  ;;  %8977 = vmatpush3.bf16.msra.mxu0 %v9646_v25  ;;  %v3179_v32 = vpop.f32.mrf.mxu1  ;;  %v9660_v58 = vld [vmem:[%s10004_s28 + $0x2c4] sm:$0xff]   ;;  %v9674_v25 = vld [vmem:[%s12032_s1 + $0x9d0] sm:$0xff]   ;;  %v4947_v29 = vrot.slane %v4945_v24, 1  ;;  %v4950_v30 = vshll.u32 %v11572_v23, 16  ;;  %v9701_v24 = vld [vmem:[%s12032_s1 + $0xaf8] sm:$0xff]  }
 0x25d   : > { %v8713_v34 = vpop.f32.mrf.mxu0  ;;  %8997 = vmatpush3.bf16.msra.mxu1 %v9647_v27  ;;  %8978 = vmatprep.subr.bf16.mxu0 %v9859_v1  ;;  %v9675_v27 = vld [vmem:[%s12032_s1 + $0x988] sm:$0xff]  }
 0x25e   : > { %v11459_v36 = vadd.f32 %v3179_v32, %v3052_v31  ;;  %8998 = vmatprep.subr.bf16.mxu1 %v9859_v1  ;;  %v8733_v37 = vpop.f32.mrf.mxu1  ;;  %v9676_v31 = vld [vmem:[%s12032_s1 + $0x9c8] sm:$0xff]   ;;  %v11589_v32 = vcombine.low %v7527_v26, %v11472_v41 }
 0x260   : > { %8979 = vmatpush3.bf16.msra.mxu0 %v9648_v33  ;;  %v9677_v33 = vld [vmem:[%s12032_s1 + $0x980] sm:$0xff]   ;;  %v5067_v37 = vrot.slane %v11589_v32, 1 }
 0x261   : > { %8999 = vmatpush3.bf16.msra.mxu1 %v9649_v35  ;;  %8980 = vmatprep.subr.bf16.mxu0 %v9859_v1  ;;  %v4952_v35 = vrot.slane %v4950_v30, 1  ;;  %v9703_v30 = vld [vmem:[%s12032_s1 + $0xaf0] sm:$0xff]  }
 0x262   : > { %9000 = vmatprep.subr.bf16.mxu1 %v9859_v1 }
 0x264   : > { %8981 = vmatpush3.bf16.msra.mxu0 %v9650_v38  ;;  %v5068_v38 = vrot.slane %v11491_v47, 1 }
 0x265   : > { %9001 = vmatpush3.bf16.msra.mxu1 %v9651_v39  ;;  %8982 = vmatprep.subr.bf16.mxu0 %v9859_v1 }
 0x266   : > { %9002 = vmatprep.subr.bf16.mxu1 %v9859_v1  ;;  %v5069_v41 = vsel %vm743_vm2, %v5067_v37, %v5068_v38  ;;  %v9705_v38 = vld [vmem:[%s12032_s1 + $0xae8] sm:$0xff]  }
 0x268   : > { %8983 = vmatpush3.bf16.msra.mxu0 %v9652_v42  ;;  %v9683_v42 = vld [vmem:[%s12032_s1 + $0xa78] sm:$0xff]  }
 0x269   : > { %9003 = vmatpush3.bf16.msra.mxu1 %v9653_v43  ;;  %8984 = vmatprep.subr.bf16.mxu0 %v9859_v1 }
 0x26a   : > { %9004 = vmatprep.subr.bf16.mxu1 %v9859_v1 }
 0x26c   : > { %8985 = vmatpush3.bf16.msra.mxu0 %v9654_v45 }
 0x26d   : > { %9005 = vmatpush3.bf16.msra.mxu1 %v9655_v46  ;;  %8986 = vmatprep.subr.bf16.mxu0 %v9859_v1  ;;  %v9684_v46 = vld [vmem:[%s12032_s1 + $0xa30] sm:$0xff]  }
 0x26e   : > { %9006 = vmatprep.subr.bf16.mxu1 %v9859_v1 }
 0x270   : > { %8987 = vmatpush3.bf16.msra.mxu0 %v9656_v49 }
 0x271   : > { %9007 = vmatpush3.bf16.msra.mxu1 %v9657_v50  ;;  %8988 = vmatprep.subr.bf16.mxu0 %v9859_v1 }
 0x272   : > { %9008 = vmatprep.subr.bf16.mxu1 %v9859_v1 }
 0x274   : > { %8989 = vmatpush3.bf16.msra.mxu0 %v9658_v54  ;;  %v9686_v54 = vld [vmem:[%s12032_s1 + $0xa28] sm:$0xff]  }
 0x275   : > { %9009 = vmatpush3.bf16.msra.mxu1 %v9659_v55  ;;  %9014 = vmatprep.subr.bf16.mxu0 %v9859_v1 }
 0x276   : > { %9034 = vmatprep.subr.bf16.mxu1 %v9859_v1 }
 0x277   : > { %v3308_v62 = vpop.f32.mrf.mxu0  ;;  %8991 = vmatmul.mubr.bf16.vlgmr.msra.gmra.mxu0 %v9660_v58 }
 0x278   : > { %v3315_v63 = vadd.f32 %v3308_v62, %v11444_v28  ;;  %9015 = vmatpush3.bf16.msra.mxu0 %v9661_v59  ;;  %v3424_v0 = vpop.f32.mrf.mxu1  ;;  %9011 = vmatmul.mubr.bf16.vlgmr.msra.gmra.mxu1 %v4821_v60  ;;  %v4943_v28 = vshrl.u32 %v7517_v20, 16  ;;  %v9688_v59 = vld [vmem:[%s12032_s1 + $0xa20] sm:$0xff]   ;;  %v9691_v62 = vld [vmem:[%s12032_s1 + $0xa58] sm:$0xff]  }
 0x279   : > { %v8752_v3 = vpop.f32.mrf.mxu0  ;;  %9035 = vmatpush3.bf16.msra.mxu1 %v9664_v61  ;;  %9016 = vmatprep.subr.bf16.mxu0 %v9859_v1  ;;  %v9689_v60 = vld [vmem:[%s12032_s1 + $0xa60] sm:$0xff]   ;;  %v9690_v61 = vld [vmem:[%s12032_s1 + $0xa18] sm:$0xff]  }
 0x27a   : > { %v11529_v6 = vadd.f32 %v3424_v0, %v3315_v63  ;;  %v8772_v5 = vpop.f32.mrf.mxu1  ;;  %9036 = vmatprep.subr.bf16.mxu1 %v9859_v1  ;;  %9030 = vmatprep.mubr.msk.bf16.mxu0 %vm9860_vm0, %v9859_v1  ;;  %v4948_v34 = vor.u32 %v4947_v29, %v4943_v28  ;;  %v9700_v63 = vld [vmem:[%s10004_s28 + $0x1e8] ss:$0 sps:$4 sm:$0x33]   ;;  %v9692_v0 = vld [vmem:[%s12032_s1 + $0xa10] sm:$0xff]   ;;  %v7553_v3 = vld [vmem:[%s10004_s28 + $0x2c4] sm:$0xe] }
 0x27b   : > { %v3311_v7 = vpop.f32.mrf.mxu0  ;;  %9050 = vmatprep.mubr.msk.bf16.mxu1 %vm9860_vm0, %v9859_v1  ;;  %v5308_v5 = vshrl.u32 %v9700_v63, 16  ;;  %v9702_v28 = vld [vmem:[%s12032_s1 + $0xab0] sm:$0xff]  }
 0x27c   : > { %v3316_v8 = vadd.f32 %v3311_v7, %v11459_v36  ;;  %9017 = vmatpush3.bf16.msra.mxu0 %v9665_v2  ;;  %v3427_v9 = vpop.f32.mrf.mxu1  ;;  %v9678_v36 = vld [vmem:[%s12032_s1 + $0x9c0] sm:$0xff]   ;;  %v4953_v39 = vsel %vm485_vm1, %v4948_v34, %v4952_v35  ;;  %v9693_v2 = vld [vmem:[%s12032_s1 + $0xa50] sm:$0xff]   ;;  %v5311_v7 = vshll.u32 %v9700_v63, 16 }
 0x27d   : > { %v8753_v11 = vpop.f32.mrf.mxu0  ;;  %9037 = vmatpush3.bf16.msra.mxu1 %v9666_v4  ;;  %9018 = vmatprep.subr.bf16.mxu0 %v9859_v1  ;;  %v5300_v4 = vshrl.u32 %v11589_v32, 16 }
 0x27e   : > { %v11544_v13 = vadd.f32 %v3427_v9, %v3316_v8  ;;  %9038 = vmatprep.subr.bf16.mxu1 %v9859_v1  ;;  %v8773_v14 = vpop.f32.mrf.mxu1  ;;  %v9694_v8 = vld [vmem:[%s12032_s1 + $0xa08] sm:$0xff]   ;;  %v7570_v9 = vcombine.low %v7553_v3, %v11556_v18  ;;  %v9697_v18 = vld [vmem:[%s12032_s1 + $0xa40] sm:$0xff]  }
 0x27f   : > { %v5302_v11 = vrot.slane %v5300_v4, 1  ;;  %v5313_v14 = vrot.slane %v5311_v7, 2  ;;  %v9722_v3 = vld [vmem:[%s12032_s1 + $0xb28] sm:$0xff]  }
 0x280   : > { %9019 = vmatpush3.bf16.msra.mxu0 %v9667_v10  ;;  %v9695_v10 = vld [vmem:[%s12032_s1 + $0xa48] sm:$0xff]  }
 0x281   : > { %9039 = vmatpush3.bf16.msra.mxu1 %v9668_v12  ;;  %9020 = vmatprep.subr.bf16.mxu0 %v9859_v1 }
 0x282   : > { %9040 = vmatprep.subr.bf16.mxu1 %v9859_v1 }
 0x284   : > { %9021 = vmatpush3.bf16.msra.mxu0 %v9669_v15  ;;  %v9696_v15 = vld [vmem:[%s12032_s1 + $0xa00] sm:$0xff]  }
 0x285   : > { %9041 = vmatpush3.bf16.msra.mxu1 %v9670_v16  ;;  %9022 = vmatprep.subr.bf16.mxu0 %v9859_v1  ;;  %v5183_v16 = vrot.slane %v7570_v9, 1  ;;  %v9725_v9 = vld [vmem:[%s12032_s1 + $0xb60] sm:$0xff]  }
 0x286   : > { %9042 = vmatprep.subr.bf16.mxu1 %v9859_v1 }
 0x288   : > { %9023 = vmatpush3.bf16.msra.mxu0 %v9671_v19 }
 0x289   : > { %9043 = vmatpush3.bf16.msra.mxu1 %v9672_v21  ;;  %9024 = vmatprep.subr.bf16.mxu0 %v9859_v1  ;;  %v5185_v21 = vsel %vm743_vm2, %v5183_v16, %v5184_v17  ;;  %v9727_v16 = vld [vmem:[%s12032_s1 + $0xb58] sm:$0xff]  }
 0x28a   : > { %9044 = vmatprep.subr.bf16.mxu1 %v9859_v1 }
 0x28c   : > { %9025 = vmatpush3.bf16.msra.mxu0 %v9673_v22  ;;  %v9699_v22 = vld [vmem:[%s12032_s1 + $0xab8] sm:$0xff]  }
 0x28d   : > { %9045 = vmatpush3.bf16.msra.mxu1 %v9674_v25  ;;  %9026 = vmatprep.subr.bf16.mxu0 %v9859_v1 }
 0x28e   : > { %9046 = vmatprep.subr.bf16.mxu1 %v9859_v1 }
 0x290   : > { %9027 = vmatpush3.bf16.msra.mxu0 %v9675_v27 }
 0x291   : > { %9047 = vmatpush3.bf16.msra.mxu1 %v9676_v31  ;;  %9028 = vmatprep.subr.bf16.mxu0 %v9859_v1 }
 0x292   : > { %9048 = vmatprep.subr.bf16.mxu1 %v9859_v1 }
 0x294   : > { %9029 = vmatpush3.bf16.msra.mxu0 %v9677_v33 }
 0x295   : > { %9049 = vmatpush3.bf16.msra.mxu1 %v9678_v36  ;;  %9054 = vmatprep.subr.bf16.mxu0 %v9859_v1  ;;  %v9704_v36 = vld [vmem:[%s12032_s1 + $0xaa8] sm:$0xff]  }
 0x296   : > { %9074 = vmatprep.subr.bf16.mxu1 %v9859_v1 }
 0x297   : > { %v3540_v43 = vpop.f32.mrf.mxu0  ;;  %9031 = vmatmul.mubr.bf16.vlgmr.msra.gmra.mxu0 %v4953_v39 }
 0x298   : > { %v3547_v44 = vadd.f32 %v3540_v43, %v11529_v6  ;;  %9055 = vmatpush3.bf16.msra.mxu0 %v9681_v40  ;;  %v3670_v45 = vpop.f32.mrf.mxu1  ;;  %9051 = vmatmul.mubr.bf16.vlgmr.msra.gmra.mxu1 %v5069_v41  ;;  %v5303_v6 = vshll.u32 %v11589_v32, 16  ;;  %v9706_v41 = vld [vmem:[%s12032_s1 + $0xaa0] sm:$0xff]   ;;  %v9708_v43 = vld [vmem:[%s12032_s1 + $0xa98] sm:$0xff]  }
 0x299   : > { %v8792_v47 = vpop.f32.mrf.mxu0  ;;  %9075 = vmatpush3.bf16.msra.mxu1 %v9683_v42  ;;  %9056 = vmatprep.subr.bf16.mxu0 %v9859_v1  ;;  %v9707_v42 = vld [vmem:[%s12032_s1 + $0xae0] sm:$0xff]  }
 0x29a   : > { %v11620_v49 = vadd.f32 %v3670_v45, %v3547_v44  ;;  %v8812_v50 = vpop.f32.mrf.mxu1  ;;  %9076 = vmatprep.subr.bf16.mxu1 %v9859_v1  ;;  %9070 = vmatprep.mubr.msk.bf16.mxu0 %vm9860_vm0, %v9859_v1  ;;  %v5305_v12 = vrot.slane %v5303_v6, 2  ;;  %v9709_v44 = vld [vmem:[%s12032_s1 + $0xad8] sm:$0xff]   ;;  %v9710_v45 = vld [vmem:[%s12032_s1 + $0xa90] sm:$0xff]   ;;  %v9712_v47 = vld [vmem:[%s12032_s1 + $0xa88] sm:$0xff]  }
 0x29b   : > { %v3543_v51 = vpop.f32.mrf.mxu0  ;;  %9090 = vmatprep.mubr.msk.bf16.mxu1 %vm9860_vm0, %v9859_v1  ;;  %v9715_v50 = vld [vmem:[%s12032_s1 + $0xac0] sm:$0xff]   ;;  %v9723_v6 = vld [vmem:[%s12032_s1 + $0xb68] sm:$0xff]  }
 0x29c   : > { %v3548_v52 = vadd.f32 %v3543_v51, %v11544_v13  ;;  %9057 = vmatpush3.bf16.msra.mxu0 %v9684_v46  ;;  %v3673_v53 = vpop.f32.mrf.mxu1  ;;  %v5310_v13 = vrot.slane %v5308_v5, 1  ;;  %v5306_v19 = vor.u32 %v5305_v12, %v5302_v11  ;;  %v9711_v46 = vld [vmem:[%s12032_s1 + $0xad0] sm:$0xff]   ;;  %v9716_v51 = vld [vmem:[%s10004_s28 + $0x24] sm:$0xff]  }
 0x29d   : > { %v8793_v55 = vpop.f32.mrf.mxu0  ;;  %9077 = vmatpush3.bf16.msra.mxu1 %v9685_v48  ;;  %9058 = vmatprep.subr.bf16.mxu0 %v9859_v1  ;;  %v9713_v48 = vld [vmem:[%s12032_s1 + $0xac8] sm:$0xff]  }
 0x29e   : > { %v11635_v57 = vadd.f32 %v3673_v53, %v3548_v52  ;;  %9078 = vmatprep.subr.bf16.mxu1 %v9859_v1  ;;  %v8813_v58 = vpop.f32.mrf.mxu1  ;;  %v5314_v20 = vor.u32 %v5313_v14, %v5310_v13  ;;  %v9717_v52 = vld [vmem:[%s12032_s1 + $0xb38] sm:$0xff]   ;;  %v9718_v53 = vld [vmem:[%s10004_s28 + $0x108] sm:$0xff]  }
 0x29f   : > { %v9720_v58 = vld [vmem:[%s12032_s1 + $0xb30] sm:$0xff]   ;;  %v11799_v11 = vld [vmem:[%s10004_s28 + $0x28] sm:$0xf]  ;;  %v11804_v13 = vld [vmem:[%s10004_s28 + $0x10c] sm:$0xf] }
 0x2a0   : > { %9059 = vmatpush3.bf16.msra.mxu0 %v9686_v54  ;;  %v5315_v23 = vsel %vm976_vm3, %v5306_v19, %v5314_v20  ;;  %v9719_v54 = vld [vmem:[%s12032_s1 + $0xb78] sm:$0xff]   ;;  %v7689_v12 = vld [vmem:[%s10004_s28 + $0x108] sm:$0xf]  ;;  %v11820_v19 = vld [vmem:[%s10004_s28 + $0x2c] ss:$0 sps:$4 sm:$0x11]  }
 0x2a1   : > { %9079 = vmatpush3.bf16.msra.mxu1 %v9687_v56  ;;  %9060 = vmatprep.subr.bf16.mxu0 %v9859_v1  ;;  %v9726_v14 = vld [vmem:[%s12032_s1 + $0xb18] sm:$0xff]   ;;  %v7708_v17 = vcombine.low %v7689_v12, %v11804_v13 }
 0x2a2   : > { %9080 = vmatprep.subr.bf16.mxu1 %v9859_v1 }
 0x2a4   : > { %9061 = vmatpush3.bf16.msra.mxu0 %v9688_v59 }
 0x2a5   : > { %9081 = vmatpush3.bf16.msra.mxu1 %v9689_v60  ;;  %9062 = vmatprep.subr.bf16.mxu0 %v9859_v1  ;;  %v9721_v60 = vld [vmem:[%s12032_s1 + $0xb70] sm:$0xff]  }
 0x2a6   : > { %9082 = vmatprep.subr.bf16.mxu1 %v9859_v1 }
 0x2a8   : > { %9063 = vmatpush3.bf16.msra.mxu0 %v9690_v61 }
 0x2a9   : > { %9083 = vmatpush3.bf16.msra.mxu1 %v9691_v62  ;;  %9064 = vmatprep.subr.bf16.mxu0 %v9859_v1 }
 0x2aa   : > { %9084 = vmatprep.subr.bf16.mxu1 %v9859_v1 }
 0x2ac   : > { %9065 = vmatpush3.bf16.msra.mxu0 %v9692_v0 }
 0x2ad   : > { %9085 = vmatpush3.bf16.msra.mxu1 %v9693_v2  ;;  %9066 = vmatprep.subr.bf16.mxu0 %v9859_v1 }
 0x2ae   : > { %9086 = vmatprep.subr.bf16.mxu1 %v9859_v1 }
 0x2b0   : > { %9067 = vmatpush3.bf16.msra.mxu0 %v9694_v8  ;;  %v9724_v8 = vld [vmem:[%s12032_s1 + $0xb20] sm:$0xff]  }
 0x2b1   : > { %9087 = vmatpush3.bf16.msra.mxu1 %v9695_v10  ;;  %9068 = vmatprep.subr.bf16.mxu0 %v9859_v1  ;;  %v7660_v10 = vld [vmem:[%s10004_s28 + $0x24] sm:$0xf] }
 0x2b2   : > { %9088 = vmatprep.subr.bf16.mxu1 %v9859_v1 }
 0x2b4   : > { %9069 = vmatpush3.bf16.msra.mxu0 %v9696_v15  ;;  %v7679_v15 = vcombine.low %v7660_v10, %v11799_v11  ;;  %v9753_v10 = vld [vmem:[%s12032_s1 + $0xbc0] sm:$0xff]  }
 0x2b5   : > { %9089 = vmatpush3.bf16.msra.mxu1 %v9697_v18  ;;  %9094 = vmatprep.subr.bf16.mxu0 %v9859_v1  ;;  %v9728_v18 = vld [vmem:[%s12032_s1 + $0xb10] sm:$0xff]  }
 0x2b6   : > { %9114 = vmatprep.subr.bf16.mxu1 %v9859_v1  ;;  %v5678_v20 = vshll.u32 %v7679_v15, 16 }
 0x2b7   : > { %v3790_v25 = vpop.f32.mrf.mxu0  ;;  %9071 = vmatmul.mubr.bf16.vlgmr.msra.gmra.mxu0 %v5185_v21  ;;  %v9729_v21 = vld [vmem:[%s12032_s1 + $0xb50] sm:$0xff]  }
 0x2b8   : > { %v3797_v26 = vadd.f32 %v3790_v25, %v11620_v49  ;;  %9095 = vmatpush3.bf16.msra.mxu0 %v9699_v22  ;;  %v3909_v27 = vpop.f32.mrf.mxu1  ;;  %9091 = vmatmul.mubr.bf16.vlgmr.msra.gmra.mxu1 %v5315_v23  ;;  %v9714_v49 = vld [vmem:[%s12032_s1 + $0xa80] sm:$0xff]   ;;  %v11827_v22 = vld [vmem:[%s10004_s28 + $0x110] ss:$0 sps:$4 sm:$0x11]   ;;  %v5810_v23 = vshll.u32 %v7708_v17, 16  ;;  %v5676_v25 = vshrl.u32 %v7679_v15, 16 }
 0x2b9   : > { %v8832_v29 = vpop.f32.mrf.mxu0  ;;  %9115 = vmatpush3.bf16.msra.mxu1 %v9701_v24  ;;  %9096 = vmatprep.subr.bf16.mxu0 %v9859_v1  ;;  %v9730_v24 = vld [vmem:[%s12032_s1 + $0xb08] sm:$0xff]   ;;  %v6049_v12 = vrot.slane %v11827_v22, 1 }
 0x2ba   : > { %v3916_v31 = vadd.f32 %v3909_v27, %v3797_v26  ;;  %v8852_v32 = vpop.f32.mrf.mxu1  ;;  %9116 = vmatprep.subr.bf16.mxu1 %v9859_v1  ;;  %9110 = vmatprep.mubr.msk.bf16.mxu0 %vm9860_vm0, %v9859_v1  ;;  %v5680_v26 = vrot.slane %v5678_v20, 1  ;;  %v5683_v27 = vshll.u32 %v11820_v19, 16  ;;  %v5808_v29 = vshrl.u32 %v7708_v17, 16 }
 0x2bb   : > { %v3793_v33 = vpop.f32.mrf.mxu0  ;;  %9130 = vmatprep.mubr.msk.bf16.mxu1 %vm9860_vm0, %v9859_v1  ;;  %v9732_v32 = vld [vmem:[%s12032_s1 + $0xb00] sm:$0xff]  }
 0x2bc   : > { %v3798_v34 = vadd.f32 %v3793_v33, %v11635_v57  ;;  %9097 = vmatpush3.bf16.msra.mxu0 %v9702_v28  ;;  %v3912_v35 = vpop.f32.mrf.mxu1  ;;  %v9731_v28 = vld [vmem:[%s12032_s1 + $0xb48] sm:$0xff]   ;;  %v5681_v33 = vor.u32 %v5680_v26, %v5676_v25 }
 0x2bd   : > { %v8833_v37 = vpop.f32.mrf.mxu0  ;;  %9117 = vmatpush3.bf16.msra.mxu1 %v9703_v30  ;;  %9098 = vmatprep.subr.bf16.mxu0 %v9859_v1  ;;  %v5812_v30 = vrot.slane %v5810_v23, 1  ;;  %v9758_v26 = vld [vmem:[%s12032_s1 + $0xc28] sm:$0xff]  }
 0x2be   : > { %v3917_v39 = vadd.f32 %v3912_v35, %v3798_v34  ;;  %9118 = vmatprep.subr.bf16.mxu1 %v9859_v1  ;;  %v8853_v40 = vpop.f32.mrf.mxu1  ;;  %v5685_v34 = vrot.slane %v5683_v27, 1  ;;  %v9733_v35 = vld [vmem:[%s12032_s1 + $0xb40] sm:$0xff]  }
 0x2c0   : > { %9099 = vmatpush3.bf16.msra.mxu0 %v9704_v36  ;;  %v5813_v36 = vor.u32 %v5812_v30, %v5808_v29  ;;  %v9759_v30 = vld [vmem:[%s12032_s1 + $0xc20] sm:$0xff]  }
 0x2c1   : > { %9119 = vmatpush3.bf16.msra.mxu1 %v9705_v38  ;;  %9100 = vmatprep.subr.bf16.mxu0 %v9859_v1  ;;  %v5686_v38 = vsel %vm485_vm1, %v5681_v33, %v5685_v34  ;;  %v9761_v33 = vld [vmem:[%s12032_s1 + $0xc10] sm:$0xff]  }
 0x2c2   : > { %9120 = vmatprep.subr.bf16.mxu1 %v9859_v1 }
 0x2c4   : > { %9101 = vmatpush3.bf16.msra.mxu0 %v9706_v41  ;;  %v9739_v41 = vld [vmem:[%s12032_s1 + $0xbf8] sm:$0xff]  }
 0x2c5   : > { %9121 = vmatpush3.bf16.msra.mxu1 %v9707_v42  ;;  %9102 = vmatprep.subr.bf16.mxu0 %v9859_v1 }
 0x2c6   : > { %9122 = vmatprep.subr.bf16.mxu1 %v9859_v1 }
 0x2c8   : > { %9103 = vmatpush3.bf16.msra.mxu0 %v9708_v43 }
 0x2c9   : > { %9123 = vmatpush3.bf16.msra.mxu1 %v9709_v44  ;;  %9104 = vmatprep.subr.bf16.mxu0 %v9859_v1 }
 0x2ca   : > { %9124 = vmatprep.subr.bf16.mxu1 %v9859_v1 }
 0x2cc   : > { %9105 = vmatpush3.bf16.msra.mxu0 %v9710_v45  ;;  %v9740_v45 = vld [vmem:[%s12032_s1 + $0xbb0] sm:$0xff]  }
 0x2cd   : > { %9125 = vmatpush3.bf16.msra.mxu1 %v9711_v46  ;;  %9106 = vmatprep.subr.bf16.mxu0 %v9859_v1 }
 0x2ce   : > { %9126 = vmatprep.subr.bf16.mxu1 %v9859_v1 }
 0x2d0   : > { %9107 = vmatpush3.bf16.msra.mxu0 %v9712_v47  ;;  %v9741_v47 = vld [vmem:[%s12032_s1 + $0xbf0] sm:$0xff]  }
 0x2d1   : > { %9127 = vmatpush3.bf16.msra.mxu1 %v9713_v48  ;;  %9108 = vmatprep.subr.bf16.mxu0 %v9859_v1 }
 0x2d2   : > { %9128 = vmatprep.subr.bf16.mxu1 %v9859_v1 }
 0x2d4   : > { %9109 = vmatpush3.bf16.msra.mxu0 %v9714_v49 }
 0x2d5   : > { %9129 = vmatpush3.bf16.msra.mxu1 %v9715_v50  ;;  %9134 = vmatprep.subr.bf16.mxu0 %v9859_v1 }
 0x2d6   : > { %9154 = vmatprep.subr.bf16.mxu1 %v9859_v1 }
 0x2d7   : > { %v4041_v55 = vpop.f32.mrf.mxu0  ;;  %9111 = vmatmul.mubr.bf16.vlgmr.msra.gmra.mxu0 %v9716_v51 }
 0x2d8   : > { %v4048_v56 = vadd.f32 %v4041_v55, %v3916_v31  ;;  %9135 = vmatpush3.bf16.msra.mxu0 %v9717_v52  ;;  %v4173_v57 = vpop.f32.mrf.mxu1  ;;  %9131 = vmatmul.mubr.bf16.vlgmr.msra.gmra.mxu1 %v9718_v53  ;;  %v5815_v31 = vshll.u32 %v11827_v22, 16  ;;  %v9742_v53 = vld [vmem:[%s12032_s1 + $0xba8] sm:$0xff]  }
 0x2d9   : > { %v8872_v59 = vpop.f32.mrf.mxu0  ;;  %9155 = vmatpush3.bf16.msra.mxu1 %v9719_v54  ;;  %9136 = vmatprep.subr.bf16.mxu0 %v9859_v1  ;;  %v9743_v55 = vld [vmem:[%s12032_s1 + $0xbe8] sm:$0xff]  }
 0x2da   : > { %v11773_v61 = vadd.f32 %v4173_v57, %v4048_v56  ;;  %v8892_v62 = vpop.f32.mrf.mxu1  ;;  %9156 = vmatprep.subr.bf16.mxu1 %v9859_v1  ;;  %9150 = vmatprep.mubr.msk.bf16.mxu0 %vm9860_vm0, %v9859_v1  ;;  %v5817_v37 = vrot.slane %v5815_v31, 1  ;;  %v9745_v59 = vld [vmem:[%s12032_s1 + $0xbe0] sm:$0xff]   ;;  %v9760_v31 = vld [vmem:[%s12032_s1 + $0xc18] sm:$0xff]  }
 0x2db   : > { %v4044_v63 = vpop.f32.mrf.mxu0  ;;  %9170 = vmatprep.mubr.msk.bf16.mxu1 %vm9860_vm0, %v9859_v1  ;;  %v9748_v62 = vld [vmem:[%s12032_s1 + $0xb90] sm:$0xff]  }
 0x2dc   : > { %v4049_v0 = vadd.f32 %v4044_v63, %v3917_v39  ;;  %9137 = vmatpush3.bf16.msra.mxu0 %v9720_v58  ;;  %v4176_v2 = vpop.f32.mrf.mxu1  ;;  %v9736_v39 = vld [vmem:[%s12032_s1 + $0xbb8] sm:$0xff]   ;;  %v5818_v40 = vsel %vm485_vm1, %v5813_v36, %v5817_v37  ;;  %v9744_v58 = vld [vmem:[%s12032_s1 + $0xba0] sm:$0xff]   ;;  %v9749_v63 = vld [vmem:[%s12032_s1 + $0xbd0] sm:$0xff]  }
 0x2dd   : > { %v8873_v4 = vpop.f32.mrf.mxu0  ;;  %9157 = vmatpush3.bf16.msra.mxu1 %v9721_v60  ;;  %9138 = vmatprep.subr.bf16.mxu0 %v9859_v1  ;;  %v9746_v60 = vld [vmem:[%s12032_s1 + $0xb98] sm:$0xff]  }
 0x2de   : > { %v11787_v5 = vadd.f32 %v4176_v2, %v4049_v0  ;;  %9158 = vmatprep.subr.bf16.mxu1 %v9859_v1  ;;  %v8893_v7 = vpop.f32.mrf.mxu1  ;;  %v7718_v0 = vld [vmem:[%s10004_s28 + $0x24] sm:$0xe]  ;;  %v7744_v2 = vld [vmem:[%s10004_s28 + $0x108] sm:$0xe] }
 0x2df   : > { %v7735_v4 = vcombine.low %v7718_v0, %v11799_v11  ;;  %v9752_v7 = vld [vmem:[%s12032_s1 + $0xb80] sm:$0xff]  }
 0x2e0   : > { %9139 = vmatpush3.bf16.msra.mxu0 %v9722_v3  ;;  %v9750_v3 = vld [vmem:[%s12032_s1 + $0xb88] sm:$0xff]  }
 0x2e1   : > { %9159 = vmatpush3.bf16.msra.mxu1 %v9723_v6  ;;  %9140 = vmatprep.subr.bf16.mxu0 %v9859_v1  ;;  %v9751_v6 = vld [vmem:[%s12032_s1 + $0xbc8] sm:$0xff]   ;;  %v6165_v34 = vshrl.u32 %v7735_v4, 16 }
 0x2e2   : > { %9160 = vmatprep.subr.bf16.mxu1 %v9859_v1 }
 0x2e4   : > { %9141 = vmatpush3.bf16.msra.mxu0 %v9724_v8  ;;  %v5932_v8 = vrot.slane %v7735_v4, 1 }
 0x2e5   : > { %9161 = vmatpush3.bf16.msra.mxu1 %v9725_v9  ;;  %9142 = vmatprep.subr.bf16.mxu0 %v9859_v1  ;;  %v5933_v9 = vrot.slane %v11820_v19, 1  ;;  %v9757_v19 = vld [vmem:[%s12032_s1 + $0xc30] sm:$0xff]  }
 0x2e6   : > { %9162 = vmatprep.subr.bf16.mxu1 %v9859_v1 }
 0x2e8   : > { %9143 = vmatpush3.bf16.msra.mxu0 %v9726_v14  ;;  %v9755_v14 = vld [vmem:[%s12032_s1 + $0xc38] sm:$0xff]  }
 0x2e9   : > { %9163 = vmatpush3.bf16.msra.mxu1 %v9727_v16  ;;  %9144 = vmatprep.subr.bf16.mxu0 %v9859_v1 }
 0x2ea   : > { %9164 = vmatprep.subr.bf16.mxu1 %v9859_v1 }
 0x2ec   : > { %9145 = vmatpush3.bf16.msra.mxu0 %v9728_v18 }
 0x2ed   : > { %9165 = vmatpush3.bf16.msra.mxu1 %v9729_v21  ;;  %9146 = vmatprep.subr.bf16.mxu0 %v9859_v1 }
 0x2ee   : > { %9166 = vmatprep.subr.bf16.mxu1 %v9859_v1 }
 0x2f0   : > { %9147 = vmatpush3.bf16.msra.mxu0 %v9730_v24 }
 0x2f1   : > { %9167 = vmatpush3.bf16.msra.mxu1 %v9731_v28  ;;  %9148 = vmatprep.subr.bf16.mxu0 %v9859_v1 }
 0x2f2   : > { %9168 = vmatprep.subr.bf16.mxu1 %v9859_v1 }
 0x2f4   : > { %9149 = vmatpush3.bf16.msra.mxu0 %v9732_v32  ;;  %v9764_v32 = vld [vmem:[%s10004_s28 + $0x2c] ss:$0 sps:$4 sm:$0x33]   ;;  %s9765_s28 = scalar_lea.vmem %s11978_s8, 128 }
 0x2f5   : > { %9169 = vmatpush3.bf16.msra.mxu1 %v9733_v35  ;;  %9174 = vmatprep.subr.bf16.mxu0 %v9859_v1  ;;  %v6168_v35 = vshll.u32 %v7735_v4, 16  ;;  %v6173_v36 = vshrl.u32 %v9764_v32, 16  ;;  %v6176_v37 = vshll.u32 %v9764_v32, 16  ;;  %p9766_p13 = scmp.ne.s32.totalorder %s11978_s8, %s9765_s28  ;;  %p9773_p4 = scmp.lt.s32.totalorder %s9771_s24, %s9765_s28 }
 0x2f6   : > { %9194 = vmatprep.subr.bf16.mxu1 %v9859_v1 }
 0x2f7   : > { %v4289_v42 = vpop.f32.mrf.mxu0  ;;  %9151 = vmatmul.mubr.bf16.vlgmr.msra.gmra.mxu0 %v5686_v38  ;;  %v9762_v38 = vld [vmem:[%s12032_s1 + $0xc08] sm:$0xff]   ;;  %p9767_p0 = pnand %p9766_p13, %p9935_p3  ;;  %p9774_p5 = por %p9773_p4, %p9772_p2 }
 0x2f8   : > { %v4296_v43 = vadd.f32 %v4289_v42, %v11773_v61  ;;  %9175 = vmatpush3.bf16.msra.mxu0 %v9736_v39  ;;  %v4405_v44 = vpop.f32.mrf.mxu1  ;;  %9171 = vmatmul.mubr.bf16.vlgmr.msra.gmra.mxu1 %v5818_v40  ;;  %v9747_v61 = vld [vmem:[%s12032_s1 + $0xbd8] sm:$0xff]   ;;  %v6167_v39 = vrot.slane %v6165_v34, 1  ;;  %v6170_v40 = vrot.slane %v6168_v35, 2  ;;  %v6178_v42 = vrot.slane %v6176_v37, 2 }
 0x2f9   : > { %v8912_v46 = vpop.f32.mrf.mxu0  ;;  %9195 = vmatpush3.bf16.msra.mxu1 %v9739_v41  ;;  %9176 = vmatprep.subr.bf16.mxu0 %v9859_v1  ;;  %v6175_v41 = vrot.slane %v6173_v36, 1  ;;  %p9768_p1 = pneg %p9767_p0 }
 0x2fa   : > { %v11866_v48 = vadd.f32 %v4405_v44, %v4296_v43  ;;  %v8932_v49 = vpop.f32.mrf.mxu1  ;;  %9196 = vmatprep.subr.bf16.mxu1 %v9859_v1  ;;  %9190 = vmatprep.mubr.msk.bf16.mxu0 %vm9860_vm0, %v9859_v1  ;;  %v9763_v43 = vld [vmem:[%s12032_s1 + $0xc00] sm:$0xff]   ;;  %v6171_v44 = vor.u32 %v6170_v40, %v6167_v39 }
 0x2fb   : > { %v4292_v50 = vpop.f32.mrf.mxu0  ;;  %9210 = vmatprep.mubr.msk.bf16.mxu1 %vm9860_vm0, %v9859_v1  ;;  %p9775_p6 = pnand %p9774_p5, %p9768_p1 }
 0x2fc   : > { %v4297_v51 = vadd.f32 %v4292_v50, %v11787_v5  ;;  %9177 = vmatpush3.bf16.msra.mxu0 %v9740_v45  ;;  %v4408_v52 = vpop.f32.mrf.mxu1  ;;  %v7761_v5 = vcombine.low %v7744_v2, %v11804_v13  ;;  %v5934_v13 = vsel %vm743_vm2, %v5932_v8, %v5933_v9  ;;  %v6179_v45 = vor.u32 %v6178_v42, %v6175_v41 }
 0x2fd   : > { %v8913_v54 = vpop.f32.mrf.mxu0  ;;  %9197 = vmatpush3.bf16.msra.mxu1 %v9741_v47  ;;  %9178 = vmatprep.subr.bf16.mxu0 %v9859_v1 }
 0x2fe   : > { %v4413_v56 = vadd.f32 %v4408_v52, %v4297_v51  ;;  %9198 = vmatprep.subr.bf16.mxu1 %v9859_v1  ;;  %v8933_v57 = vpop.f32.mrf.mxu1  ;;  %v6048_v11 = vrot.slane %v7761_v5, 1  ;;  %v6180_v46 = vsel %vm976_vm3, %v6171_v44, %v6179_v45 }
 0x300   : > { %9179 = vmatpush3.bf16.msra.mxu0 %v9742_v53  ;;  %v6050_v15 = vsel %vm743_vm2, %v6048_v11, %v6049_v12 }
 0x301   : > { %9199 = vmatpush3.bf16.msra.mxu1 %v9743_v55  ;;  %9180 = vmatprep.subr.bf16.mxu0 %v9859_v1 }
 0x302   : > { %9200 = vmatprep.subr.bf16.mxu1 %v9859_v1 }
 0x304   : > { %9181 = vmatpush3.bf16.msra.mxu0 %v9744_v58 }
 0x305   : > { %9201 = vmatpush3.bf16.msra.mxu1 %v9745_v59  ;;  %9182 = vmatprep.subr.bf16.mxu0 %v9859_v1 }
 0x306   : > { %9202 = vmatprep.subr.bf16.mxu1 %v9859_v1 }
 0x308   : > { %9183 = vmatpush3.bf16.msra.mxu0 %v9746_v60 }
 0x309   : > { %9203 = vmatpush3.bf16.msra.mxu1 %v9747_v61  ;;  %9184 = vmatprep.subr.bf16.mxu0 %v9859_v1 }
 0x30a   : > { %9204 = vmatprep.subr.bf16.mxu1 %v9859_v1 }
 0x30c   : > { %9185 = vmatpush3.bf16.msra.mxu0 %v9748_v62 }
 0x30d   : > { %9205 = vmatpush3.bf16.msra.mxu1 %v9749_v63  ;;  %9186 = vmatprep.subr.bf16.mxu0 %v9859_v1 }
 0x30e   : > { %9206 = vmatprep.subr.bf16.mxu1 %v9859_v1 }
 0x310   : > { %9187 = vmatpush3.bf16.msra.mxu0 %v9750_v3 }
 0x311   : > { %9207 = vmatpush3.bf16.msra.mxu1 %v9751_v6  ;;  %9188 = vmatprep.subr.bf16.mxu0 %v9859_v1 }
 0x312   : > { %9208 = vmatprep.subr.bf16.mxu1 %v9859_v1 }
 0x314   : > { %9189 = vmatpush3.bf16.msra.mxu0 %v9752_v7 }
 0x315   : > { %9209 = vmatpush3.bf16.msra.mxu1 %v9753_v10  ;;  %9214 = vmatprep.subr.bf16.mxu0 %v9859_v1 }
 0x317   : > { %v4535_v16 = vpop.f32.mrf.mxu0  ;;  %9191 = vmatmul.mubr.bf16.vlgmr.msra.gmra.mxu0 %v5934_v13 }
 0x318   : > { %v4542_v17 = vadd.f32 %v4535_v16, %v11866_v48  ;;  %9215 = vmatpush3.bf16.msra.mxu0 %v9755_v14  ;;  %v4654_v18 = vpop.f32.mrf.mxu1  ;;  %9211 = vmatmul.mubr.bf16.vlgmr.msra.gmra.mxu1 %v6050_v15 }
 0x319   : > { %v8952_v20 = vpop.f32.mrf.mxu0  ;;  %9216 = vmatprep.subr.bf16.mxu0 %v9859_v1  ;;  %9230 = vmatprep.mubr.msk.bf16.mxu0 %vm9860_vm0, %v9859_v1 }
 0x31a   : > { %v4661_v21 = vadd.f32 %v4654_v18, %v4542_v17  ;;  %v8972_v22 = vpop.f32.mrf.mxu1 }
 0x31b   : > { %v4538_v23 = vpop.f32.mrf.mxu0 }
 0x31c   : > { %v4543_v24 = vadd.f32 %v4538_v23, %v4413_v56  ;;  %9217 = vmatpush3.bf16.msra.mxu0 %v9757_v19  ;;  %v4657_v25 = vpop.f32.mrf.mxu1 }
 0x31d   : > { %v8953_v27 = vpop.f32.mrf.mxu0  ;;  %9218 = vmatprep.subr.bf16.mxu0 %v9859_v1 }
 0x31e   : > { %v4662_v28 = vadd.f32 %v4657_v25, %v4543_v24  ;;  %v8973_v29 = vpop.f32.mrf.mxu1 }
 0x320   : > { %9219 = vmatpush3.bf16.msra.mxu0 %v9758_v26 }
 0x321   : > { %9220 = vmatprep.subr.bf16.mxu0 %v9859_v1 }
 0x324   : > { %9221 = vmatpush3.bf16.msra.mxu0 %v9759_v30 }
 0x325   : > { %9222 = vmatprep.subr.bf16.mxu0 %v9859_v1 }
 0x328   : > { %9223 = vmatpush3.bf16.msra.mxu0 %v9760_v31 }
 0x329   : > { %9224 = vmatprep.subr.bf16.mxu0 %v9859_v1 }
 0x32c   : > { %9225 = vmatpush3.bf16.msra.mxu0 %v9761_v33 }
 0x32d   : > { %9226 = vmatprep.subr.bf16.mxu0 %v9859_v1 }
 0x330   : > { %9227 = vmatpush3.bf16.msra.mxu0 %v9762_v38 }
 0x331   : > { %9228 = vmatprep.subr.bf16.mxu0 %v9859_v1 }
 0x334   : > { %9229 = vmatpush3.bf16.msra.mxu0 %v9763_v43 }
 0x337   : > { %v4773_v47 = vpop.f32.mrf.mxu0  ;;  %9231 = vmatmul.mubr.bf16.vlgmr.msra.gmra.mxu0 %v6180_v46 }
 0x338   : > { %v4780_v48 = vadd.f32 %v4773_v47, %v4661_v21  ;;  %v4905_v49 = vpop.f32.mrf.mxu1 }
 0x339   : > { %v8992_v50 = vpop.f32.mrf.mxu0 }
 0x33a   : > { %v4912_v51 = vadd.f32 %v4905_v49, %v4780_v48  ;;  %v9012_v52 = vpop.f32.mrf.mxu1 }
 0x33b   : > { %v4776_v53 = vpop.f32.mrf.mxu0 }
 0x33c   : > { %v4781_v54 = vadd.f32 %v4776_v53, %v4662_v28  ;;  %v4908_v55 = vpop.f32.mrf.mxu1 }
 0x33d   : > { %v8993_v56 = vpop.f32.mrf.mxu0 }
 0x33e   : > { %v4913_v57 = vadd.f32 %v4908_v55, %v4781_v54  ;;  %v9013_v58 = vpop.f32.mrf.mxu1  ;;  %v7796_v56 = vld [vmem:[%s12033_s2] ss:$0 sm:$0xff] }
 0x357   : > { %v5037_v59 = vpop.f32.mrf.mxu0 }
 0x358   : > { %v5044_v60 = vadd.f32 %v5037_v59, %v4912_v51  ;;  %v5153_v61 = vpop.f32.mrf.mxu1 }
 0x359   : > { %v9032_v1 = vpop.f32.mrf.mxu0 }
 0x35a   : > { %v5160_v62 = vadd.f32 %v5153_v61, %v5044_v60  ;;  %v9052_v63 = vpop.f32.mrf.mxu1 }
 0x35b   : > { %v5040_v0 = vpop.f32.mrf.mxu0 }
 0x35c   : > { %v5045_v2 = vadd.f32 %v5040_v0, %v4913_v57  ;;  %v5156_v3 = vpop.f32.mrf.mxu1 }
 0x35d   : > { %v9033_v4 = vpop.f32.mrf.mxu0 }
 0x35e   : > { %v5161_v6 = vadd.f32 %v5156_v3, %v5045_v2  ;;  %v9053_v5 = vpop.f32.mrf.mxu1 }
 0x377   : > { %v5269_v7 = vpop.f32.mrf.mxu0 }
 0x378   : > { %v5276_v8 = vadd.f32 %v5269_v7, %v5160_v62  ;;  %v5399_v9 = vpop.f32.mrf.mxu1 }
 0x379   : > { %v9072_v10 = vpop.f32.mrf.mxu0 }
 0x37a   : > { %v5406_v11 = vadd.f32 %v5399_v9, %v5276_v8  ;;  %v9092_v12 = vpop.f32.mrf.mxu1 }
 0x37b   : > { %v5272_v13 = vpop.f32.mrf.mxu0 }
 0x37c   : > { %v5277_v14 = vadd.f32 %v5272_v13, %v5161_v6  ;;  %v5402_v15 = vpop.f32.mrf.mxu1 }
 0x37d   : > { %v9073_v16 = vpop.f32.mrf.mxu0 }
 0x37e   : > { %v5407_v17 = vadd.f32 %v5402_v15, %v5277_v14  ;;  %v9093_v18 = vpop.f32.mrf.mxu1 }
 0x397   : > { %v5519_v19 = vpop.f32.mrf.mxu0 }
 0x398   : > { %v5526_v20 = vadd.f32 %v5519_v19, %v5406_v11  ;;  %v5638_v21 = vpop.f32.mrf.mxu1 }
 0x399   : > { %v9112_v22 = vpop.f32.mrf.mxu0 }
 0x39a   : > { %v5645_v23 = vadd.f32 %v5638_v21, %v5526_v20  ;;  %v9132_v24 = vpop.f32.mrf.mxu1 }
 0x39b   : > { %v5522_v25 = vpop.f32.mrf.mxu0 }
 0x39c   : > { %v5527_v26 = vadd.f32 %v5522_v25, %v5407_v17  ;;  %v5641_v27 = vpop.f32.mrf.mxu1 }
 0x39d   : > { %v9113_v28 = vpop.f32.mrf.mxu0 }
 0x39e   : > { %v5646_v29 = vadd.f32 %v5641_v27, %v5527_v26  ;;  %v9133_v30 = vpop.f32.mrf.mxu1 }
 0x3b7   : > { %v5770_v31 = vpop.f32.mrf.mxu0 }
 0x3b8   : > { %v5902_v32 = vpop.f32.mrf.mxu1  ;;  %v5777_v47 = vadd.f32 %v5770_v31, %v5645_v23 }
 0x3b9   : > { %v9152_v33 = vpop.f32.mrf.mxu0 }
 0x3ba   : > { %v9172_v34 = vpop.f32.mrf.mxu1  ;;  %v5909_v48 = vadd.f32 %v5902_v32, %v5777_v47 }
 0x3bb   : > { %v5773_v35 = vpop.f32.mrf.mxu0 }
 0x3bc   : > { %v5905_v36 = vpop.f32.mrf.mxu1  ;;  %v5778_v49 = vadd.f32 %v5773_v35, %v5646_v29 }
 0x3bd   : > { %v9153_v37 = vpop.f32.mrf.mxu0 }
 0x3be   : > { %v9173_v38 = vpop.f32.mrf.mxu1  ;;  %v5910_v51 = vadd.f32 %v5905_v36, %v5778_v49 }
 0x3d7   : > { %v6018_v39 = vpop.f32.mrf.mxu0 }
 0x3d8   : > { %v6134_v40 = vpop.f32.mrf.mxu1  ;;  %v6025_v50 = vadd.f32 %v6018_v39, %v5909_v48 }
 0x3d9   : > { %v9192_v41 = vpop.f32.mrf.mxu0 }
 0x3da   : > { %v9212_v42 = vpop.f32.mrf.mxu1  ;;  %v6141_v52 = vadd.f32 %v6134_v40, %v6025_v50 }
 0x3db   : > { %v6021_v43 = vpop.f32.mrf.mxu0 }
 0x3dc   : > { %v6137_v44 = vpop.f32.mrf.mxu1  ;;  %v6026_v53 = vadd.f32 %v6021_v43, %v5910_v51 }
 0x3dd   : > { %v9193_v45 = vpop.f32.mrf.mxu0 }
 0x3de   : > { %v9213_v46 = vpop.f32.mrf.mxu1  ;;  %v6142_v58 = vadd.f32 %v6137_v44, %v6026_v53 }
 0x3f7   : > { %v6264_v54 = vpop.f32.mrf.mxu0 }
 0x3f8   : > { %v6271_v55 = vadd.f32 %v6264_v54, %v6141_v52 }
 0x3f9   : > { %v9232_v57 = vpop.f32.mrf.mxu0 }
 0x3fa   : > { %v6280_v60 = vadd.f32 %v7796_v56, %v6271_v55 }
 0x3fb   : > { %v6267_v59 = vpop.f32.mrf.mxu0 }
 0x3fc   : > { %v6272_v61 = vadd.f32 %v6267_v59, %v6142_v58  ;;  %v6282_v63 = vmax.f32 %v6280_v60, 0.0 }
 0x3fd   : > { %v9233_v1 = vpop.f32.mrf.mxu0 }
 0x3fe   : > { %v6281_v62 = vadd.f32 %v7796_v56, %v6272_v61 }
 0x400   : > { %v6283_v0 = vmax.f32 %v6281_v62, 0.0 }
 0x402   : > { %v7811_v2 = vpack.c.bf16 %v6283_v0, %v6282_v63 }
 0x404   : > { %7812 = vst [vmem:[%s210_s7] sm:$0xff] %v7811_v2  }
 0x405   : > { %9778 = shalt.err (!%p9775_p6)
}
 0x406   : > { %s9779_s20 = scalar_lea.hbm %s11976_s9, 128  ;;  %s9783_s5 = scalar_lea.hbm %s12034_s3, 4096 }
 0x407   : > { %p9780_p7 = scmp.ne.s32.totalorder %s11976_s9, %s9779_s20  ;;  %p9784_p11 = scmp.lt.s32.totalorder %s11976_s9, %s12034_s3 }
 0x408   : > { %p9785_p12 = scmp.lt.s32.totalorder %s9783_s5, %s9779_s20 }
 0x409   : > { %p9781_p9 = pnand %p9780_p7, %p9935_p3 }
 0x40a   : > { %p9786_p13 = por %p9785_p12, %p9784_p11 }
 0x40b   : > { %p9782_p10 = pneg %p9781_p9 }
 0x40d   : > { %p9787_p0 = pnand %p9786_p13, %p9782_p10 }
 0x40f   : > { %9790 = shalt.err (!%p9787_p0)
}
 0x410   : > { %s9862_s7 = smov 64   ;;  %s9863_s15 = smov 4  }
 0x411   : > { %9235 = dma.vmem_to_hbm [thread:$0]  (%p9935_p3), %s11978_s8, 128, %s11976_s9, %s11980_s10, %s9862_s7, %s9862_s7, %s9863_s15  }
 0x412 PF: > { %p9241_p1 = scmp.ge.s32.totalorder %s9857_s19, 2  ;;  %s6326_s16 = sand.u32 1, %s9829_s12  }
 0x413   : > { %s6327_s28 = scalar_lea.sflag [#allocation3], %s6326_s16 }
 0x414   : > { %p9238_p2 = pnand %p9241_p1, %p9944_p8 }
 0x416   : > { %p9239_p4 = pneg %p9238_p2 }
 0x418   : > { %9824 = dma.done.wait (%p9239_p4), %s6327_s28, 128  }
 0x419   : > { %9826 = vsyncadd (%p9239_p4), %s6327_s28, 4294967168  ;;  %s16_s19 = sadd.s32 1, %s9857_s19   ;;  %s12037_s12 = smov %s9833_s13 }
 0x41a   : > { %p13_p5 = scmp.ge.s32.totalorder %s16_s19, 34   ;;  %s12038_s13 = smov %s9837_s14 }
 0x41b   : > { %s12039_s14 = smov %s9953_s30  ;;  %s12040_s15 = smov %s9849_s17 }
 0x41c   : > { %s12041_s16 = smov %s9853_s18  ;;  %s12042_s17 = smov %s12045_s22 }
 0x41d   : > { %s12043_s18 = smov %s12049_s23  ;;  %15 = sbr.rel (!%p13_p5) target bundleno = 5 (0x5), region = 135 }
 0x422   :  { %6332 = vsyncpa [#allocation3], 1 }
 0x423   :  { %6334 = vsyncpa [#allocation3 + $0x1], 1 }

</bundles_post_ra>
